<compile_context>
chip_gen: v5e
topology: v5e:2x2
jax: 0.10.0
libtpu: 0.0.40
codegen_flags: <defaults>
</compile_context>

<pallas_src>
import math
from functools import partial

import jax
import jax.numpy as jnp
from jax.experimental import pallas as pl
from jax.experimental.pallas import tpu as pltpu

_MIB = 1024 * 1024


# --------------------------------------------------------------------------- #
# Head re-layout (single reshape + transpose, head-major for batched einsums).
# --------------------------------------------------------------------------- #
def _split_heads(t, BB, S, H, Dh):
    # (BB*S, H*Dh) -> (BB*H, S, Dh)
    t = t.reshape(BB, S, H, Dh)
    t = jnp.transpose(t, (0, 2, 1, 3))
    return t.reshape(BB * H, S, Dh)


def _merge_heads(o, BB, S, H, Dh):
    # (BB*H, S, Dh) -> (BB*S, H*Dh)
    o = o.reshape(BB, H, S, Dh)
    o = jnp.transpose(o, (0, 2, 1, 3))
    return o.reshape(BB * S, H * Dh)


# --------------------------------------------------------------------------- #
# Kernel body
# --------------------------------------------------------------------------- #
def encoder_kernel(x_ref,
                   wq_ref, bq_ref, wk_ref, bk_ref, wv_ref, bv_ref,
                   g1_ref, be1_ref, w1_ref, b1_ref, w2_ref, b2_ref,
                   g2_ref, be2_ref,
                   o_ref, *, num_heads, eps, approx_gelu):
    BB, S, E = x_ref.shape
    H = num_heads
    Dh = E // H
    bf16 = jnp.bfloat16

    # Fold the batch chunk into the matmul M dimension.
    x = x_ref[...].reshape(BB * S, E)            # (M, E) f32, M = BB*S
    x_bf = x.astype(bf16)

    # --- Q/K/V projections: bf16 MXU operands, f32 accumulation, f32 bias add ---
    q = jnp.dot(x_bf, wq_ref[...], preferred_element_type=jnp.float32) + bq_ref[...]
    k = jnp.dot(x_bf, wk_ref[...], preferred_element_type=jnp.float32) + bk_ref[...]
    v = jnp.dot(x_bf, wv_ref[...], preferred_element_type=jnp.float32) + bv_ref[...]
    q = q * jnp.float32(1.0 / math.sqrt(Dh))     # fold score scaling into the smaller tensor

    qh = _split_heads(q, BB, S, H, Dh).astype(bf16)   # (BB*H, S, Dh)
    kh = _split_heads(k, BB, S, H, Dh).astype(bf16)
    vh = _split_heads(v, BB, S, H, Dh).astype(bf16)

    # --- batched multi-head attention: one MXU stream, no per-head .T / concat ---
    # TODO(synk): flash-style key-axis tiling for long S (scores are the scaling cliff).
    s = jnp.einsum("bqd,bkd->bqk", qh, kh,
                   preferred_element_type=jnp.float32)            # (BB*H, S, S) f32
    s = s - jnp.max(s, axis=-1, keepdims=True)
    p = jnp.exp(s)
    # exact per-row reciprocal (one EUP op per row; rows sum to 1)
    p = p * pl.reciprocal(jnp.sum(p, axis=-1, keepdims=True))
    o_h = jnp.einsum("bqk,bkd->bqd", p.astype(bf16), vh,
                     preferred_element_type=jnp.float32)          # (BB*H, S, Dh) f32

    x_attn = _merge_heads(o_h, BB, S, H, Dh)                      # (M, E) f32  == x_ in PyTorch

    def layer_norm(z, g, b):
        mu = jnp.mean(z, axis=-1, keepdims=True)
        zc = z - mu
        var = jnp.mean(zc * zc, axis=-1, keepdims=True)
        return zc * jax.lax.rsqrt(var + eps) * g + b

    # --- residual + LN1 ---
    x1 = layer_norm(x + x_attn, g1_ref[...], be1_ref[...])

    # --- FFN: Linear -> GELU -> Linear, bf16 operands / f32 accumulation ---
    h1 = jnp.dot(x1.astype(bf16), w1_ref[...],
                 preferred_element_type=jnp.float32) + b1_ref[...]
    if approx_gelu:
        h1 = jax.nn.gelu(h1, approximate=True)   # tanh -> EUP slot (free next to MXU/VPU)
    else:
        h1 = 0.5 * h1 * (1.0 + jax.lax.erf(h1 * jnp.float32(1.0 / math.sqrt(2.0))))
    h2 = jnp.dot(h1.astype(bf16), w2_ref[...],
                 preferred_element_type=jnp.float32) + b2_ref[...]

    # --- residual with the *attention* output (as in the PyTorch forward) + LN2 ---
    out = layer_norm(h2 + x_attn, g2_ref[...], be2_ref[...])
    o_ref[...] = out.reshape(BB, S, E).astype(o_ref.dtype)


# --------------------------------------------------------------------------- #
# VMEM planning / grid sizing
# --------------------------------------------------------------------------- #
def _tpu_vmem_and_cores():
    """Physical per-core VMEM bytes and TensorCore count (defensive defaults)."""
    phys = 128 * _MIB
    cores = 1
    try:
        info = pltpu.get_tpu_info()
        phys = int(getattr(info, "vmem_capacity_bytes", phys)) or phys
        cores = int(getattr(info, "num_cores", 0) or 0)
        if cores <= 0:
            cores = 2 if phys <= 64 * _MIB else 1   # 64-MiB VMEM => v7x-like, 2 TCs
    except Exception:
        pass
    return phys, cores


def _estimate_vmem_bytes(bb, S, E, F, H, double_buffer_weights=False):
    """Rough per-grid-step VMEM footprint (weights + IO tiles + live activations)."""
    M = bb * S
    wbytes = 2 * (3 * E * E + 2 * E * F)               # bf16 matmul weights
    pbytes = 4 * (7 * E + F)                           # f32 biases + LN params
    if double_buffer_weights:
        wbytes *= 2
        pbytes *= 2
    io = 2 * (4 * M * E) * 2                           # x tile + out tile, double-buffered
    act = 4 * M * (12 * E + 3 * F)                     # q/k/v, head copies, x_attn, x1, h1, h2
    scores = 12 * bb * H * S * S                       # s f32 + p f32 + p bf16
    return wbytes + pbytes + io + act + scores


def _pick_batch_block(B, S, E, F, H, vmem_budget, num_cores):
    """Largest batch fold fitting the VMEM budget; on multi-core chips keep the
    grid length a multiple of the core count (megacore balance). Single-core
    chips take the biggest fold even if grid == (1,) (extra steps are pure
    serial overhead there)."""
    best = 1
    for bb in range(1, B + 1):
        if B % bb:
            continue
        steps = B // bb
        if num_cores > 1 and (B % num_cores == 0) and (steps % num_cores != 0):
            continue
        if _estimate_vmem_bytes(bb, S, E, F, H) > vmem_budget:
            continue
        best = bb
    return best


# --------------------------------------------------------------------------- #
# Wrapper
# --------------------------------------------------------------------------- #
def prepare_kernel_params(params):
    """One-time bf16 cast of the matmul weights (do NOT redo this per call)."""
    bf16 = jnp.bfloat16
    kp = dict(params)
    for name in ("wq", "wk", "wv", "w1", "w2"):
        kp[name] = params[name].astype(bf16)
    return kp


def encoder_forward(x, kp, num_heads, *, batch_block=None, approx_gelu=True,
                    single_buffer_weights=True, vmem_limit_bytes=None):
    B, S, E = x.shape
    F = kp["w1"].shape[1]
    H = num_heads
    assert E % H == 0

    phys_vmem, num_cores = _tpu_vmem_and_cores()
    # Leave headroom for Mosaic internal scratch / pipeline buffers.
    cap = 56 * _MIB if phys_vmem <= 64 * _MIB else 112 * _MIB

    if batch_block is None:
        batch_block = _pick_batch_block(B, S, E, F, H, int(cap * 0.7), num_cores)
    assert B % batch_block == 0
    grid = (B // batch_block,)

    if vmem_limit_bytes is None:
        est = _estimate_vmem_bytes(batch_block, S, E, F, H,
                                   double_buffer_weights=not single_buffer_weights)
        vmem_limit_bytes = max(32 * _MIB, min(cap, int(est * 1.5) + 8 * _MIB))

    def weight_spec(shape):
        # Constant index_map -> block index never changes -> fetched once.
        idx = lambda g: (0,) * len(shape)
        if single_buffer_weights:
            return pl.BlockSpec(shape, idx, pipeline_mode=pl.Buffered(1))
        return pl.BlockSpec(shape, idx)

    in_specs = [
        pl.BlockSpec((batch_block, S, E), lambda g: (g, 0, 0)),  # x
        weight_spec((E, E)), weight_spec((1, E)),    # Wq, bq
        weight_spec((E, E)), weight_spec((1, E)),    # Wk, bk
        weight_spec((E, E)), weight_spec((1, E)),    # Wv, bv
        weight_spec((1, E)), weight_spec((1, E)),    # LN1 gamma, beta
        weight_spec((E, F)), weight_spec((1, F)),    # fc1 W, b
        weight_spec((F, E)), weight_spec((1, E)),    # fc2 W, b
        weight_spec((1, E)), weight_spec((1, E)),    # LN2 gamma, beta
    ]
    out_spec = pl.BlockSpec((batch_block, S, E), lambda g: (g, 0, 0))

    kernel = partial(encoder_kernel, num_heads=H, eps=1e-5, approx_gelu=approx_gelu)

    return pl.pallas_call(
        kernel,
        out_shape=jax.ShapeDtypeStruct((B, S, E), x.dtype),
        grid_spec=pltpu.PrefetchScalarGridSpec(
            num_scalar_prefetch=0,
            grid=grid,
            in_specs=in_specs,
            out_specs=out_spec,
        ),
        compiler_params=pltpu.CompilerParams(
            dimension_semantics=("parallel",),
            vmem_limit_bytes=int(vmem_limit_bytes),
        ),
    )(x,
      kp["wq"], kp["bq"], kp["wk"], kp["bk"], kp["wv"], kp["bv"],
      kp["g1"], kp["be1"],
      kp["w1"], kp["b1"], kp["w2"], kp["b2"],
      kp["g2"], kp["be2"])


# --------------------------------------------------------------------------- #
# Parameters + pure-JAX reference
# --------------------------------------------------------------------------- #
def make_params(key, E, F):
    ks = jax.random.split(key, 10)
    std = 0.02
    return {
        "wq": jax.random.normal(ks[0], (E, E), jnp.float32) * std,
        "bq": jax.random.normal(ks[1], (1, E), jnp.float32) * std,
        "wk": jax.random.normal(ks[2], (E, E), jnp.float32) * std,
        "bk": jax.random.normal(ks[3], (1, E), jnp.float32) * std,
        "wv": jax.random.normal(ks[4], (E, E), jnp.float32) * std,
        "bv": jax.random.normal(ks[5], (1, E), jnp.float32) * std,
        "g1": jnp.ones((1, E), jnp.float32),
        "be1": jnp.zeros((1, E), jnp.float32),
        "w1": jax.random.normal(ks[6], (E, F), jnp.float32) * std,
        "b1": jax.random.normal(ks[7], (1, F), jnp.float32) * std,
        "w2": jax.random.normal(ks[8], (F, E), jnp.float32) * std,
        "b2": jax.random.normal(ks[9], (1, E), jnp.float32) * std,
        "g2": jnp.ones((1, E), jnp.float32),
        "be2": jnp.zeros((1, E), jnp.float32),
    }


def encoder_reference(x, p, num_heads):
    """Pure-JAX f32 mirror of the PyTorch forward (exact-erf GELU)."""
    B, S, E = x.shape
    Dh = E // num_heads
    eps = 1e-5

    def mha(xin):
        q = xin @ p["wq"] + p["bq"][0]
        k = xin @ p["wk"] + p["bk"][0]
        v = xin @ p["wv"] + p["bv"][0]

        def split_heads(t):
            t = t.reshape(B, S, num_heads, Dh).transpose(0, 2, 1, 3)
            return t.reshape(B * num_heads, S, Dh)

        q, k, v = split_heads(q), split_heads(k), split_heads(v)
        att = jnp.einsum("bqd,bkd->bqk", q, k) / math.sqrt(Dh)
        att = jax.nn.softmax(att, axis=-1)
        o = jnp.einsum("bqk,bkd->bqd", att, v)
        o = o.reshape(B, num_heads, S, Dh).transpose(0, 2, 1, 3).reshape(B, S, E)
        return o

    def ln(z, g, b):
        mu = jnp.mean(z, axis=-1, keepdims=True)
        var = jnp.mean((z - mu) ** 2, axis=-1, keepdims=True)
        return (z - mu) / jnp.sqrt(var + eps) * g[0] + b[0]

    x_ = mha(x)
    y = ln(x + x_, p["g1"], p["be1"])
    h = y @ p["w1"] + p["b1"][0]
    h = 0.5 * h * (1.0 + jax.lax.erf(h / math.sqrt(2.0)))
    h = h @ p["w2"] + p["b2"][0]
    return ln(h + x_, p["g2"], p["be2"])


if __name__ == "__main__":
    B, S, E, H, F = 2, 8, 32, 4, 64
    key = jax.random.PRNGKey(0)
    kx, kp_key = jax.random.split(key)
    x = jax.random.normal(kx, (B, S, E), jnp.float32)
    params = make_params(kp_key, E, F)
    kparams = prepare_kernel_params(params)   # bf16 weight cast happens exactly once

    ref = encoder_reference(x, params, num_heads=H)

    # Preferred config: single-buffered constant weights (pl.Buffered(1)).
    # Fallback: default double-buffered specs if this build rejects buffer_count=1.
    # Tolerance: bf16 MXU operands + tanh GELU give ~1e-2-level deltas vs the
    # f32 exact-erf reference (amplified by LayerNorm2 on a small-variance stream).
    last_err = None
    for single_buf in (True, False):
        try:
            out = jax.block_until_ready(
                encoder_forward(x, kparams, num_heads=H,
                                single_buffer_weights=single_buf))
        except Exception as e:   # lowering rejected -> try the fallback spec
            last_err = e
            continue
        if out.shape == ref.shape and bool(
                jnp.allclose(out, ref, atol=5e-2, rtol=5e-2)):
            print("KERNEL_OK")
            break
        last_err = AssertionError(
            f"single_buffer_weights={single_buf}: mismatch vs reference")
    else:
        raise last_err
</pallas_src>

<mosaic_0001>
module attributes {stable_mosaic.version = 11 : i64} {
  func.func @encoder_kernel(%arg0: i32, %arg1: memref<2x8x32xf32, #tpu.memory_space<vmem>>, %arg2: memref<32x32xbf16, #tpu.memory_space<vmem>>, %arg3: memref<1x32xf32, #tpu.memory_space<vmem>>, %arg4: memref<32x32xbf16, #tpu.memory_space<vmem>>, %arg5: memref<1x32xf32, #tpu.memory_space<vmem>>, %arg6: memref<32x32xbf16, #tpu.memory_space<vmem>>, %arg7: memref<1x32xf32, #tpu.memory_space<vmem>>, %arg8: memref<1x32xf32, #tpu.memory_space<vmem>>, %arg9: memref<1x32xf32, #tpu.memory_space<vmem>>, %arg10: memref<32x64xbf16, #tpu.memory_space<vmem>>, %arg11: memref<1x64xf32, #tpu.memory_space<vmem>>, %arg12: memref<64x32xbf16, #tpu.memory_space<vmem>>, %arg13: memref<1x32xf32, #tpu.memory_space<vmem>>, %arg14: memref<1x32xf32, #tpu.memory_space<vmem>>, %arg15: memref<1x32xf32, #tpu.memory_space<vmem>>, %arg16: memref<2x8x32xf32, #tpu.memory_space<vmem>>) attributes {dimension_semantics = [#tpu.dimension_semantics<parallel>], iteration_bounds = array<i64: 1>, scalar_prefetch = 0 : i64, scratch_operands = 0 : i64, tpu.core_type = #tpu.core_type<tc>, window_params = [{transform_indices = @transform_0, window_bounds = array<i64: 2, 8, 32>}, {pipeline_mode = #tpu.pipeline_mode<synchronous>, transform_indices = @transform_1, window_bounds = array<i64: 32, 32>}, {pipeline_mode = #tpu.pipeline_mode<synchronous>, transform_indices = @transform_2, window_bounds = array<i64: 1, 32>}, {pipeline_mode = #tpu.pipeline_mode<synchronous>, transform_indices = @transform_3, window_bounds = array<i64: 32, 32>}, {pipeline_mode = #tpu.pipeline_mode<synchronous>, transform_indices = @transform_4, window_bounds = array<i64: 1, 32>}, {pipeline_mode = #tpu.pipeline_mode<synchronous>, transform_indices = @transform_5, window_bounds = array<i64: 32, 32>}, {pipeline_mode = #tpu.pipeline_mode<synchronous>, transform_indices = @transform_6, window_bounds = array<i64: 1, 32>}, {pipeline_mode = #tpu.pipeline_mode<synchronous>, transform_indices = @transform_7, window_bounds = array<i64: 1, 32>}, {pipeline_mode = #tpu.pipeline_mode<synchronous>, transform_indices = @transform_8, window_bounds = array<i64: 1, 32>}, {pipeline_mode = #tpu.pipeline_mode<synchronous>, transform_indices = @transform_9, window_bounds = array<i64: 32, 64>}, {pipeline_mode = #tpu.pipeline_mode<synchronous>, transform_indices = @transform_10, window_bounds = array<i64: 1, 64>}, {pipeline_mode = #tpu.pipeline_mode<synchronous>, transform_indices = @transform_11, window_bounds = array<i64: 64, 32>}, {pipeline_mode = #tpu.pipeline_mode<synchronous>, transform_indices = @transform_12, window_bounds = array<i64: 1, 32>}, {pipeline_mode = #tpu.pipeline_mode<synchronous>, transform_indices = @transform_13, window_bounds = array<i64: 1, 32>}, {pipeline_mode = #tpu.pipeline_mode<synchronous>, transform_indices = @transform_14, window_bounds = array<i64: 1, 32>}, {transform_indices = @transform_15, window_bounds = array<i64: 2, 8, 32>}]} {
    %c0 = arith.constant 0 : index
    %c0_0 = arith.constant 0 : index
    %c0_1 = arith.constant 0 : index
    %0 = vector.load %arg1[%c0, %c0_0, %c0_1] : memref<2x8x32xf32, #tpu.memory_space<vmem>>, vector<2x8x32xf32>
    %1 = vector.shape_cast %0 : vector<2x8x32xf32> to vector<16x32xf32>
    %2 = arith.truncf %1 : vector<16x32xf32> to vector<16x32xbf16>
    %c0_2 = arith.constant 0 : index
    %c0_3 = arith.constant 0 : index
    %3 = vector.load %arg2[%c0_2, %c0_3] : memref<32x32xbf16, #tpu.memory_space<vmem>>, vector<32x32xbf16>
    %cst = arith.constant dense<0.000000e+00> : vector<16x32xf32>
    %4 = tpu.matmul %2, %3, %cst {dimension_numbers = #tpu.dot_dimension_numbers<[1], [0], [0], [1], [0, 0, 1, 1], [], []>} : vector<16x32xbf16>, vector<32x32xbf16>, vector<16x32xf32> -> vector<16x32xf32>
    %c0_4 = arith.constant 0 : index
    %c0_5 = arith.constant 0 : index
    %5 = vector.load %arg3[%c0_4, %c0_5] : memref<1x32xf32, #tpu.memory_space<vmem>>, vector<1x32xf32>
    %6 = vector.broadcast %5 : vector<1x32xf32> to vector<16x32xf32>
    %7 = arith.addf %4, %6 : vector<16x32xf32>
    %c0_6 = arith.constant 0 : index
    %c0_7 = arith.constant 0 : index
    %8 = vector.load %arg4[%c0_6, %c0_7] : memref<32x32xbf16, #tpu.memory_space<vmem>>, vector<32x32xbf16>
    %cst_8 = arith.constant dense<0.000000e+00> : vector<16x32xf32>
    %9 = tpu.matmul %2, %8, %cst_8 {dimension_numbers = #tpu.dot_dimension_numbers<[1], [0], [0], [1], [0, 0, 1, 1], [], []>} : vector<16x32xbf16>, vector<32x32xbf16>, vector<16x32xf32> -> vector<16x32xf32>
    %c0_9 = arith.constant 0 : index
    %c0_10 = arith.constant 0 : index
    %10 = vector.load %arg5[%c0_9, %c0_10] : memref<1x32xf32, #tpu.memory_space<vmem>>, vector<1x32xf32>
    %11 = vector.broadcast %10 : vector<1x32xf32> to vector<16x32xf32>
    %12 = arith.addf %9, %11 : vector<16x32xf32>
    %c0_11 = arith.constant 0 : index
    %c0_12 = arith.constant 0 : index
    %13 = vector.load %arg6[%c0_11, %c0_12] : memref<32x32xbf16, #tpu.memory_space<vmem>>, vector<32x32xbf16>
    %cst_13 = arith.constant dense<0.000000e+00> : vector<16x32xf32>
    %14 = tpu.matmul %2, %13, %cst_13 {dimension_numbers = #tpu.dot_dimension_numbers<[1], [0], [0], [1], [0, 0, 1, 1], [], []>} : vector<16x32xbf16>, vector<32x32xbf16>, vector<16x32xf32> -> vector<16x32xf32>
    %c0_14 = arith.constant 0 : index
    %c0_15 = arith.constant 0 : index
    %15 = vector.load %arg7[%c0_14, %c0_15] : memref<1x32xf32, #tpu.memory_space<vmem>>, vector<1x32xf32>
    %16 = vector.broadcast %15 : vector<1x32xf32> to vector<16x32xf32>
    %17 = arith.addf %14, %16 : vector<16x32xf32>
    %cst_16 = arith.constant 0.353553385 : f32
    %18 = vector.broadcast %cst_16 : f32 to vector<16x32xf32>
    %19 = arith.mulf %7, %18 : vector<16x32xf32>
    %20 = vector.shape_cast %19 : vector<16x32xf32> to vector<2x8x4x8xf32>
    %21 = tpu.transpose %20, [0, 2, 1, 3] : vector<2x8x4x8xf32> -> vector<2x4x8x8xf32>
    %22 = vector.shape_cast %21 : vector<2x4x8x8xf32> to vector<8x8x8xf32>
    %23 = arith.truncf %22 : vector<8x8x8xf32> to vector<8x8x8xbf16>
    %24 = vector.shape_cast %12 : vector<16x32xf32> to vector<2x8x4x8xf32>
    %25 = tpu.transpose %24, [0, 2, 1, 3] : vector<2x8x4x8xf32> -> vector<2x4x8x8xf32>
    %26 = vector.shape_cast %25 : vector<2x4x8x8xf32> to vector<8x8x8xf32>
    %27 = arith.truncf %26 : vector<8x8x8xf32> to vector<8x8x8xbf16>
    %28 = vector.shape_cast %17 : vector<16x32xf32> to vector<2x8x4x8xf32>
    %29 = tpu.transpose %28, [0, 2, 1, 3] : vector<2x8x4x8xf32> -> vector<2x4x8x8xf32>
    %30 = vector.shape_cast %29 : vector<2x4x8x8xf32> to vector<8x8x8xf32>
    %31 = arith.truncf %30 : vector<8x8x8xf32> to vector<8x8x8xbf16>
    "tpu.trace_start"() <{level = 10 : i32, message = "bqd,bkd->bqk"}> : () -> ()
    %cst_17 = arith.constant dense<0.000000e+00> : vector<8x8x8xf32>
    %32 = tpu.matmul %23, %27, %cst_17 {dimension_numbers = #tpu.dot_dimension_numbers<[2], [2], [1], [1], [0, 0, 0, 1, 1, 1], [0], [0]>} : vector<8x8x8xbf16>, vector<8x8x8xbf16>, vector<8x8x8xf32> -> vector<8x8x8xf32>
    "tpu.trace_stop"() : () -> ()
    %cst_18 = arith.constant dense<0xFF800000> : vector<8x8xf32>
    %33 = vector.multi_reduction <maximumf>, %32, %cst_18 [2] : vector<8x8x8xf32> to vector<8x8xf32>
    %34 = vector.shape_cast %33 : vector<8x8xf32> to vector<8x8x1xf32>
    %35 = vector.broadcast %34 : vector<8x8x1xf32> to vector<8x8x8xf32>
    %36 = arith.subf %32, %35 : vector<8x8x8xf32>
    %37 = math.exp %36 : vector<8x8x8xf32>
    %cst_19 = arith.constant dense<0.000000e+00> : vector<8x8xf32>
    %38 = vector.multi_reduction <add>, %37, %cst_19 [2] : vector<8x8x8xf32> to vector<8x8xf32>
    %39 = vector.shape_cast %38 : vector<8x8xf32> to vector<8x8x1xf32>
    %40 = tpu.reciprocal %39 : vector<8x8x1xf32> -> vector<8x8x1xf32>
    %41 = vector.broadcast %40 : vector<8x8x1xf32> to vector<8x8x8xf32>
    %42 = arith.mulf %37, %41 : vector<8x8x8xf32>
    %43 = arith.truncf %42 : vector<8x8x8xf32> to vector<8x8x8xbf16>
    "tpu.trace_start"() <{level = 10 : i32, message = "bqk,bkd->bqd"}> : () -> ()
    %cst_20 = arith.constant dense<0.000000e+00> : vector<8x8x8xf32>
    %44 = tpu.matmul %43, %31, %cst_20 {dimension_numbers = #tpu.dot_dimension_numbers<[2], [1], [1], [2], [0, 0, 0, 1, 1, 2], [0], [0]>} : vector<8x8x8xbf16>, vector<8x8x8xbf16>, vector<8x8x8xf32> -> vector<8x8x8xf32>
    "tpu.trace_stop"() : () -> ()
    %45 = vector.shape_cast %44 : vector<8x8x8xf32> to vector<2x4x8x8xf32>
    %46 = tpu.transpose %45, [0, 2, 1, 3] : vector<2x4x8x8xf32> -> vector<2x8x4x8xf32>
    %47 = vector.shape_cast %46 : vector<2x8x4x8xf32> to vector<16x32xf32>
    %48 = arith.addf %1, %47 : vector<16x32xf32>
    %c0_21 = arith.constant 0 : index
    %c0_22 = arith.constant 0 : index
    %49 = vector.load %arg8[%c0_21, %c0_22] : memref<1x32xf32, #tpu.memory_space<vmem>>, vector<1x32xf32>
    %c0_23 = arith.constant 0 : index
    %c0_24 = arith.constant 0 : index
    %50 = vector.load %arg9[%c0_23, %c0_24] : memref<1x32xf32, #tpu.memory_space<vmem>>, vector<1x32xf32>
    %cst_25 = arith.constant dense<0.000000e+00> : vector<16xf32>
    %51 = vector.multi_reduction <add>, %48, %cst_25 [1] : vector<16x32xf32> to vector<16xf32>
    %52 = vector.shape_cast %51 : vector<16xf32> to vector<16x1xf32>
    %cst_26 = arith.constant 3.200000e+01 : f32
    %53 = vector.broadcast %cst_26 : f32 to vector<16x1xf32>
    %54 = arith.divf %52, %53 : vector<16x1xf32>
    %55 = vector.broadcast %54 : vector<16x1xf32> to vector<16x32xf32>
    %56 = arith.subf %48, %55 : vector<16x32xf32>
    %57 = arith.mulf %56, %56 : vector<16x32xf32>
    %cst_27 = arith.constant dense<0.000000e+00> : vector<16xf32>
    %58 = vector.multi_reduction <add>, %57, %cst_27 [1] : vector<16x32xf32> to vector<16xf32>
    %59 = vector.shape_cast %58 : vector<16xf32> to vector<16x1xf32>
    %cst_28 = arith.constant 3.200000e+01 : f32
    %60 = vector.broadcast %cst_28 : f32 to vector<16x1xf32>
    %61 = arith.divf %59, %60 : vector<16x1xf32>
    %cst_29 = arith.constant 9.99999974E-6 : f32
    %62 = vector.broadcast %cst_29 : f32 to vector<16x1xf32>
    %63 = arith.addf %61, %62 : vector<16x1xf32>
    %64 = math.rsqrt %63 : vector<16x1xf32>
    %65 = vector.broadcast %64 : vector<16x1xf32> to vector<16x32xf32>
    %66 = arith.mulf %56, %65 : vector<16x32xf32>
    %67 = vector.broadcast %49 : vector<1x32xf32> to vector<16x32xf32>
    %68 = arith.mulf %66, %67 : vector<16x32xf32>
    %69 = vector.broadcast %50 : vector<1x32xf32> to vector<16x32xf32>
    %70 = arith.addf %68, %69 : vector<16x32xf32>
    %71 = arith.truncf %70 : vector<16x32xf32> to vector<16x32xbf16>
    %c0_30 = arith.constant 0 : index
    %c0_31 = arith.constant 0 : index
    %72 = vector.load %arg10[%c0_30, %c0_31] : memref<32x64xbf16, #tpu.memory_space<vmem>>, vector<32x64xbf16>
    %cst_32 = arith.constant dense<0.000000e+00> : vector<16x64xf32>
    %73 = tpu.matmul %71, %72, %cst_32 {dimension_numbers = #tpu.dot_dimension_numbers<[1], [0], [0], [1], [0, 0, 1, 1], [], []>} : vector<16x32xbf16>, vector<32x64xbf16>, vector<16x64xf32> -> vector<16x64xf32>
    %c0_33 = arith.constant 0 : index
    %c0_34 = arith.constant 0 : index
    %74 = vector.load %arg11[%c0_33, %c0_34] : memref<1x64xf32, #tpu.memory_space<vmem>>, vector<1x64xf32>
    %75 = vector.broadcast %74 : vector<1x64xf32> to vector<16x64xf32>
    %76 = arith.addf %73, %75 : vector<16x64xf32>
    %77 = arith.mulf %76, %76 : vector<16x64xf32>
    %78 = arith.mulf %76, %77 : vector<16x64xf32>
    %cst_35 = arith.constant 4.471500e-02 : f32
    %79 = vector.broadcast %cst_35 : f32 to vector<16x64xf32>
    %80 = arith.mulf %79, %78 : vector<16x64xf32>
    %81 = arith.addf %76, %80 : vector<16x64xf32>
    %cst_36 = arith.constant 0.797884583 : f32
    %82 = vector.broadcast %cst_36 : f32 to vector<16x64xf32>
    %83 = arith.mulf %82, %81 : vector<16x64xf32>
    %84 = math.tanh %83 : vector<16x64xf32>
    %cst_37 = arith.constant 1.000000e+00 : f32
    %85 = vector.broadcast %cst_37 : f32 to vector<16x64xf32>
    %86 = arith.addf %85, %84 : vector<16x64xf32>
    %cst_38 = arith.constant 5.000000e-01 : f32
    %87 = vector.broadcast %cst_38 : f32 to vector<16x64xf32>
    %88 = arith.mulf %87, %86 : vector<16x64xf32>
    %89 = arith.mulf %76, %88 : vector<16x64xf32>
    %90 = arith.truncf %89 : vector<16x64xf32> to vector<16x64xbf16>
    %c0_39 = arith.constant 0 : index
    %c0_40 = arith.constant 0 : index
    %91 = vector.load %arg12[%c0_39, %c0_40] : memref<64x32xbf16, #tpu.memory_space<vmem>>, vector<64x32xbf16>
    %cst_41 = arith.constant dense<0.000000e+00> : vector<16x32xf32>
    %92 = tpu.matmul %90, %91, %cst_41 {dimension_numbers = #tpu.dot_dimension_numbers<[1], [0], [0], [1], [0, 0, 1, 1], [], []>} : vector<16x64xbf16>, vector<64x32xbf16>, vector<16x32xf32> -> vector<16x32xf32>
    %c0_42 = arith.constant 0 : index
    %c0_43 = arith.constant 0 : index
    %93 = vector.load %arg13[%c0_42, %c0_43] : memref<1x32xf32, #tpu.memory_space<vmem>>, vector<1x32xf32>
    %94 = vector.broadcast %93 : vector<1x32xf32> to vector<16x32xf32>
    %95 = arith.addf %92, %94 : vector<16x32xf32>
    %96 = arith.addf %95, %47 : vector<16x32xf32>
    %c0_44 = arith.constant 0 : index
    %c0_45 = arith.constant 0 : index
    %97 = vector.load %arg14[%c0_44, %c0_45] : memref<1x32xf32, #tpu.memory_space<vmem>>, vector<1x32xf32>
    %c0_46 = arith.constant 0 : index
    %c0_47 = arith.constant 0 : index
    %98 = vector.load %arg15[%c0_46, %c0_47] : memref<1x32xf32, #tpu.memory_space<vmem>>, vector<1x32xf32>
    %cst_48 = arith.constant dense<0.000000e+00> : vector<16xf32>
    %99 = vector.multi_reduction <add>, %96, %cst_48 [1] : vector<16x32xf32> to vector<16xf32>
    %100 = vector.shape_cast %99 : vector<16xf32> to vector<16x1xf32>
    %cst_49 = arith.constant 3.200000e+01 : f32
    %101 = vector.broadcast %cst_49 : f32 to vector<16x1xf32>
    %102 = arith.divf %100, %101 : vector<16x1xf32>
    %103 = vector.broadcast %102 : vector<16x1xf32> to vector<16x32xf32>
    %104 = arith.subf %96, %103 : vector<16x32xf32>
    %105 = arith.mulf %104, %104 : vector<16x32xf32>
    %cst_50 = arith.constant dense<0.000000e+00> : vector<16xf32>
    %106 = vector.multi_reduction <add>, %105, %cst_50 [1] : vector<16x32xf32> to vector<16xf32>
    %107 = vector.shape_cast %106 : vector<16xf32> to vector<16x1xf32>
    %cst_51 = arith.constant 3.200000e+01 : f32
    %108 = vector.broadcast %cst_51 : f32 to vector<16x1xf32>
    %109 = arith.divf %107, %108 : vector<16x1xf32>
    %cst_52 = arith.constant 9.99999974E-6 : f32
    %110 = vector.broadcast %cst_52 : f32 to vector<16x1xf32>
    %111 = arith.addf %109, %110 : vector<16x1xf32>
    %112 = math.rsqrt %111 : vector<16x1xf32>
    %113 = vector.broadcast %112 : vector<16x1xf32> to vector<16x32xf32>
    %114 = arith.mulf %104, %113 : vector<16x32xf32>
    %115 = vector.broadcast %97 : vector<1x32xf32> to vector<16x32xf32>
    %116 = arith.mulf %114, %115 : vector<16x32xf32>
    %117 = vector.broadcast %98 : vector<1x32xf32> to vector<16x32xf32>
    %118 = arith.addf %116, %117 : vector<16x32xf32>
    %119 = vector.shape_cast %118 : vector<16x32xf32> to vector<2x8x32xf32>
    %c0_53 = arith.constant 0 : index
    %c0_54 = arith.constant 0 : index
    %c0_55 = arith.constant 0 : index
    %120 = vector.load %arg16[%c0_53, %c0_54, %c0_55] : memref<2x8x32xf32, #tpu.memory_space<vmem>>, vector<2x8x32xf32>
    tpu.vector_store %arg16[%c0_53, %c0_54, %c0_55], %119 {strides = array<i32>} : memref<2x8x32xf32, #tpu.memory_space<vmem>>, vector<2x8x32xf32>,
    return
  }
  func.func @transform_0(%arg0: i32) -> (i32, i32, i32) {
    %c0_i32 = arith.constant 0 : i32
    %c0_i32_0 = arith.constant 0 : i32
    %c0_i32_1 = arith.constant 0 : i32
    return %arg0, %c0_i32, %c0_i32_0 : i32, i32, i32
  }
  func.func @transform_1(%arg0: i32) -> (i32, i32) {
    %c0_i32 = arith.constant 0 : i32
    %c0_i32_0 = arith.constant 0 : i32
    %c0_i32_1 = arith.constant 0 : i32
    return %c0_i32, %c0_i32_0 : i32, i32
  }
  func.func @transform_2(%arg0: i32) -> (i32, i32) {
    %c0_i32 = arith.constant 0 : i32
    %c0_i32_0 = arith.constant 0 : i32
    %c0_i32_1 = arith.constant 0 : i32
    return %c0_i32, %c0_i32_0 : i32, i32
  }
  func.func @transform_3(%arg0: i32) -> (i32, i32) {
    %c0_i32 = arith.constant 0 : i32
    %c0_i32_0 = arith.constant 0 : i32
    %c0_i32_1 = arith.constant 0 : i32
    return %c0_i32, %c0_i32_0 : i32, i32
  }
  func.func @transform_4(%arg0: i32) -> (i32, i32) {
    %c0_i32 = arith.constant 0 : i32
    %c0_i32_0 = arith.constant 0 : i32
    %c0_i32_1 = arith.constant 0 : i32
    return %c0_i32, %c0_i32_0 : i32, i32
  }
  func.func @transform_5(%arg0: i32) -> (i32, i32) {
    %c0_i32 = arith.constant 0 : i32
    %c0_i32_0 = arith.constant 0 : i32
    %c0_i32_1 = arith.constant 0 : i32
    return %c0_i32, %c0_i32_0 : i32, i32
  }
  func.func @transform_6(%arg0: i32) -> (i32, i32) {
    %c0_i32 = arith.constant 0 : i32
    %c0_i32_0 = arith.constant 0 : i32
    %c0_i32_1 = arith.constant 0 : i32
    return %c0_i32, %c0_i32_0 : i32, i32
  }
  func.func @transform_7(%arg0: i32) -> (i32, i32) {
    %c0_i32 = arith.constant 0 : i32
    %c0_i32_0 = arith.constant 0 : i32
    %c0_i32_1 = arith.constant 0 : i32
    return %c0_i32, %c0_i32_0 : i32, i32
  }
  func.func @transform_8(%arg0: i32) -> (i32, i32) {
    %c0_i32 = arith.constant 0 : i32
    %c0_i32_0 = arith.constant 0 : i32
    %c0_i32_1 = arith.constant 0 : i32
    return %c0_i32, %c0_i32_0 : i32, i32
  }
  func.func @transform_9(%arg0: i32) -> (i32, i32) {
    %c0_i32 = arith.constant 0 : i32
    %c0_i32_0 = arith.constant 0 : i32
    %c0_i32_1 = arith.constant 0 : i32
    return %c0_i32, %c0_i32_0 : i32, i32
  }
  func.func @transform_10(%arg0: i32) -> (i32, i32) {
    %c0_i32 = arith.constant 0 : i32
    %c0_i32_0 = arith.constant 0 : i32
    %c0_i32_1 = arith.constant 0 : i32
    return %c0_i32, %c0_i32_0 : i32, i32
  }
  func.func @transform_11(%arg0: i32) -> (i32, i32) {
    %c0_i32 = arith.constant 0 : i32
    %c0_i32_0 = arith.constant 0 : i32
    %c0_i32_1 = arith.constant 0 : i32
    return %c0_i32, %c0_i32_0 : i32, i32
  }
  func.func @transform_12(%arg0: i32) -> (i32, i32) {
    %c0_i32 = arith.constant 0 : i32
    %c0_i32_0 = arith.constant 0 : i32
    %c0_i32_1 = arith.constant 0 : i32
    return %c0_i32, %c0_i32_0 : i32, i32
  }
  func.func @transform_13(%arg0: i32) -> (i32, i32) {
    %c0_i32 = arith.constant 0 : i32
    %c0_i32_0 = arith.constant 0 : i32
    %c0_i32_1 = arith.constant 0 : i32
    return %c0_i32, %c0_i32_0 : i32, i32
  }
  func.func @transform_14(%arg0: i32) -> (i32, i32) {
    %c0_i32 = arith.constant 0 : i32
    %c0_i32_0 = arith.constant 0 : i32
    %c0_i32_1 = arith.constant 0 : i32
    return %c0_i32, %c0_i32_0 : i32, i32
  }
  func.func @transform_15(%arg0: i32) -> (i32, i32, i32) {
    %c0_i32 = arith.constant 0 : i32
    %c0_i32_0 = arith.constant 0 : i32
    %c0_i32_1 = arith.constant 0 : i32
    return %arg0, %c0_i32, %c0_i32_0 : i32, i32, i32
  }
}

module attributes {stable_mosaic.version = 11 : i64} {
  func.func @encoder_kernel(%arg0: i32, %arg1: memref<2x8x32xf32, #tpu.memory_space<vmem>>, %arg2: memref<32x32xbf16, #tpu.memory_space<vmem>>, %arg3: memref<1x32xf32, #tpu.memory_space<vmem>>, %arg4: memref<32x32xbf16, #tpu.memory_space<vmem>>, %arg5: memref<1x32xf32, #tpu.memory_space<vmem>>, %arg6: memref<32x32xbf16, #tpu.memory_space<vmem>>, %arg7: memref<1x32xf32, #tpu.memory_space<vmem>>, %arg8: memref<1x32xf32, #tpu.memory_space<vmem>>, %arg9: memref<1x32xf32, #tpu.memory_space<vmem>>, %arg10: memref<32x64xbf16, #tpu.memory_space<vmem>>, %arg11: memref<1x64xf32, #tpu.memory_space<vmem>>, %arg12: memref<64x32xbf16, #tpu.memory_space<vmem>>, %arg13: memref<1x32xf32, #tpu.memory_space<vmem>>, %arg14: memref<1x32xf32, #tpu.memory_space<vmem>>, %arg15: memref<1x32xf32, #tpu.memory_space<vmem>>, %arg16: memref<2x8x32xf32, #tpu.memory_space<vmem>>) attributes {dimension_semantics = [#tpu.dimension_semantics<parallel>], iteration_bounds = array<i64: 1>, scalar_prefetch = 0 : i64, scratch_operands = 0 : i64, tpu.core_type = #tpu.core_type<tc>, window_params = [{transform_indices = @transform_0, window_bounds = array<i64: 2, 8, 32>}, {pipeline_mode = #tpu.pipeline_mode<synchronous>, transform_indices = @transform_1, window_bounds = array<i64: 32, 32>}, {pipeline_mode = #tpu.pipeline_mode<synchronous>, transform_indices = @transform_2, window_bounds = array<i64: 1, 32>}, {pipeline_mode = #tpu.pipeline_mode<synchronous>, transform_indices = @transform_3, window_bounds = array<i64: 32, 32>}, {pipeline_mode = #tpu.pipeline_mode<synchronous>, transform_indices = @transform_4, window_bounds = array<i64: 1, 32>}, {pipeline_mode = #tpu.pipeline_mode<synchronous>, transform_indices = @transform_5, window_bounds = array<i64: 32, 32>}, {pipeline_mode = #tpu.pipeline_mode<synchronous>, transform_indices = @transform_6, window_bounds = array<i64: 1, 32>}, {pipeline_mode = #tpu.pipeline_mode<synchronous>, transform_indices = @transform_7, window_bounds = array<i64: 1, 32>}, {pipeline_mode = #tpu.pipeline_mode<synchronous>, transform_indices = @transform_8, window_bounds = array<i64: 1, 32>}, {pipeline_mode = #tpu.pipeline_mode<synchronous>, transform_indices = @transform_9, window_bounds = array<i64: 32, 64>}, {pipeline_mode = #tpu.pipeline_mode<synchronous>, transform_indices = @transform_10, window_bounds = array<i64: 1, 64>}, {pipeline_mode = #tpu.pipeline_mode<synchronous>, transform_indices = @transform_11, window_bounds = array<i64: 64, 32>}, {pipeline_mode = #tpu.pipeline_mode<synchronous>, transform_indices = @transform_12, window_bounds = array<i64: 1, 32>}, {pipeline_mode = #tpu.pipeline_mode<synchronous>, transform_indices = @transform_13, window_bounds = array<i64: 1, 32>}, {pipeline_mode = #tpu.pipeline_mode<synchronous>, transform_indices = @transform_14, window_bounds = array<i64: 1, 32>}, {transform_indices = @transform_15, window_bounds = array<i64: 2, 8, 32>}]} {
    %c0 = arith.constant 0 : index
    %c0_0 = arith.constant 0 : index
    %c0_1 = arith.constant 0 : index
    %0 = vector.load %arg1[%c0, %c0_0, %c0_1] : memref<2x8x32xf32, #tpu.memory_space<vmem>>, vector<2x8x32xf32>
    %1 = vector.shape_cast %0 : vector<2x8x32xf32> to vector<16x32xf32>
    %2 = arith.truncf %1 : vector<16x32xf32> to vector<16x32xbf16>
    %c0_2 = arith.constant 0 : index
    %c0_3 = arith.constant 0 : index
    %3 = vector.load %arg2[%c0_2, %c0_3] : memref<32x32xbf16, #tpu.memory_space<vmem>>, vector<32x32xbf16>
    %cst = arith.constant dense<0.000000e+00> : vector<16x32xf32>
    %4 = tpu.matmul %2, %3, %cst {dimension_numbers = #tpu.dot_dimension_numbers<[1], [0], [0], [1], [0, 0, 1, 1], [], []>} : vector<16x32xbf16>, vector<32x32xbf16>, vector<16x32xf32> -> vector<16x32xf32>
    %c0_4 = arith.constant 0 : index
    %c0_5 = arith.constant 0 : index
    %5 = vector.load %arg3[%c0_4, %c0_5] : memref<1x32xf32, #tpu.memory_space<vmem>>, vector<1x32xf32>
    %6 = vector.broadcast %5 : vector<1x32xf32> to vector<16x32xf32>
    %7 = arith.addf %4, %6 : vector<16x32xf32>
    %c0_6 = arith.constant 0 : index
    %c0_7 = arith.constant 0 : index
    %8 = vector.load %arg4[%c0_6, %c0_7] : memref<32x32xbf16, #tpu.memory_space<vmem>>, vector<32x32xbf16>
    %cst_8 = arith.constant dense<0.000000e+00> : vector<16x32xf32>
    %9 = tpu.matmul %2, %8, %cst_8 {dimension_numbers = #tpu.dot_dimension_numbers<[1], [0], [0], [1], [0, 0, 1, 1], [], []>} : vector<16x32xbf16>, vector<32x32xbf16>, vector<16x32xf32> -> vector<16x32xf32>
    %c0_9 = arith.constant 0 : index
    %c0_10 = arith.constant 0 : index
    %10 = vector.load %arg5[%c0_9, %c0_10] : memref<1x32xf32, #tpu.memory_space<vmem>>, vector<1x32xf32>
    %11 = vector.broadcast %10 : vector<1x32xf32> to vector<16x32xf32>
    %12 = arith.addf %9, %11 : vector<16x32xf32>
    %c0_11 = arith.constant 0 : index
    %c0_12 = arith.constant 0 : index
    %13 = vector.load %arg6[%c0_11, %c0_12] : memref<32x32xbf16, #tpu.memory_space<vmem>>, vector<32x32xbf16>
    %cst_13 = arith.constant dense<0.000000e+00> : vector<16x32xf32>
    %14 = tpu.matmul %2, %13, %cst_13 {dimension_numbers = #tpu.dot_dimension_numbers<[1], [0], [0], [1], [0, 0, 1, 1], [], []>} : vector<16x32xbf16>, vector<32x32xbf16>, vector<16x32xf32> -> vector<16x32xf32>
    %c0_14 = arith.constant 0 : index
    %c0_15 = arith.constant 0 : index
    %15 = vector.load %arg7[%c0_14, %c0_15] : memref<1x32xf32, #tpu.memory_space<vmem>>, vector<1x32xf32>
    %16 = vector.broadcast %15 : vector<1x32xf32> to vector<16x32xf32>
    %17 = arith.addf %14, %16 : vector<16x32xf32>
    %cst_16 = arith.constant 0.353553385 : f32
    %18 = vector.broadcast %cst_16 : f32 to vector<16x32xf32>
    %19 = arith.mulf %7, %18 : vector<16x32xf32>
    %20 = vector.shape_cast %19 : vector<16x32xf32> to vector<2x8x4x8xf32>
    %21 = tpu.transpose %20, [0, 2, 1, 3] : vector<2x8x4x8xf32> -> vector<2x4x8x8xf32>
    %22 = vector.shape_cast %21 : vector<2x4x8x8xf32> to vector<8x8x8xf32>
    %23 = arith.truncf %22 : vector<8x8x8xf32> to vector<8x8x8xbf16>
    %24 = vector.shape_cast %12 : vector<16x32xf32> to vector<2x8x4x8xf32>
    %25 = tpu.transpose %24, [0, 2, 1, 3] : vector<2x8x4x8xf32> -> vector<2x4x8x8xf32>
    %26 = vector.shape_cast %25 : vector<2x4x8x8xf32> to vector<8x8x8xf32>
    %27 = arith.truncf %26 : vector<8x8x8xf32> to vector<8x8x8xbf16>
    %28 = vector.shape_cast %17 : vector<16x32xf32> to vector<2x8x4x8xf32>
    %29 = tpu.transpose %28, [0, 2, 1, 3] : vector<2x8x4x8xf32> -> vector<2x4x8x8xf32>
    %30 = vector.shape_cast %29 : vector<2x4x8x8xf32> to vector<8x8x8xf32>
    %31 = arith.truncf %30 : vector<8x8x8xf32> to vector<8x8x8xbf16>
    "tpu.trace_start"() <{level = 10 : i32, message = "bqd,bkd->bqk"}> : () -> ()
    %cst_17 = arith.constant dense<0.000000e+00> : vector<8x8x8xf32>
    %32 = tpu.matmul %23, %27, %cst_17 {dimension_numbers = #tpu.dot_dimension_numbers<[2], [2], [1], [1], [0, 0, 0, 1, 1, 1], [0], [0]>} : vector<8x8x8xbf16>, vector<8x8x8xbf16>, vector<8x8x8xf32> -> vector<8x8x8xf32>
    "tpu.trace_stop"() : () -> ()
    %cst_18 = arith.constant dense<0xFF800000> : vector<8x8xf32>
    %33 = vector.multi_reduction <maximumf>, %32, %cst_18 [2] : vector<8x8x8xf32> to vector<8x8xf32>
    %34 = vector.shape_cast %33 : vector<8x8xf32> to vector<8x8x1xf32>
    %35 = vector.broadcast %34 : vector<8x8x1xf32> to vector<8x8x8xf32>
    %36 = arith.subf %32, %35 : vector<8x8x8xf32>
    %37 = math.exp %36 : vector<8x8x8xf32>
    %cst_19 = arith.constant dense<0.000000e+00> : vector<8x8xf32>
    %38 = vector.multi_reduction <add>, %37, %cst_19 [2] : vector<8x8x8xf32> to vector<8x8xf32>
    %39 = vector.shape_cast %38 : vector<8x8xf32> to vector<8x8x1xf32>
    %40 = tpu.reciprocal %39 : vector<8x8x1xf32> -> vector<8x8x1xf32>
    %41 = vector.broadcast %40 : vector<8x8x1xf32> to vector<8x8x8xf32>
    %42 = arith.mulf %37, %41 : vector<8x8x8xf32>
    %43 = arith.truncf %42 : vector<8x8x8xf32> to vector<8x8x8xbf16>
    "tpu.trace_start"() <{level = 10 : i32, message = "bqk,bkd->bqd"}> : () -> ()
    %cst_20 = arith.constant dense<0.000000e+00> : vector<8x8x8xf32>
    %44 = tpu.matmul %43, %31, %cst_20 {dimension_numbers = #tpu.dot_dimension_numbers<[2], [1], [1], [2], [0, 0, 0, 1, 1, 2], [0], [0]>} : vector<8x8x8xbf16>, vector<8x8x8xbf16>, vector<8x8x8xf32> -> vector<8x8x8xf32>
    "tpu.trace_stop"() : () -> ()
    %45 = vector.shape_cast %44 : vector<8x8x8xf32> to vector<2x4x8x8xf32>
    %46 = tpu.transpose %45, [0, 2, 1, 3] : vector<2x4x8x8xf32> -> vector<2x8x4x8xf32>
    %47 = vector.shape_cast %46 : vector<2x8x4x8xf32> to vector<16x32xf32>
    %48 = arith.addf %1, %47 : vector<16x32xf32>
    %c0_21 = arith.constant 0 : index
    %c0_22 = arith.constant 0 : index
    %49 = vector.load %arg8[%c0_21, %c0_22] : memref<1x32xf32, #tpu.memory_space<vmem>>, vector<1x32xf32>
    %c0_23 = arith.constant 0 : index
    %c0_24 = arith.constant 0 : index
    %50 = vector.load %arg9[%c0_23, %c0_24] : memref<1x32xf32, #tpu.memory_space<vmem>>, vector<1x32xf32>
    %cst_25 = arith.constant dense<0.000000e+00> : vector<16xf32>
    %51 = vector.multi_reduction <add>, %48, %cst_25 [1] : vector<16x32xf32> to vector<16xf32>
    %52 = vector.shape_cast %51 : vector<16xf32> to vector<16x1xf32>
    %cst_26 = arith.constant 3.200000e+01 : f32
    %53 = vector.broadcast %cst_26 : f32 to vector<16x1xf32>
    %54 = arith.divf %52, %53 : vector<16x1xf32>
    %55 = vector.broadcast %54 : vector<16x1xf32> to vector<16x32xf32>
    %56 = arith.subf %48, %55 : vector<16x32xf32>
    %57 = arith.mulf %56, %56 : vector<16x32xf32>
    %cst_27 = arith.constant dense<0.000000e+00> : vector<16xf32>
    %58 = vector.multi_reduction <add>, %57, %cst_27 [1] : vector<16x32xf32> to vector<16xf32>
    %59 = vector.shape_cast %58 : vector<16xf32> to vector<16x1xf32>
    %cst_28 = arith.constant 3.200000e+01 : f32
    %60 = vector.broadcast %cst_28 : f32 to vector<16x1xf32>
    %61 = arith.divf %59, %60 : vector<16x1xf32>
    %cst_29 = arith.constant 9.99999974E-6 : f32
    %62 = vector.broadcast %cst_29 : f32 to vector<16x1xf32>
    %63 = arith.addf %61, %62 : vector<16x1xf32>
    %64 = math.rsqrt %63 : vector<16x1xf32>
    %65 = vector.broadcast %64 : vector<16x1xf32> to vector<16x32xf32>
    %66 = arith.mulf %56, %65 : vector<16x32xf32>
    %67 = vector.broadcast %49 : vector<1x32xf32> to vector<16x32xf32>
    %68 = arith.mulf %66, %67 : vector<16x32xf32>
    %69 = vector.broadcast %50 : vector<1x32xf32> to vector<16x32xf32>
    %70 = arith.addf %68, %69 : vector<16x32xf32>
    %71 = arith.truncf %70 : vector<16x32xf32> to vector<16x32xbf16>
    %c0_30 = arith.constant 0 : index
    %c0_31 = arith.constant 0 : index
    %72 = vector.load %arg10[%c0_30, %c0_31] : memref<32x64xbf16, #tpu.memory_space<vmem>>, vector<32x64xbf16>
    %cst_32 = arith.constant dense<0.000000e+00> : vector<16x64xf32>
    %73 = tpu.matmul %71, %72, %cst_32 {dimension_numbers = #tpu.dot_dimension_numbers<[1], [0], [0], [1], [0, 0, 1, 1], [], []>} : vector<16x32xbf16>, vector<32x64xbf16>, vector<16x64xf32> -> vector<16x64xf32>
    %c0_33 = arith.constant 0 : index
    %c0_34 = arith.constant 0 : index
    %74 = vector.load %arg11[%c0_33, %c0_34] : memref<1x64xf32, #tpu.memory_space<vmem>>, vector<1x64xf32>
    %75 = vector.broadcast %74 : vector<1x64xf32> to vector<16x64xf32>
    %76 = arith.addf %73, %75 : vector<16x64xf32>
    %77 = arith.mulf %76, %76 : vector<16x64xf32>
    %78 = arith.mulf %76, %77 : vector<16x64xf32>
    %cst_35 = arith.constant 4.471500e-02 : f32
    %79 = vector.broadcast %cst_35 : f32 to vector<16x64xf32>
    %80 = arith.mulf %79, %78 : vector<16x64xf32>
    %81 = arith.addf %76, %80 : vector<16x64xf32>
    %cst_36 = arith.constant 0.797884583 : f32
    %82 = vector.broadcast %cst_36 : f32 to vector<16x64xf32>
    %83 = arith.mulf %82, %81 : vector<16x64xf32>
    %84 = math.tanh %83 : vector<16x64xf32>
    %cst_37 = arith.constant 1.000000e+00 : f32
    %85 = vector.broadcast %cst_37 : f32 to vector<16x64xf32>
    %86 = arith.addf %85, %84 : vector<16x64xf32>
    %cst_38 = arith.constant 5.000000e-01 : f32
    %87 = vector.broadcast %cst_38 : f32 to vector<16x64xf32>
    %88 = arith.mulf %87, %86 : vector<16x64xf32>
    %89 = arith.mulf %76, %88 : vector<16x64xf32>
    %90 = arith.truncf %89 : vector<16x64xf32> to vector<16x64xbf16>
    %c0_39 = arith.constant 0 : index
    %c0_40 = arith.constant 0 : index
    %91 = vector.load %arg12[%c0_39, %c0_40] : memref<64x32xbf16, #tpu.memory_space<vmem>>, vector<64x32xbf16>
    %cst_41 = arith.constant dense<0.000000e+00> : vector<16x32xf32>
    %92 = tpu.matmul %90, %91, %cst_41 {dimension_numbers = #tpu.dot_dimension_numbers<[1], [0], [0], [1], [0, 0, 1, 1], [], []>} : vector<16x64xbf16>, vector<64x32xbf16>, vector<16x32xf32> -> vector<16x32xf32>
    %c0_42 = arith.constant 0 : index
    %c0_43 = arith.constant 0 : index
    %93 = vector.load %arg13[%c0_42, %c0_43] : memref<1x32xf32, #tpu.memory_space<vmem>>, vector<1x32xf32>
    %94 = vector.broadcast %93 : vector<1x32xf32> to vector<16x32xf32>
    %95 = arith.addf %92, %94 : vector<16x32xf32>
    %96 = arith.addf %95, %47 : vector<16x32xf32>
    %c0_44 = arith.constant 0 : index
    %c0_45 = arith.constant 0 : index
    %97 = vector.load %arg14[%c0_44, %c0_45] : memref<1x32xf32, #tpu.memory_space<vmem>>, vector<1x32xf32>
    %c0_46 = arith.constant 0 : index
    %c0_47 = arith.constant 0 : index
    %98 = vector.load %arg15[%c0_46, %c0_47] : memref<1x32xf32, #tpu.memory_space<vmem>>, vector<1x32xf32>
    %cst_48 = arith.constant dense<0.000000e+00> : vector<16xf32>
    %99 = vector.multi_reduction <add>, %96, %cst_48 [1] : vector<16x32xf32> to vector<16xf32>
    %100 = vector.shape_cast %99 : vector<16xf32> to vector<16x1xf32>
    %cst_49 = arith.constant 3.200000e+01 : f32
    %101 = vector.broadcast %cst_49 : f32 to vector<16x1xf32>
    %102 = arith.divf %100, %101 : vector<16x1xf32>
    %103 = vector.broadcast %102 : vector<16x1xf32> to vector<16x32xf32>
    %104 = arith.subf %96, %103 : vector<16x32xf32>
    %105 = arith.mulf %104, %104 : vector<16x32xf32>
    %cst_50 = arith.constant dense<0.000000e+00> : vector<16xf32>
    %106 = vector.multi_reduction <add>, %105, %cst_50 [1] : vector<16x32xf32> to vector<16xf32>
    %107 = vector.shape_cast %106 : vector<16xf32> to vector<16x1xf32>
    %cst_51 = arith.constant 3.200000e+01 : f32
    %108 = vector.broadcast %cst_51 : f32 to vector<16x1xf32>
    %109 = arith.divf %107, %108 : vector<16x1xf32>
    %cst_52 = arith.constant 9.99999974E-6 : f32
    %110 = vector.broadcast %cst_52 : f32 to vector<16x1xf32>
    %111 = arith.addf %109, %110 : vector<16x1xf32>
    %112 = math.rsqrt %111 : vector<16x1xf32>
    %113 = vector.broadcast %112 : vector<16x1xf32> to vector<16x32xf32>
    %114 = arith.mulf %104, %113 : vector<16x32xf32>
    %115 = vector.broadcast %97 : vector<1x32xf32> to vector<16x32xf32>
    %116 = arith.mulf %114, %115 : vector<16x32xf32>
    %117 = vector.broadcast %98 : vector<1x32xf32> to vector<16x32xf32>
    %118 = arith.addf %116, %117 : vector<16x32xf32>
    %119 = vector.shape_cast %118 : vector<16x32xf32> to vector<2x8x32xf32>
    %c0_53 = arith.constant 0 : index
    %c0_54 = arith.constant 0 : index
    %c0_55 = arith.constant 0 : index
    %120 = vector.load %arg16[%c0_53, %c0_54, %c0_55] : memref<2x8x32xf32, #tpu.memory_space<vmem>>, vector<2x8x32xf32>
    tpu.vector_store %arg16[%c0_53, %c0_54, %c0_55], %119 {strides = array<i32>} : memref<2x8x32xf32, #tpu.memory_space<vmem>>, vector<2x8x32xf32>,
    return
  }
  func.func @transform_0(%arg0: i32) -> (i32, i32, i32) {
    %c0_i32 = arith.constant 0 : i32
    %c0_i32_0 = arith.constant 0 : i32
    %c0_i32_1 = arith.constant 0 : i32
    return %arg0, %c0_i32, %c0_i32_0 : i32, i32, i32
  }
  func.func @transform_1(%arg0: i32) -> (i32, i32) {
    %c0_i32 = arith.constant 0 : i32
    %c0_i32_0 = arith.constant 0 : i32
    %c0_i32_1 = arith.constant 0 : i32
    return %c0_i32, %c0_i32_0 : i32, i32
  }
  func.func @transform_2(%arg0: i32) -> (i32, i32) {
    %c0_i32 = arith.constant 0 : i32
    %c0_i32_0 = arith.constant 0 : i32
    %c0_i32_1 = arith.constant 0 : i32
    return %c0_i32, %c0_i32_0 : i32, i32
  }
  func.func @transform_3(%arg0: i32) -> (i32, i32) {
    %c0_i32 = arith.constant 0 : i32
    %c0_i32_0 = arith.constant 0 : i32
    %c0_i32_1 = arith.constant 0 : i32
    return %c0_i32, %c0_i32_0 : i32, i32
  }
  func.func @transform_4(%arg0: i32) -> (i32, i32) {
    %c0_i32 = arith.constant 0 : i32
    %c0_i32_0 = arith.constant 0 : i32
    %c0_i32_1 = arith.constant 0 : i32
    return %c0_i32, %c0_i32_0 : i32, i32
  }
  func.func @transform_5(%arg0: i32) -> (i32, i32) {
    %c0_i32 = arith.constant 0 : i32
    %c0_i32_0 = arith.constant 0 : i32
    %c0_i32_1 = arith.constant 0 : i32
    return %c0_i32, %c0_i32_0 : i32, i32
  }
  func.func @transform_6(%arg0: i32) -> (i32, i32) {
    %c0_i32 = arith.constant 0 : i32
    %c0_i32_0 = arith.constant 0 : i32
    %c0_i32_1 = arith.constant 0 : i32
    return %c0_i32, %c0_i32_0 : i32, i32
  }
  func.func @transform_7(%arg0: i32) -> (i32, i32) {
    %c0_i32 = arith.constant 0 : i32
    %c0_i32_0 = arith.constant 0 : i32
    %c0_i32_1 = arith.constant 0 : i32
    return %c0_i32, %c0_i32_0 : i32, i32
  }
  func.func @transform_8(%arg0: i32) -> (i32, i32) {
    %c0_i32 = arith.constant 0 : i32
    %c0_i32_0 = arith.constant 0 : i32
    %c0_i32_1 = arith.constant 0 : i32
    return %c0_i32, %c0_i32_0 : i32, i32
  }
  func.func @transform_9(%arg0: i32) -> (i32, i32) {
    %c0_i32 = arith.constant 0 : i32
    %c0_i32_0 = arith.constant 0 : i32
    %c0_i32_1 = arith.constant 0 : i32
    return %c0_i32, %c0_i32_0 : i32, i32
  }
  func.func @transform_10(%arg0: i32) -> (i32, i32) {
    %c0_i32 = arith.constant 0 : i32
    %c0_i32_0 = arith.constant 0 : i32
    %c0_i32_1 = arith.constant 0 : i32
    return %c0_i32, %c0_i32_0 : i32, i32
  }
  func.func @transform_11(%arg0: i32) -> (i32, i32) {
    %c0_i32 = arith.constant 0 : i32
    %c0_i32_0 = arith.constant 0 : i32
    %c0_i32_1 = arith.constant 0 : i32
    return %c0_i32, %c0_i32_0 : i32, i32
  }
  func.func @transform_12(%arg0: i32) -> (i32, i32) {
    %c0_i32 = arith.constant 0 : i32
    %c0_i32_0 = arith.constant 0 : i32
    %c0_i32_1 = arith.constant 0 : i32
    return %c0_i32, %c0_i32_0 : i32, i32
  }
  func.func @transform_13(%arg0: i32) -> (i32, i32) {
    %c0_i32 = arith.constant 0 : i32
    %c0_i32_0 = arith.constant 0 : i32
    %c0_i32_1 = arith.constant 0 : i32
    return %c0_i32, %c0_i32_0 : i32, i32
  }
  func.func @transform_14(%arg0: i32) -> (i32, i32) {
    %c0_i32 = arith.constant 0 : i32
    %c0_i32_0 = arith.constant 0 : i32
    %c0_i32_1 = arith.constant 0 : i32
    return %c0_i32, %c0_i32_0 : i32, i32
  }
  func.func @transform_15(%arg0: i32) -> (i32, i32, i32) {
    %c0_i32 = arith.constant 0 : i32
    %c0_i32_0 = arith.constant 0 : i32
    %c0_i32_1 = arith.constant 0 : i32
    return %arg0, %c0_i32, %c0_i32_0 : i32, i32, i32
  }
}

</mosaic_0001>

<bundles_post_ra>
// kernel: tpu_custom_call.1
= control target key start
LH: loop header
LB: loop body
LE: loop exit
PB: predicated region body
PF: predicated region fallthrough
CT: control target
= control target key end

     0   :  { %20 = vsyncpa [#allocation3], 0  ;;  %s2980_s0 = inlined_call_operand.vmem [shape: f32[2,8,32], index: 0, kind: input, shape index: {}]   ;;  %s2981_s1 = inlined_call_operand.vmem [shape: bf16[32,32], index: 1, kind: input, shape index: {}]   ;;  %s2982_s2 = inlined_call_operand.vmem [shape: f32[1,32], index: 2, kind: input, shape index: {}]   ;;  %s2983_s3 = inlined_call_operand.vmem [shape: bf16[32,32], index: 3, kind: input, shape index: {}]   ;;  %s2984_s4 = inlined_call_operand.vmem [shape: f32[1,32], index: 4, kind: input, shape index: {}]   ;;  %s2985_s5 = inlined_call_operand.hbm [shape: bf16[32,32], index: 5, kind: input, shape index: {}]   ;;  %s2986_s6 = inlined_call_operand.vmem [shape: f32[1,32], index: 6, kind: input, shape index: {}]   ;;  %s2987_s7 = inlined_call_operand.vmem [shape: f32[1,32], index: 7, kind: input, shape index: {}]   ;;  %s2988_s8 = inlined_call_operand.vmem [shape: f32[1,32], index: 8, kind: input, shape index: {}]   ;;  %s2989_s9 = inlined_call_operand.hbm [shape: bf16[32,64], index: 9, kind: input, shape index: {}]   ;;  %s2990_s10 = inlined_call_operand.vmem [shape: f32[1,64], index: 10, kind: input, shape index: {}]   ;;  %s2991_s11 = inlined_call_operand.vmem [shape: bf16[64,32], index: 11, kind: input, shape index: {}]   ;;  %s2992_s12 = inlined_call_operand.vmem [shape: f32[1,32], index: 12, kind: input, shape index: {}]   ;;  %s2993_s13 = inlined_call_operand.vmem [shape: f32[1,32], index: 13, kind: input, shape index: {}]   ;;  %s2994_s14 = inlined_call_operand.vmem [shape: f32[1,32], index: 14, kind: input, shape index: {}]   ;;  %s2995_s15 = inlined_call_operand.hbm [shape: f32[2,8,32], index: 15, kind: output, shape index: {}]  }
   0x1   :  { %21 = vsyncpa [#allocation6], 0 }
   0x2   :  { %22 = vsyncpa [#allocation4], 0  ;;  %s37_s20 = sshll.u32 %s2985_s5, 4  ;;  %s2205_s21 = smov [#allocation2]   ;;  %s38_s20 = int_to_ptr.hbm [resolvable:$true] %s37_s20 }
   0x3   :  { %s39_s22 = sshll.u32 %s2205_s21, 4  ;;  %s56_s25 = sshll.u32 %s2989_s9, 4  ;;  %s40_s22 = int_to_ptr.vmem [resolvable:$true] %s39_s22  ;;  %s57_s25 = int_to_ptr.hbm [resolvable:$true] %s56_s25 }
   0x4   :  { %s2206_s26 = smov 64   ;;  %s2207_s27 = smov 4  }
   0x5   :  { %45 = dma.hbm_to_vmem [thread:$0]  %s38_s20, 256, %s40_s22, [#allocation3], %s2206_s26, %s2206_s26, %s2207_s27  }
   0x6   :  { %s2208_s28 = smov [#allocation5]  }
   0x7   :  { %s58_s29 = sshll.u32 %s2208_s28, 4  ;;  %s59_s29 = int_to_ptr.vmem [resolvable:$true] %s58_s29 }
   0x8   :  { %64 = dma.hbm_to_vmem [thread:$0]  %s57_s25, 256, %s59_s29, [#allocation6], %s2206_s26, %s2206_s26, %s2207_s27  }
   0x9   :  { %2199 = dma.done.wait [#allocation3], 256  }
   0xa   :  { %2200 = vsyncadd [#allocation3], 4294967040 }
   0xb   :  { %2201 = dma.done.wait [#allocation6], 256  }
   0xc   :  { %2202 = vsyncadd [#allocation6], 4294967040  ;;  %v2024_v0 = vld [vmem:[%s2981_s1 + $0x8] sm:$0xff]  ;;  %v2023_v2 = vld [vmem:[%s2981_s1] sm:$0xff]  ;;  %vm107_vm0 = vcmask 261120   ;;  %s2209_s27 = smov 104  }
   0xd   :  { %v2026_v1 = vld [vmem:[%s2983_s3 + $0x8] sm:$0xff]  ;;  %v2025_v3 = vld [vmem:[%s2983_s3] sm:$0xff]  ;;  %117 = vmatpush.bf16.msra.mxu0 %v2024_v0  ;;  %s2210_s28 = smov 120   ;;  %v2212_v23 = vmov 1983009808   ;;  %vm216_vm1 = vcmask 1047556  }
   0xe   :  { %v84_v4 = vld [vmem:[%s2980_s0] sm:$0xff]  ;;  %151 = vmatpush.bf16.msra.mxu1 %v2026_v1  ;;  %v85_v5 = vld [vmem:[%s2980_s0 + $0x8] sm:$0xff]  ;;  %v221_v24 = vunpack.c.l.s4 %v2212_v23  ;;  %v2213_v33 = vmov 1934713408   ;;  %vm940_vm2 = vcmask 64512   ;;  %vm1296_vm3 = vcmask 1043456  }
   0xf   :  { %v2324_v6 = vpack.c.bf16 %v85_v5, %v84_v4  ;;  %v2070_v7 = vld [vmem:[%s2982_s2] ss:$0 sm:$0xff]  ;;  %s2211_s2 = smov 112   ;;  %v2028_v25 = vld [vmem:[#allocation2 + $0x8] sm:$0xff]  ;;  %v245_v34 = vunpack.c.l.s4 %v2213_v33  ;;  %s2215_s5 = smov 8  }
  0x10   :  { %v2071_v8 = vld [vmem:[%s2984_s4] ss:$0 sm:$0xff]  ;;  %185 = vmatpush.bf16.msra.mxu2 %v2028_v25  ;;  %v2364_v26 = vunpack.c.0.s8 %v221_v24  ;;  %s2216_s30 = smov 24  }
  0x11   :  { %118 = vmatpush.bf16.msra.mxu0 %v2023_v2  ;;  %v2027_v28 = vld [vmem:[#allocation2] sm:$0xff]  ;;  %v2381_v52 = vunpack.c.0.s8 %v245_v34 }
  0x12   :  { %152 = vmatpush.bf16.msra.mxu1 %v2025_v3 }
  0x14   :  { %1962 = vmatmul.msk.bf16.vlgmr.msra.gmra.mxu0 %vm107_vm0, %v2324_v6  ;;  %186 = vmatpush.bf16.msra.mxu2 %v2027_v28 }
  0x15   :  { %1971 = vmatmul.msk.bf16.vlgmr.msra.gmra.mxu1 %vm107_vm0, %v2324_v6 }
  0x17   :  { %1980 = vmatmul.msk.bf16.vlgmr.msra.gmra.mxu2 %vm107_vm0, %v2324_v6 }
  0x91   :  { %v120_v9 = vpop.f32.mrf.mxu0 }
  0x92   :  { %v154_v10 = vpop.f32.mrf.mxu1  ;;  %v121_v11 = vadd.f32 %v2070_v7, %v120_v9 }
  0x93   :  { %v2336_v12 = vadd.f32 %v2071_v8, %v154_v10 }
  0x94   :  { %v193_v13 = vmul.f32 0.35355338, %v121_v11 }
  0x95   :  { %458 = vrot.lane.b32.xlu1 %v2336_v12, %s2209_s27  ;;  %v466_v44 = vrot.slane %v2336_v12, 4 }
  0x96   :  { %209 = vrot.lane.b32.xlu2 %v193_v13, %s2209_s27  ;;  %v2050_v14 = vpack.i.bf16 %v193_v13, %v2336_v12  ;;  %v218_v35 = vrot.slane %v193_v13, 4 }
  0x98   :  { %2051 = vrot.lane.b32.xlu0 %v2050_v14, %s2210_s28 }
  0x99   :  { %v122_v17 = vpop.f32.mrf.mxu0 }
  0x9a   :  { %v156_v15 = vpop.f32.mrf.mxu1  ;;  %v123_v18 = vadd.f32 %v2070_v7, %v122_v17 }
  0x9b   :  { %v2343_v16 = vadd.f32 %v2071_v8, %v156_v15 }
  0x9c   :  { %v2350_v19 = vmul.f32 0.35355338, %v123_v18 }
  0x9d   :  { %203 = vrot.lane.b32.xlu1 %v193_v13, %s2211_s2  ;;  %v522_v45 = vrot.slane %v2343_v16, 4 }
  0x9e   :  { %448 = vrot.lane.b32.xlu2 %v2343_v16, %s2210_s28  ;;  %v274_v53 = vrot.slane %v2350_v19, 4 }
  0xa0   :  { %452 = vrot.lane.b32.xlu0 %v2336_v12, %s2211_s2 }
  0xa5   :  { %460 = vrot.lane.b32.xlu1 %v2343_v16, %s2209_s27 }
  0xa6   :  { %199 = vrot.lane.b32.xlu2 %v2350_v19, %s2210_s28 }
  0xa8   :  { %454 = vrot.lane.b32.xlu0 %v2343_v16, %s2211_s2 }
  0xad   :  { %211 = vrot.lane.b32.xlu1 %v2350_v19, %s2209_s27 }
  0xb0   :  { %205 = vrot.lane.b32.xlu0 %v2350_v19, %s2211_s2 }
  0xf0   :  { %v210_v20 = vpop.permute.xlu2 %209 }
  0xf1   :  { %v228_v29 = vrot.slane %v210_v20, 4 }
  0xf8   :  { %v2362_v21 = vpop.permute.xlu2 %448 }
  0xf9   :  { %v534_v54 = vrot.slane %v2362_v21, 4 }
 0x100   :  { %v2368_v40 = vpop.permute.xlu2 %199 }
 0x101   :  { %v286_v55 = vrot.slane %v2368_v40, 4 }
 0x107   :  { %v459_v22 = vpop.permute.xlu1 %458 }
 0x108   :  { %v476_v30 = vrot.slane %v459_v22, 4 }
 0x10a   :  { %v2052_v27 = vpop.permute.xlu0 %2051 }
 0x10b   :  { %v2054_v31 = vunpack.i.h.bf16 %v2052_v27  ;;  %v2053_v32 = vunpack.i.l.bf16 %v2052_v27 }
 0x10d   :  { %v229_v36 = vsel %vm216_vm1, %v228_v29, %v2054_v31  ;;  %v230_v37 = vrot.slane %v2054_v31, 4  ;;  %v477_v38 = vsel %vm216_vm1, %v476_v30, %v2053_v32  ;;  %v478_v39 = vrot.slane %v2053_v32, 4 }
 0x10e   :  { %v235_v41 = vperm.slane %v229_v36, %v2364_v26  ;;  %v483_v42 = vperm.slane %v477_v38, %v2364_v26 }
 0x10f   :  { %v204_v43 = vpop.permute.xlu1 %203  ;;  %v231_v46 = vsel %vm216_vm1, %v210_v20, %v230_v37  ;;  %v479_v47 = vsel %vm216_vm1, %v459_v22, %v478_v39 }
 0x110   :  { %v215_v48 = vrot.slane %v204_v43, 4  ;;  %v219_v49 = vsel %vm216_vm1, %v204_v43, %v218_v35  ;;  %v239_v50 = vperm.slane %v231_v46, %v2364_v26  ;;  %v487_v51 = vperm.slane %v479_v47, %v2364_v26 }
 0x111   :  { %v227_v57 = vperm.slane %v219_v49, %v2364_v26  ;;  %v240_v58 = vrot.slane %v235_v41, 4  ;;  %v488_v60 = vrot.slane %v483_v42, 4 }
 0x112   :  { %v217_v56 = vsel %vm216_vm1, %v215_v48, %v193_v13  ;;  %v252_v59 = vrot.slane %v239_v50, 4  ;;  %v453_v62 = vpop.permute.xlu0 %452  ;;  %v500_v63 = vrot.slane %v487_v51, 4 }
 0x113   :  { %v223_v61 = vperm.slane %v217_v56, %v2364_v26  ;;  %v254_v0 = vrot.slane %v227_v57, 4  ;;  %v464_v1 = vrot.slane %v453_v62, 4  ;;  %v467_v2 = vsel %vm216_vm1, %v453_v62, %v466_v44 }
 0x114   :  { %v253_v5 = vsel %vm216_vm1, %v252_v59, %v227_v57  ;;  %v475_v6 = vperm.slane %v467_v2, %v2364_v26 }
 0x115   :  { %v241_v3 = vsel %vm216_vm1, %v240_v58, %v223_v61  ;;  %v242_v4 = vrot.slane %v223_v61, 4  ;;  %v255_v8 = vsel %vm216_vm1, %v239_v50, %v254_v0  ;;  %v259_v9 = vperm.slane %v253_v5, %v2381_v52 }
 0x116   :  { %v247_v7 = vperm.slane %v241_v3, %v2381_v52  ;;  %v465_v10 = vsel %vm216_vm1, %v464_v1, %v2336_v12  ;;  %v263_v13 = vperm.slane %v255_v8, %v2381_v52  ;;  %v501_v15 = vsel %vm216_vm1, %v500_v63, %v475_v6 }
 0x117   :  { %v243_v11 = vsel %vm216_vm1, %v235_v41, %v242_v4  ;;  %v471_v14 = vperm.slane %v465_v10, %v2364_v26  ;;  %v461_v17 = vpop.permute.xlu1 %460  ;;  %v268_v22 = vrot.slane %v259_v9, 4  ;;  %v502_v23 = vrot.slane %v475_v6, 4 }
 0x118   :  { %v251_v18 = vperm.slane %v243_v11, %v2381_v52  ;;  %v264_v20 = vrot.slane %v247_v7, 4  ;;  %v270_v24 = vrot.slane %v263_v13, 4  ;;  %v507_v12 = vperm.slane %v501_v15, %v2381_v52 }
 0x119   :  { %v489_v25 = vsel %vm216_vm1, %v488_v60, %v471_v14  ;;  %v490_v27 = vrot.slane %v471_v14, 4  ;;  %v269_v30 = vsel %vm216_vm1, 0.0, %v268_v22  ;;  %v503_v35 = vsel %vm216_vm1, %v487_v51, %v502_v23 }
 0x11a   :  { %v2406_v28 = vsel %vm216_vm1, 0.0, %v264_v20  ;;  %v266_v29 = vrot.slane %v251_v18, 4  ;;  %v2410_v31 = vperm.slane %v489_v25, %v2381_v52  ;;  %v271_v32 = vsel %vm216_vm1, 0.0, %v270_v24  ;;  %v455_v36 = vpop.permute.xlu0 %454 }
 0x11b   :  { %v339_v33 = vsel %vm216_vm1, %v270_v24, %v259_v9  ;;  %v491_v34 = vsel %vm216_vm1, %v483_v42, %v490_v27  ;;  %v344_v41 = vrot.slane %v271_v32, 4  ;;  %v511_v42 = vperm.slane %v503_v35, %v2381_v52 }
 0x11c   :  { %v2417_v37 = vsel %vm216_vm1, 0.0, %v266_v29  ;;  %v328_v38 = vsel %vm216_vm1, %v266_v29, %v247_v7  ;;  %v2421_v39 = vperm.slane %v339_v33, %v2364_v26  ;;  %v499_v46 = vperm.slane %v491_v34, %v2381_v52 }
 0x11d   :  { %v2424_v43 = vperm.slane %v328_v38, %v2364_v26  ;;  %v333_v44 = vrot.slane %v2417_v37, 4  ;;  %v345_v47 = vsel %vm216_vm1, %v344_v41, %v269_v30  ;;  %v512_v49 = vrot.slane %v2410_v31, 4 }
 0x11e   :  { %v364_v48 = vrot.slane %v2421_v39, 4  ;;  %v516_v50 = vrot.slane %v507_v12, 4  ;;  %v2433_v51 = vperm.slane %v345_v47, %v2364_v26  ;;  %v514_v56 = vrot.slane %v499_v46, 4 }
 0x11f   :  { %v518_v57 = vrot.slane %v511_v42, 4  ;;  %v532_v58 = vrot.slane %v461_v17, 4  ;;  %v535_v60 = vsel %vm216_vm1, %v461_v17, %v534_v54  ;;  %v520_v61 = vrot.slane %v455_v36, 4  ;;  %v212_v63 = vpop.permute.xlu1 %211 }
 0x120   :  { %v517_v59 = vsel %vm216_vm1, 0.0, %v516_v50  ;;  %v523_v62 = vsel %vm216_vm1, %v455_v36, %v522_v45  ;;  %v2441_v0 = vsel %vm216_vm1, 0.0, %v514_v56  ;;  %v543_v45 = vperm.slane %v535_v60, %v2364_v26 }
 0x121   :  { %v519_v1 = vsel %vm216_vm1, 0.0, %v518_v57  ;;  %v587_v2 = vsel %vm216_vm1, %v518_v57, %v507_v12  ;;  %v533_v3 = vsel %vm216_vm1, %v532_v58, %v2362_v21  ;;  %v581_v4 = vrot.slane %v2441_v0, 4 }
 0x122   :  { %v2449_v54 = vperm.slane %v587_v2, %v2364_v26  ;;  %v592_v5 = vrot.slane %v519_v1, 4  ;;  %v539_v6 = vperm.slane %v533_v3, %v2364_v26  ;;  %v521_v7 = vsel %vm216_vm1, %v520_v61, %v2343_v16  ;;  %v206_v10 = vpop.permute.xlu0 %205 }
 0x123   :  { %v531_v8 = vperm.slane %v523_v62, %v2364_v26  ;;  %v284_v9 = vrot.slane %v212_v63, 4  ;;  %v527_v13 = vperm.slane %v521_v7, %v2364_v26  ;;  %v287_v14 = vsel %vm216_vm1, %v212_v63, %v286_v55 }
 0x124   :  { %v593_v11 = vsel %vm216_vm1, %v592_v5, %v517_v59  ;;  %v544_v21 = vrot.slane %v539_v6, 4  ;;  %v556_v15 = vrot.slane %v543_v45, 4  ;;  %v295_v16 = vperm.slane %v287_v14, %v2364_v26 }
 0x125   :  { %v558_v17 = vrot.slane %v531_v8, 4  ;;  %v285_v18 = vsel %vm216_vm1, %v284_v9, %v2368_v40  ;;  %v546_v22 = vrot.slane %v527_v13, 4  ;;  %v272_v24 = vrot.slane %v206_v10, 4 }
 0x126   :  { %v545_v20 = vsel %vm216_vm1, %v544_v21, %v527_v13  ;;  %v291_v23 = vperm.slane %v285_v18, %v2364_v26  ;;  %v557_v27 = vsel %vm216_vm1, %v556_v15, %v531_v8  ;;  %v308_v55 = vrot.slane %v295_v16, 4 }
 0x127   :  { %v551_v25 = vperm.slane %v545_v20, %v2381_v52  ;;  %v559_v12 = vsel %vm216_vm1, %v543_v45, %v558_v17  ;;  %v547_v29 = vsel %vm216_vm1, %v539_v6, %v546_v22  ;;  %v563_v30 = vperm.slane %v557_v27, %v2381_v52 }
 0x128   :  { %v567_v40 = vperm.slane %v559_v12, %v2381_v52  ;;  %v296_v32 = vrot.slane %v291_v23, 4  ;;  %v555_v33 = vperm.slane %v547_v29, %v2381_v52  ;;  %v273_v35 = vsel %vm216_vm1, %v272_v24, %v2350_v19 }
 0x129   :  { %v568_v34 = vrot.slane %v551_v25, 4  ;;  %v275_v36 = vsel %vm216_vm1, %v206_v10, %v274_v53  ;;  %v572_v38 = vrot.slane %v563_v30, 4  ;;  %v279_v46 = vperm.slane %v273_v35, %v2364_v26 }
 0x12a   :  { %v574_v41 = vrot.slane %v567_v40, 4  ;;  %v283_v42 = vperm.slane %v275_v36, %v2364_v26  ;;  %v570_v50 = vrot.slane %v555_v33, 4  ;;  %v513_v57 = vsel %vm216_vm1, 0.0, %v512_v49 }
 0x12b   :  { %v2481_v47 = vsel %vm216_vm1, 0.0, %v568_v34  ;;  %v576_v58 = vsel %vm216_vm1, %v514_v56, %v2410_v31  ;;  %v573_v59 = vsel %vm216_vm1, 0.0, %v572_v38  ;;  %v297_v60 = vsel %vm216_vm1, %v296_v32, %v279_v46 }
 0x12c   :  { %v575_v19 = vsel %vm216_vm1, 0.0, %v574_v41  ;;  %v641_v53 = vsel %vm216_vm1, %v574_v41, %v563_v30  ;;  %v2491_v61 = vsel %vm216_vm1, 0.0, %v570_v50  ;;  %v2494_v62 = vsel %vm216_vm1, %v570_v50, %v551_v25 }
 0x12d   :  { %v2497_v63 = vperm.slane %v641_v53, %v2364_v26  ;;  %v646_v49 = vrot.slane %v575_v19, 4  ;;  %v635_v31 = vrot.slane %v2491_v61, 4  ;;  %v298_v56 = vrot.slane %v279_v46, 4 }
 0x12e   :  { %v303_v1 = vperm.slane %v297_v60, %v2381_v52  ;;  %v309_v2 = vsel %vm216_vm1, %v308_v55, %v283_v42  ;;  %v310_v6 = vrot.slane %v283_v42, 4  ;;  %v580_v10 = vperm.slane %v576_v58, %v2364_v26 }
 0x12f   :  { %v647_v3 = vsel %vm216_vm1, %v646_v49, %v573_v59  ;;  %v666_v5 = vrot.slane %v2497_v63, 4  ;;  %v315_v45 = vperm.slane %v309_v2, %v2381_v52  ;;  %v299_v8 = vsel %vm216_vm1, %v291_v23, %v298_v56 }
 0x130   :  { %v2506_v7 = vperm.slane %v647_v3, %v2364_v26  ;;  %v320_v9 = vrot.slane %v303_v1, 4  ;;  %v307_v21 = vperm.slane %v299_v8, %v2381_v52  ;;  %v311_v13 = vsel %vm216_vm1, %v295_v16, %v310_v6 }
 0x131   :  { %v324_v14 = vrot.slane %v315_v45, 4  ;;  %v582_v15 = vsel %vm216_vm1, %v581_v4, %v513_v57  ;;  %v319_v17 = vperm.slane %v311_v13, %v2381_v52  ;;  %v597_v22 = vperm.slane %v593_v11, %v2364_v26 }
 0x132   :  { %v321_v18 = vsel %vm216_vm1, 0.0, %v320_v9  ;;  %v586_v20 = vperm.slane %v582_v15, %v2364_v26  ;;  %v322_v23 = vrot.slane %v307_v21, 4  ;;  %v600_v25 = vrot.slane %v580_v10, 4 }
 0x133   :  { %v325_v24 = vsel %vm216_vm1, 0.0, %v324_v14  ;;  %v612_v27 = vrot.slane %v2449_v54, 4  ;;  %v326_v16 = vrot.slane %v319_v17, 4  ;;  %v610_v0 = vrot.slane %v597_v22, 4 }
 0x134   :  { %v598_v12 = vrot.slane %v586_v20, 4  ;;  %v323_v4 = vsel %vm216_vm1, 0.0, %v322_v23  ;;  %v382_v55 = vsel %vm216_vm1, %v322_v23, %v303_v1  ;;  %v601_v29 = vsel %vm216_vm1, %v586_v20, %v600_v25 }
 0x135   :  { %v613_v30 = vsel %vm216_vm1, %v597_v22, %v612_v27  ;;  %v327_v11 = vsel %vm216_vm1, 0.0, %v326_v16  ;;  %v2527_v40 = vperm.slane %v382_v55, %v2364_v26  ;;  %v387_v32 = vrot.slane %v323_v4, 4 }
 0x136   :  { %v393_v33 = vsel %vm216_vm1, %v326_v16, %v315_v45  ;;  %v398_v35 = vrot.slane %v327_v11, 4  ;;  %v609_v36 = vperm.slane %v601_v29, %v2381_v52  ;;  %v621_v38 = vperm.slane %v613_v30, %v2381_v52 }
 0x137   :  { %v2531_v34 = vperm.slane %v393_v33, %v2364_v26  ;;  %v388_v41 = vsel %vm216_vm1, %v387_v32, %v321_v18  ;;  %v406_v46 = vrot.slane %v2527_v40, 4  ;;  %v599_v42 = vsel %vm216_vm1, %v598_v12, %v580_v10 }
 0x138   :  { %v611_v50 = vsel %vm216_vm1, %v610_v0, %v2449_v54  ;;  %v2541_v57 = vperm.slane %v388_v41, %v2364_v26  ;;  %v399_v58 = vsel %vm216_vm1, %v398_v35, %v325_v24  ;;  %v626_v19 = vrot.slane %v621_v38, 4 }
 0x139   :  { %v418_v59 = vrot.slane %v2531_v34, 4  ;;  %v2546_v53 = vperm.slane %v399_v58, %v2364_v26  ;;  %v605_v60 = vperm.slane %v599_v42, %v2381_v52  ;;  %v617_v49 = vperm.slane %v611_v50, %v2381_v52 }
 0x13a   :  { %v628_v56 = vrot.slane %v609_v36, 4  ;;  %v627_v1 = vsel %vm216_vm1, %v626_v19, %v609_v36  ;;  %v334_v54 = vsel %vm216_vm1, %v333_v44, %v2406_v28  ;;  %v352_v2 = vrot.slane %v2424_v43, 4 }
 0x13b   :  { %v365_v3 = vsel %vm216_vm1, %v2433_v51, %v364_v48  ;;  %v416_v6 = vrot.slane %v2546_v53, 4  ;;  %v686_v45 = vpack.c.bf16 %v627_v1, %v627_v1  ;;  %v622_v8 = vrot.slane %v617_v49, 4 }
 0x13c   :  { %v629_v9 = vsel %vm216_vm1, %v621_v38, %v628_v56  ;;  %v624_v21 = vrot.slane %v605_v60, 4  ;;  %v338_v13 = vperm.slane %v334_v54, %v2364_v26  ;;  %v373_v37 = vperm.slane %v365_v3, %v2381_v52 }
 0x13d   :  { %v687_v10 = vpack.c.bf16 %v629_v9, %v629_v9  ;;  %v983_v28 = vsel %vm940_vm2, %v686_v45, 0  ;;  %v623_v44 = vsel %vm216_vm1, %v622_v8, %v605_v60  ;;  %v634_v14 = vperm.slane %v2494_v62, %v2364_v26 }
 0x13e   :  { %v636_v48 = vsel %vm216_vm1, %v635_v31, %v2481_v47  ;;  %992 = vmatpush.bf16.xpose.msrb.mxu1 %v983_v28  ;;  %v684_v15 = vpack.c.bf16 %v623_v44, %v623_v44  ;;  %v625_v18 = vsel %vm216_vm1, %v617_v49, %v624_v21  ;;  %v353_v20 = vsel %vm216_vm1, %v338_v13, %v352_v2 }
 0x13f   :  { %v1002_v17 = vsel %vm940_vm2, %v687_v10, 0  ;;  %v685_v22 = vpack.c.bf16 %v625_v18, %v625_v18  ;;  %v361_v23 = vperm.slane %v353_v20, %v2381_v52  ;;  %v378_v24 = vrot.slane %v373_v37, 4 }
 0x140   :  { %1011 = vmatpush.bf16.xpose.msrb.mxu2 %v1002_v17  ;;  %v640_v62 = vperm.slane %v636_v48, %v2364_v26  ;;  %v945_v25 = vsel %vm940_vm2, %v684_v15, 0  ;;  %v654_v61 = vrot.slane %v634_v14, 4  ;;  %v667_v47 = vsel %vm216_vm1, %v2506_v7, %v666_v5 }
 0x141   :  { %v350_v31 = vrot.slane %v338_v13, 4  ;;  %954 = vmatpush.bf16.xpose.msra.mxu3 %v945_v25  ;;  %v964_v27 = vsel %vm940_vm2, %v685_v22, 0  ;;  %v379_v16 = vsel %vm216_vm1, %v378_v24, %v361_v23  ;;  %v675_v12 = vperm.slane %v667_v47, %v2381_v52 }
 0x142   :  { %v362_v0 = vrot.slane %v2433_v51, 4  ;;  %973 = vmatpush.bf16.xpose.msrb.mxu0 %v964_v27  ;;  %v438_v4 = vpack.c.bf16 %v379_v16, %v379_v16  ;;  %v655_v55 = vsel %vm216_vm1, %v640_v62, %v654_v61  ;;  %v380_v30 = vrot.slane %v361_v23, 4  ;;  %v188_v16 = vpop.f32.mrf.mxu2 }
 0x143   :  { %v351_v29 = vsel %vm216_vm1, %v350_v31, %v2424_v43  ;;  %v663_v5 = vperm.slane %v655_v55, %v2381_v52  ;;  %v680_v11 = vrot.slane %v675_v12, 4  ;;  %v652_v36 = vrot.slane %v640_v62, 4 }
 0x144   :  { %v357_v32 = vperm.slane %v351_v29, %v2381_v52  ;;  %v363_v33 = vsel %vm216_vm1, %v362_v0, %v2421_v39  ;;  %v381_v51 = vsel %vm216_vm1, %v373_v37, %v380_v30  ;;  %v664_v38 = vrot.slane %v2506_v7, 4 }
 0x145   :  { %v369_v35 = vperm.slane %v363_v33, %v2381_v52  ;;  %1983 = vmatmul.msk.bf16.vlgmr.msrb.gmra.mxu1 %vm940_vm2, %v438_v4  ;;  %v681_v43 = vsel %vm216_vm1, %v680_v11, %v663_v5  ;;  %v439_v42 = vpack.c.bf16 %v381_v51, %v381_v51  ;;  %v682_v50 = vrot.slane %v663_v5, 4 }
 0x146   :  { %v376_v41 = vrot.slane %v357_v32, 4  ;;  %v690_v58 = vpack.c.bf16 %v681_v43, %v681_v43  ;;  %v653_v60 = vsel %vm216_vm1, %v652_v36, %v634_v14  ;;  %v665_v39 = vsel %vm216_vm1, %v664_v38, %v2497_v63 }
 0x147   :  { %v374_v19 = vrot.slane %v369_v35, 4  ;;  %1984 = vmatmul.msk.bf16.vlgmr.msrb.gmra.mxu2 %vm940_vm2, %v439_v42  ;;  %v659_v49 = vperm.slane %v653_v60, %v2381_v52  ;;  %v671_v7 = vperm.slane %v665_v39, %v2381_v52  ;;  %v683_v56 = vsel %vm216_vm1, %v675_v12, %v682_v50 }
 0x148   :  { %v377_v1 = vsel %vm216_vm1, %v369_v35, %v376_v41  ;;  %v1059_v54 = vsel %vm940_vm2, %v690_v58, 0  ;;  %v691_v3 = vpack.c.bf16 %v683_v56, %v683_v56  ;;  %v407_v10 = vsel %vm216_vm1, %v2541_v57, %v406_v46  ;;  %v2072_v56 = vld [vmem:[%s2986_s6] ss:$0 sm:$0xff]  ;;  %s2214_s6 = smov 16  }
 0x149   :  { %v375_v2 = vsel %vm216_vm1, %v374_v19, %v357_v32  ;;  %v437_v45 = vpack.c.bf16 %v377_v1, %v377_v1  ;;  %1068 = vmatpush.bf16.xpose.msra.mxu1 %v1059_v54  ;;  %v676_v9 = vrot.slane %v671_v7, 4  ;;  %v678_v63 = vrot.slane %v659_v49, 4 }
 0x14a   :  { %v436_v8 = vpack.c.bf16 %v375_v2, %v375_v2  ;;  %v1078_v21 = vsel %vm940_vm2, %v691_v3, 0  ;;  %v415_v13 = vperm.slane %v407_v10, %v2381_v52  ;;  %v419_v37 = vsel %vm216_vm1, %v2546_v53, %v418_v59  ;;  %v190_v12 = vpop.f32.mrf.mxu2 }
 0x14b   :  { %1982 = vmatmul.msk.bf16.vlgmr.msrb.gmra.mxu0 %vm940_vm2, %v437_v45  ;;  %v404_v28 = vrot.slane %v2541_v57, 4  ;;  %v677_v44 = vsel %vm216_vm1, %v676_v9, %v659_v49  ;;  %1087 = vmatpush.bf16.xpose.msra.mxu2 %v1078_v21  ;;  %v679_v46 = vsel %vm216_vm1, %v671_v7, %v678_v63  ;;  %v427_v14 = vperm.slane %v419_v37, %v2381_v52 }
 0x14c   :  { %1981 = vmatmul.msk.bf16.vlgmr.msra.gmra.mxu3 %vm940_vm2, %v436_v8  ;;  %v688_v48 = vpack.c.bf16 %v677_v44, %v677_v44  ;;  %v689_v15 = vpack.c.bf16 %v679_v46, %v679_v46  ;;  %v417_v59 = vsel %vm216_vm1, %v416_v6, %v2531_v34  ;;  %v434_v24 = vrot.slane %v415_v13, 4 }
 0x14d   :  { %v405_v17 = vsel %vm216_vm1, %v404_v28, %v2527_v40  ;;  %v432_v57 = vrot.slane %v427_v14, 4  ;;  %v423_v23 = vperm.slane %v417_v59, %v2381_v52  ;;  %v2656_v54 = vadd.f32 %v2072_v56, %v188_v16 }
 0x14e   :  { %v411_v18 = vperm.slane %v405_v17, %v2381_v52  ;;  %v1021_v20 = vsel %vm940_vm2, %v688_v48, 0  ;;  %v1040_v22 = vsel %vm940_vm2, %v689_v15, 0  ;;  %v435_v53 = vsel %vm216_vm1, %v427_v14, %v434_v24 }
 0x14f   :  { %1030 = vmatpush.bf16.xpose.msrb.mxu3 %v1021_v20  ;;  %1049 = vmatpush.bf16.xpose.msra.mxu0 %v1040_v22  ;;  %v433_v62 = vsel %vm216_vm1, %v432_v57, %v415_v13  ;;  %v428_v25 = vrot.slane %v423_v23, 4  ;;  %v443_v34 = vpack.c.bf16 %v435_v53, %v435_v53  ;;  %v2658_v2 = vadd.f32 %v2072_v56, %v190_v12 }
 0x150   :  { %v430_v40 = vrot.slane %v411_v18, 4  ;;  %v442_v61 = vpack.c.bf16 %v433_v62, %v433_v62 }
 0x151   :  { %v429_v47 = vsel %vm216_vm1, %v428_v25, %v411_v18  ;;  %v2060_v3 = vpack.i.bf16 %v2658_v2, %v2656_v54 }
 0x152   :  { %v431_v6 = vsel %vm216_vm1, %v423_v23, %v430_v40  ;;  %v440_v27 = vpack.c.bf16 %v429_v47, %v429_v47 }
 0x153   :  { %v441_v31 = vpack.c.bf16 %v431_v6, %v431_v6 }
 0x155   :  { %1987 = vmatmul.msk.bf16.vlgmr.msra.gmra.mxu1 %vm940_vm2, %v442_v61 }
 0x157   :  { %1988 = vmatmul.msk.bf16.vlgmr.msra.gmra.mxu2 %vm940_vm2, %v443_v34 }
 0x15b   :  { %1986 = vmatmul.msk.bf16.vlgmr.msra.gmra.mxu0 %vm940_vm2, %v441_v31 }
 0x15c   :  { %1985 = vmatmul.msk.bf16.vlgmr.msrb.gmra.mxu3 %vm940_vm2, %v440_v27 }
 0x1c2   :  { %v994_v0 = vpop.f32.mrf.mxu1 }
 0x1c3   :  { %v1099_v4 = vsel %vm940_vm2, %v994_v0, -inf }
 0x1c4   :  { %1100 = vmax.xlane.f32.xlu1 %v1099_v4 }
 0x1c8   :  { %v975_v55 = vpop.f32.mrf.mxu0 }
 0x1c9   :  { %v1096_v29 = vsel %vm940_vm2, %v975_v55, -inf }
 0x1ca   :  { %1097 = vmax.xlane.f32.xlu2 %v1096_v29  ;;  %v996_v30 = vpop.f32.mrf.mxu1  ;;  %v1013_v5 = vpop.f32.mrf.mxu2 }
 0x1cb   :  { %v1102_v11 = vsel %vm940_vm2, %v1013_v5, -inf }
 0x1cc   :  { %1103 = vmax.xlane.f32.xlu0 %v1102_v11 }
 0x1cf   :  { %v956_v32 = vpop.f32.mrf.mxu3 }
 0x1d0   :  { %v977_v33 = vpop.f32.mrf.mxu0  ;;  %v1093_v35 = vsel %vm940_vm2, %v956_v32, -inf }
 0x1d2   :  { %1094 = vmax.xlane.f32.xlu2 %v1093_v35  ;;  %v1015_v51 = vpop.f32.mrf.mxu2  ;;  %v1070_v36 = vpop.f32.mrf.mxu1 }
 0x1d3   :  { %v1111_v38 = vsel %vm940_vm2, %v1070_v36, -inf }
 0x1d4   :  { %1112 = vmax.xlane.f32.xlu1 %v1111_v38 }
 0x1d7   :  { %v958_v43 = vpop.f32.mrf.mxu3 }
 0x1d8   :  { %v2647_v41 = vpop.f32.mrf.mxu0 }
 0x1d9   :  { %v1108_v42 = vsel %vm940_vm2, %v2647_v41, -inf }
 0x1da   :  { %1109 = vmax.xlane.f32.xlu2 %v1108_v42  ;;  %v1072_v50 = vpop.f32.mrf.mxu1  ;;  %v1089_v58 = vpop.f32.mrf.mxu2 }
 0x1db   :  { %v1114_v19 = vsel %vm940_vm2, %v1089_v58, -inf }
 0x1dc   :  { %1115 = vmax.xlane.f32.xlu0 %v1114_v19 }
 0x1df   :  { %v1032_v60 = vpop.f32.mrf.mxu3 }
 0x1e0   :  { %v1053_v39 = vpop.f32.mrf.mxu0  ;;  %v1105_v49 = vsel %vm940_vm2, %v1032_v60, -inf }
 0x1e2   :  { %1106 = vmax.xlane.f32.xlu2 %v1105_v49  ;;  %v1091_v7 = vpop.f32.mrf.mxu2 }
 0x1e7   :  { %v1034_v1 = vpop.f32.mrf.mxu3 }
 0x1ed   :  { %2061 = vrot.lane.b32.xlu1 %v2060_v3, %s2211_s2 }
 0x1f0   :  { %2056 = vrot.lane.b32.xlu0 %v2060_v3, %s2210_s28 }
 0x1fa   :  { %2066 = vrot.lane.b32.xlu2 %v2060_v3, %s2209_s27 }
 0x237   :  { %v1101_v45 = vpop.xlane.xlu1 %1100 }
 0x238   :  { %v1119_v8 = vsub.f32 %v994_v0, %v1101_v45 }
 0x23a   :  { %v1129_v9 = vmul.f32 1.442695, %v1119_v8 }
 0x23c   :  { %2079 = vpow2.f32 %v1129_v9 }
 0x23d   :  { %v1098_v63 = vpop.xlane.xlu2 %1097 }
 0x23e   :  { %v1118_v14 = vsub.f32 %v975_v55, %v1098_v63  ;;  %v714_v55 = vrot.slane %v2656_v54, 4 }
 0x23f   :  { %v1104_v10 = vpop.xlane.xlu0 %1103 }
 0x240   :  { %v1120_v21 = vsub.f32 %v1013_v5, %v1104_v10  ;;  %v1127_v18 = vmul.f32 1.442695, %v1118_v14  ;;  %v770_v5 = vrot.slane %v2658_v2, 4 }
 0x242   :  { %v2665_v13 = vpop.eup %2079  ;;  %v1131_v37 = vmul.f32 1.442695, %v1120_v21 }
 0x243   :  { %v1147_v28 = vsel %vm940_vm2, %v2665_v13, 0.0 }
 0x244   :  { %2081 = vpow2.f32 %v1131_v37  ;;  %1148 = vadd.xlane.f32.xlu2 %v1147_v28 }
 0x245   :  { %v1095_v44 = vpop.xlane.xlu2 %1094 }
 0x246   :  { %v1117_v46 = vsub.f32 %v956_v32, %v1095_v44 }
 0x247   :  { %v1113_v15 = vpop.xlane.xlu1 %1112 }
 0x248   :  { %v1125_v48 = vmul.f32 1.442695, %v1117_v46  ;;  %v1123_v17 = vsub.f32 %v1070_v36, %v1113_v15 }
 0x24a   :  { %2083 = vpow2.f32 %v1125_v48  ;;  %v2669_v59 = vpop.eup %2081  ;;  %v1137_v57 = vmul.f32 1.442695, %v1123_v17 }
 0x24b   :  { %v1150_v20 = vsel %vm940_vm2, %v2669_v59, 0.0 }
 0x24c   :  { %2085 = vpow2.f32 %v1137_v57  ;;  %1151 = vadd.xlane.f32.xlu1 %v1150_v20 }
 0x24d   :  { %v1110_v22 = vpop.xlane.xlu2 %1109  ;;  %2087 = vpow2.f32 %v1127_v18 }
 0x24e   :  { %v1122_v31 = vsub.f32 %v2647_v41, %v1110_v22 }
 0x24f   :  { %v1116_v24 = vpop.xlane.xlu0 %1115 }
 0x250   :  { %v2673_v23 = vpop.eup %2083  ;;  %v1124_v62 = vsub.f32 %v1089_v58, %v1116_v24  ;;  %v1135_v12 = vmul.f32 1.442695, %v1122_v31 }
 0x251   :  { %v1141_v40 = vsel %vm940_vm2, %v2673_v23, 0.0 }
 0x252   :  { %1142 = vadd.xlane.f32.xlu0 %v1141_v40  ;;  %v2677_v25 = vpop.eup %2085  ;;  %v1139_v53 = vmul.f32 1.442695, %v1124_v62 }
 0x253   :  { %v1159_v61 = vsel %vm940_vm2, %v2677_v25, 0.0  ;;  %v2681_v6 = vpop.eup %2087 }
 0x254   :  { %1160 = vadd.xlane.f32.xlu2 %v1159_v61  ;;  %2089 = vpow2.f32 %v1139_v53  ;;  %v1144_v16 = vsel %vm940_vm2, %v2681_v6, 0.0 }
 0x255   :  { %v1107_v34 = vpop.xlane.xlu2 %1106 }
 0x256   :  { %v1121_v47 = vsub.f32 %v1032_v60, %v1107_v34 }
 0x258   :  { %v1133_v27 = vmul.f32 1.442695, %v1121_v47 }
 0x25a   :  { %2091 = vpow2.f32 %v1133_v27  ;;  %1145 = vadd.xlane.f32.xlu0 %v1144_v16  ;;  %v2686_v0 = vpop.eup %2089 }
 0x25b   :  { %2093 = vpow2.f32 %v1135_v12  ;;  %v1162_v32 = vsel %vm940_vm2, %v2686_v0, 0.0 }
 0x25d   :  { %v2067_v4 = vpop.permute.xlu2 %2066 }
 0x25e   :  { %v2069_v30 = vunpack.i.h.bf16 %v2067_v4  ;;  %v2068_v33 = vunpack.i.l.bf16 %v2067_v4 }
 0x25f   :  { %v2062_v11 = vpop.permute.xlu1 %2061 }
 0x260   :  { %v2689_v29 = vpop.eup %2091  ;;  %v2064_v35 = vunpack.i.h.bf16 %v2062_v11  ;;  %v2063_v51 = vunpack.i.l.bf16 %v2062_v11  ;;  %v780_v58 = vrot.slane %v2069_v30, 4  ;;  %v724_v39 = vrot.slane %v2068_v33, 4 }
 0x261   :  { %v1153_v36 = vsel %vm940_vm2, %v2689_v29, 0.0  ;;  %v2703_v1 = vpop.eup %2093 }
 0x262   :  { %1163 = vadd.xlane.f32.xlu0 %v1162_v32  ;;  %1154 = vadd.xlane.f32.xlu1 %v1153_v36  ;;  %v768_v38 = vrot.slane %v2064_v35, 4  ;;  %v771_v43 = vsel %vm216_vm1, %v2064_v35, %v770_v5  ;;  %v712_v41 = vrot.slane %v2063_v51, 4  ;;  %v715_v42 = vsel %vm216_vm1, %v2063_v51, %v714_v55  ;;  %v2057_v50 = vpop.permute.xlu0 %2056 }
 0x263   :  { %v2059_v19 = vunpack.i.h.bf16 %v2057_v50  ;;  %v2058_v60 = vunpack.i.l.bf16 %v2057_v50  ;;  %v723_v56 = vperm.slane %v715_v42, %v2364_v26  ;;  %v779_v45 = vperm.slane %v771_v43, %v2364_v26 }
 0x264   :  { %v769_v49 = vsel %vm216_vm1, %v768_v38, %v2658_v2  ;;  %v713_v7 = vsel %vm216_vm1, %v712_v41, %v2656_v54  ;;  %v1156_v48 = vsel %vm940_vm2, %v2703_v1, 0.0 }
 0x265   :  { %v775_v3 = vperm.slane %v769_v49, %v2364_v26  ;;  %v719_v8 = vperm.slane %v713_v7, %v2364_v26  ;;  %v782_v9 = vrot.slane %v2059_v19, 4  ;;  %v725_v63 = vsel %vm216_vm1, %v724_v39, %v2058_v60 }
 0x266   :  { %v726_v10 = vrot.slane %v2058_v60, 4  ;;  %v781_v21 = vsel %vm216_vm1, %v780_v58, %v2059_v19  ;;  %v731_v54 = vperm.slane %v725_v63, %v2364_v26  ;;  %v750_v44 = vrot.slane %v723_v56, 4 }
 0x267   :  { %v794_v2 = vrot.slane %v775_v3, 4  ;;  %v738_v37 = vrot.slane %v719_v8, 4  ;;  %v787_v28 = vperm.slane %v781_v21, %v2364_v26  ;;  %v783_v14 = vsel %vm216_vm1, %v2069_v30, %v782_v9 }
 0x268   :  { %v727_v46 = vsel %vm216_vm1, %v2068_v33, %v726_v10  ;;  %v736_v17 = vrot.slane %v731_v54, 4  ;;  %v791_v18 = vperm.slane %v783_v14, %v2364_v26  ;;  %v806_v20 = vrot.slane %v779_v45, 4 }
 0x269   :  { %v735_v15 = vperm.slane %v727_v46, %v2364_v26  ;;  %v739_v57 = vsel %vm216_vm1, %v731_v54, %v738_v37  ;;  %v792_v24 = vrot.slane %v787_v28, 4  ;;  %v795_v62 = vsel %vm216_vm1, %v787_v28, %v794_v2 }
 0x26a   :  { %1157 = vadd.xlane.f32.xlu1 %v1156_v48  ;;  %v747_v22 = vperm.slane %v739_v57, %v2381_v52  ;;  %v737_v40 = vsel %vm216_vm1, %v736_v17, %v719_v8  ;;  %v803_v34 = vperm.slane %v795_v62, %v2381_v52  ;;  %v804_v55 = vrot.slane %v791_v18, 4 }
 0x26b   :  { %v748_v53 = vrot.slane %v735_v15, 4  ;;  %v751_v61 = vsel %vm216_vm1, %v735_v15, %v750_v44  ;;  %v743_v47 = vperm.slane %v737_v40, %v2381_v52  ;;  %v793_v16 = vsel %vm216_vm1, %v792_v24, %v775_v3 }
 0x26c   :  { %v759_v31 = vperm.slane %v751_v61, %v2381_v52  ;;  %v762_v27 = vrot.slane %v747_v22, 4  ;;  %v799_v4 = vperm.slane %v793_v16, %v2381_v52  ;;  %v807_v30 = vsel %vm216_vm1, %v791_v18, %v806_v20 }
 0x26d   :  { %v749_v12 = vsel %vm216_vm1, %v748_v53, %v723_v56  ;;  %v760_v11 = vrot.slane %v743_v47, 4  ;;  %v805_v35 = vsel %vm216_vm1, %v804_v55, %v779_v45  ;;  %v815_v51 = vperm.slane %v807_v30, %v2381_v52 }
 0x26e   :  { %v755_v5 = vperm.slane %v749_v12, %v2381_v52  ;;  %v763_v32 = vsel %vm216_vm1, 0.0, %v762_v27  ;;  %v766_v33 = vrot.slane %v759_v31, 4  ;;  %v816_v36 = vrot.slane %v799_v4, 4 }
 0x26f   :  { %v818_v38 = vrot.slane %v803_v34, 4  ;;  %v761_v43 = vsel %vm216_vm1, 0.0, %v760_v11  ;;  %v811_v50 = vperm.slane %v805_v35, %v2381_v52  ;;  %v822_v60 = vrot.slane %v815_v51, 4 }
 0x270   :  { %v764_v41 = vrot.slane %v755_v5, 4  ;;  %v767_v42 = vsel %vm216_vm1, 0.0, %v766_v33  ;;  %v817_v58 = vsel %vm216_vm1, 0.0, %v816_v36  ;;  %v824_v39 = vsel %vm216_vm1, %v762_v27, %v743_v47 }
 0x271   :  { %v819_v19 = vsel %vm216_vm1, 0.0, %v818_v38  ;;  %v820_v49 = vrot.slane %v811_v50, 4  ;;  %v828_v7 = vperm.slane %v824_v39, %v2364_v26  ;;  %v829_v56 = vrot.slane %v763_v32, 4 }
 0x272   :  { %v840_v3 = vrot.slane %v767_v42, 4  ;;  %v823_v45 = vsel %vm216_vm1, 0.0, %v822_v60  ;;  %v878_v8 = vsel %vm216_vm1, %v818_v38, %v799_v4  ;;  %v883_v9 = vrot.slane %v819_v19, 4 }
 0x273   :  { %v765_v63 = vsel %vm216_vm1, 0.0, %v764_v41  ;;  %v882_v10 = vperm.slane %v878_v8, %v2364_v26  ;;  %v894_v21 = vrot.slane %v823_v45, 4  ;;  %v830_v2 = vsel %vm216_vm1, %v829_v56, %v761_v43 }
 0x274   :  { %v835_v37 = vsel %vm216_vm1, %v766_v33, %v755_v5  ;;  %v834_v54 = vperm.slane %v830_v2, %v2364_v26  ;;  %v841_v44 = vsel %vm216_vm1, %v840_v3, %v765_v63  ;;  %v848_v46 = vrot.slane %v828_v7, 4 }
 0x275   :  { %v839_v28 = vperm.slane %v835_v37, %v2364_v26  ;;  %v845_v14 = vperm.slane %v841_v44, %v2364_v26  ;;  %v821_v48 = vsel %vm216_vm1, 0.0, %v820_v49  ;;  %v884_v15 = vsel %vm216_vm1, %v883_v9, %v817_v58 }
 0x276   :  { %v889_v17 = vsel %vm216_vm1, %v822_v60, %v811_v50  ;;  %v849_v57 = vsel %vm216_vm1, %v834_v54, %v848_v46  ;;  %v888_v20 = vperm.slane %v884_v15, %v2364_v26  ;;  %v895_v62 = vsel %vm216_vm1, %v894_v21, %v821_v48 }
 0x277   :  { %v860_v18 = vrot.slane %v839_v28, 4  ;;  %v893_v22 = vperm.slane %v889_v17, %v2364_v26  ;;  %v857_v24 = vperm.slane %v849_v57, %v2381_v52  ;;  %v902_v40 = vrot.slane %v882_v10, 4 }
 0x278   :  { %v846_v53 = vrot.slane %v834_v54, 4  ;;  %v899_v34 = vperm.slane %v895_v62, %v2364_v26  ;;  %v858_v31 = vrot.slane %v845_v14, 4  ;;  %v900_v41 = vrot.slane %v888_v20, 4 }
 0x279   :  { %v861_v61 = vsel %vm216_vm1, %v845_v14, %v860_v18  ;;  %v914_v47 = vrot.slane %v893_v22, 4  ;;  %v876_v16 = vrot.slane %v857_v24, 4  ;;  %v903_v12 = vsel %vm216_vm1, %v888_v20, %v902_v40 }
 0x27a   :  { %v869_v27 = vperm.slane %v861_v61, %v2381_v52  ;;  %v847_v4 = vsel %vm216_vm1, %v846_v53, %v828_v7  ;;  %v911_v55 = vperm.slane %v903_v12, %v2381_v52  ;;  %v859_v11 = vsel %vm216_vm1, %v858_v31, %v839_v28 }
 0x27b   :  { %v915_v30 = vsel %vm216_vm1, %v899_v34, %v914_v47  ;;  %v853_v5 = vperm.slane %v847_v4, %v2381_v52  ;;  %v865_v51 = vperm.slane %v859_v11, %v2381_v52  ;;  %v912_v19 = vrot.slane %v899_v34, 4 }
 0x27c   :  { %v877_v32 = vsel %vm216_vm1, %v869_v27, %v876_v16  ;;  %v874_v33 = vrot.slane %v869_v27, 4  ;;  %v923_v35 = vperm.slane %v915_v30, %v2381_v52  ;;  %v930_v38 = vrot.slane %v911_v55, 4 }
 0x27d   :  { %v935_v36 = vpack.c.bf16 %v877_v32, %v877_v32  ;;  %v872_v43 = vrot.slane %v853_v5, 4  ;;  %v870_v58 = vrot.slane %v865_v51, 4  ;;  %v901_v2 = vsel %vm216_vm1, %v900_v41, %v882_v10 }
 0x27e   :  { %v875_v42 = vsel %vm216_vm1, %v874_v33, %v857_v24  ;;  %v928_v50 = vrot.slane %v923_v35, 4  ;;  %v931_v49 = vsel %vm216_vm1, %v923_v35, %v930_v38  ;;  %v907_v28 = vperm.slane %v901_v2, %v2381_v52 }
 0x27f   :  { %v1355_v60 = vsel %vm1296_vm3, %v935_v36, 0  ;;  %v934_v39 = vpack.c.bf16 %v875_v42, %v875_v42  ;;  %v873_v7 = vsel %vm216_vm1, %v865_v51, %v872_v43  ;;  %v939_v56 = vpack.c.bf16 %v931_v49, %v931_v49 }
 0x280   :  { %1364 = vmatpush.bf16.msrb.mxu2 %v1355_v60  ;;  %v933_v3 = vpack.c.bf16 %v873_v7, %v873_v7  ;;  %v929_v45 = vsel %vm216_vm1, %v928_v50, %v911_v55  ;;  %v871_v8 = vsel %vm216_vm1, %v870_v58, %v853_v5  ;;  %v913_v44 = vsel %vm216_vm1, %v912_v19, %v893_v22 }
 0x281   :  { %v1336_v9 = vsel %vm1296_vm3, %v934_v39, 0  ;;  %v938_v63 = vpack.c.bf16 %v929_v45, %v929_v45  ;;  %v932_v21 = vpack.c.bf16 %v871_v8, %v871_v8  ;;  %v1431_v37 = vsel %vm1296_vm3, %v939_v56, 0 }
 0x282   :  { %1345 = vmatpush.bf16.msrb.mxu1 %v1336_v9  ;;  %v1317_v54 = vsel %vm1296_vm3, %v933_v3, 0  ;;  %v919_v48 = vperm.slane %v913_v44, %v2381_v52  ;;  %v926_v10 = vrot.slane %v907_v28, 4 }
 0x283   :  { %1326 = vmatpush.bf16.msrb.mxu0 %v1317_v54  ;;  %v1412_v46 = vsel %vm1296_vm3, %v938_v63, 0  ;;  %v1298_v14 = vsel %vm1296_vm3, %v932_v21, 0 }
 0x284   :  { %1440 = vmatpush.bf16.msra.mxu2 %v1431_v37  ;;  %1307 = vmatpush.bf16.msra.mxu3 %v1298_v14  ;;  %v924_v15 = vrot.slane %v919_v48, 4  ;;  %v927_v17 = vsel %vm216_vm1, %v919_v48, %v926_v10 }
 0x285   :  { %v937_v57 = vpack.c.bf16 %v927_v17, %v927_v17 }
 0x286   :  { %1421 = vmatpush.bf16.msra.mxu1 %v1412_v46  ;;  %v925_v18 = vsel %vm216_vm1, %v924_v15, %v907_v28 }
 0x287   :  { %v936_v20 = vpack.c.bf16 %v925_v18, %v925_v18  ;;  %v1393_v22 = vsel %vm1296_vm3, %v937_v57, 0 }
 0x288   :  { %1402 = vmatpush.bf16.msra.mxu0 %v1393_v22 }
 0x289   :  { %v1374_v24 = vsel %vm1296_vm3, %v936_v20, 0 }
 0x28a   :  { %1383 = vmatpush.bf16.msrb.mxu3 %v1374_v24 }
 0x2b7   :  { %v1149_v62 = vpop.xlane.xlu2 %1148 }
 0x2b8   :  { %2095 = vrcp.f32 %v1149_v62  ;;  %v1204_v47 = vand.u32 2147483648, %v1149_v62  ;;  %v1202_v27 = vand.u32 2147483647, %v1149_v62  ;;  %vm1198_vm5 = vweird.f32 %v1149_v62 }
 0x2ba   :  { %v1205_v55 = vor.u32 1.1754944e-38, %v1204_v47  ;;  %vm1203_vm7 = vcmp.eq.f32.partialorder %v1202_v27, 8.507059e+37 }
 0x2be   :  { %v2096_v40 = vpop.eup %2095 }
 0x2bf   :  { %v1194_v53 = vmul.f32 %v2096_v40, %v1149_v62  ;;  %v1152_v61 = vpop.xlane.xlu1 %1151  ;;  %vm1199_vm4 = vweird.f32 %v2096_v40 }
 0x2c0   :  { %2097 = vrcp.f32 %v1152_v61  ;;  %vm1200_vm6 = vmor %vm1198_vm5, %vm1199_vm4  ;;  %v1218_v51 = vand.u32 2147483648, %v1152_v61  ;;  %v1216_v43 = vand.u32 2147483647, %v1152_v61  ;;  %vm1212_vm9 = vweird.f32 %v1152_v61 }
 0x2c1   :  { %v1195_v34 = vsub.f32 1.0, %v1194_v53 }
 0x2c2   :  { %v1219_v60 = vor.u32 1.1754944e-38, %v1218_v51  ;;  %vm1217_vm11 = vcmp.eq.f32.partialorder %v1216_v43, 8.507059e+37 }
 0x2c3   :  { %v1196_v31 = vmul.f32 %v2096_v40, %v1195_v34 }
 0x2c5   :  { %v1143_v16 = vpop.xlane.xlu0 %1142  ;;  %v1197_v12 = vadd.f32 %v2096_v40, %v1196_v31 }
 0x2c6   :  { %2099 = vrcp.f32 %v1143_v16  ;;  %v2098_v4 = vpop.eup %2097  ;;  %v1176_v49 = vand.u32 2147483648, %v1143_v16  ;;  %v1174_v45 = vand.u32 2147483647, %v1143_v16  ;;  %vm1170_vm13 = vweird.f32 %v1143_v16 }
 0x2c7   :  { %v1201_v30 = vsel %vm1200_vm6, %v2096_v40, %v1197_v12  ;;  %v1208_v5 = vmul.f32 %v2098_v4, %v1152_v61  ;;  %v1161_v11 = vpop.xlane.xlu2 %1160  ;;  %vm1213_vm8 = vweird.f32 %v2098_v4 }
 0x2c8   :  { %v1206_v32 = vsel %vm1203_vm7, %v1205_v55, %v1201_v30  ;;  %2101 = vrcp.f32 %v1161_v11  ;;  %vm1214_vm10 = vmor %vm1212_vm9, %vm1213_vm8  ;;  %v1177_v21 = vor.u32 1.1754944e-38, %v1176_v49  ;;  %v1260_v2 = vand.u32 2147483648, %v1161_v11 }
 0x2c9   :  { %v1279_v33 = vmul.f32 %v2665_v13, %v1206_v32  ;;  %v1209_v35 = vsub.f32 1.0, %v1208_v5  ;;  %v1258_v28 = vand.u32 2147483647, %v1161_v11  ;;  %vm1175_vm3 = vcmp.eq.f32.partialorder %v1174_v45, 8.507059e+37 }
 0x2ca   :  { %vm1254_vm4 = vweird.f32 %v1161_v11  ;;  %v1261_v57 = vor.u32 1.1754944e-38, %v1260_v2 }
 0x2cb   :  { %v1210_v38 = vmul.f32 %v2098_v4, %v1209_v35  ;;  %v1287_v41 = vpack.c.bf16 %v1279_v33, %v1279_v33  ;;  %vm1259_vm6 = vcmp.eq.f32.partialorder %v1258_v28, 8.507059e+37 }
 0x2cc   :  { %v2100_v36 = vpop.eup %2099 }
 0x2cd   :  { %v1166_v42 = vmul.f32 %v2100_v36, %v1143_v16  ;;  %v1146_v50 = vpop.xlane.xlu0 %1145  ;;  %v1211_v58 = vadd.f32 %v2098_v4, %v1210_v38  ;;  %1991 = vmatmul.msk.bf16.vlgmr.msrb.gmra.mxu1 %vm940_vm2, %v1287_v41  ;;  %vm1171_vm12 = vweird.f32 %v2100_v36 }
 0x2ce   :  { %2103 = vrcp.f32 %v1146_v50  ;;  %v2102_v19 = vpop.eup %2101  ;;  %vm1172_vm14 = vmor %vm1170_vm13, %vm1171_vm12  ;;  %v1190_v22 = vand.u32 2147483648, %v1146_v50  ;;  %v1188_v40 = vand.u32 2147483647, %v1146_v50  ;;  %vm1184_vm8 = vweird.f32 %v1146_v50 }
 0x2cf   :  { %v1167_v39 = vsub.f32 1.0, %v1166_v42  ;;  %v1215_v13 = vsel %vm1214_vm10, %v2098_v4, %v1211_v58  ;;  %v1250_v7 = vmul.f32 %v2102_v19, %v1161_v11  ;;  %vm1255_vm15 = vweird.f32 %v2102_v19 }
 0x2d0   :  { %v1220_v56 = vsel %vm1217_vm11, %v1219_v60, %v1215_v13  ;;  %vm1256_vm5 = vmor %vm1254_vm4, %vm1255_vm15  ;;  %vm1189_vm10 = vcmp.eq.f32.partialorder %v1188_v40, 8.507059e+37 }
 0x2d1   :  { %v1168_v3 = vmul.f32 %v2100_v36, %v1167_v39  ;;  %v1280_v8 = vmul.f32 %v2669_v59, %v1220_v56  ;;  %v1251_v9 = vsub.f32 1.0, %v1250_v7 }
 0x2d3   :  { %v1169_v63 = vadd.f32 %v2100_v36, %v1168_v3  ;;  %v1252_v54 = vmul.f32 %v2102_v19, %v1251_v9  ;;  %v1288_v44 = vpack.c.bf16 %v1280_v8, %v1280_v8 }
 0x2d4   :  { %v2104_v37 = vpop.eup %2103 }
 0x2d5   :  { %v1173_v46 = vsel %vm1172_vm14, %v2100_v36, %v1169_v63  ;;  %v1180_v14 = vmul.f32 %v2104_v37, %v1146_v50  ;;  %v1164_v48 = vpop.xlane.xlu0 %1163  ;;  %v2793_v10 = vpop.xlane.xlu1 %1154  ;;  %v1253_v17 = vadd.f32 %v2102_v19, %v1252_v54  ;;  %1992 = vmatmul.msk.bf16.vlgmr.msrb.gmra.mxu2 %vm940_vm2, %v1288_v44  ;;  %vm1185_vm7 = vweird.f32 %v2104_v37 }
 0x2d6   :  { %v1178_v15 = vsel %vm1175_vm3, %v1177_v21, %v1173_v46  ;;  %2105 = vrcp.f32 %v1164_v48  ;;  %vm1186_vm9 = vmor %vm1184_vm8, %vm1185_vm7  ;;  %v1272_v11 = vand.u32 2147483647, %v1164_v48  ;;  %v1274_v32 = vand.u32 2147483648, %v1164_v48 }
 0x2d7   :  { %v1277_v59 = vmul.f32 %v2673_v23, %v1178_v15  ;;  %v1181_v18 = vsub.f32 1.0, %v1180_v14  ;;  %v1257_v20 = vsel %vm1256_vm5, %v2102_v19, %v1253_v17  ;;  %2107 = vrcp.f32 %v2793_v10 }
 0x2d8   :  { %v1262_v24 = vsel %vm1259_vm6, %v1261_v57, %v1257_v20  ;;  %v1191_v23 = vor.u32 1.1754944e-38, %v1190_v22  ;;  %vm1268_vm12 = vweird.f32 %v1164_v48  ;;  %v1232_v36 = vand.u32 2147483648, %v2793_v10 }
 0x2d9   :  { %v1182_v62 = vmul.f32 %v2104_v37, %v1181_v18  ;;  %v1283_v53 = vmul.f32 %v2677_v25, %v1262_v24  ;;  %v1285_v61 = vpack.c.bf16 %v1277_v59, %v1277_v59  ;;  %v1230_v41 = vand.u32 2147483647, %v2793_v10 }
 0x2da   :  { %v1275_v42 = vor.u32 1.1754944e-38, %v1274_v32  ;;  %vm1226_vm15 = vweird.f32 %v2793_v10  ;;  %vm1273_vm3 = vcmp.eq.f32.partialorder %v1272_v11, 8.507059e+37  ;;  %v1233_v39 = vor.u32 1.1754944e-38, %v1232_v36 }
 0x2db   :  { %v1183_v34 = vadd.f32 %v2104_v37, %v1182_v62  ;;  %1989 = vmatmul.msk.bf16.vlgmr.msra.gmra.mxu3 %vm940_vm2, %v1285_v61  ;;  %v1291_v31 = vpack.c.bf16 %v1283_v53, %v1283_v53  ;;  %vm1231_vm5 = vcmp.eq.f32.partialorder %v1230_v41, 8.507059e+37 }
 0x2dc   :  { %v2106_v47 = vpop.eup %2105 }
 0x2dd   :  { %v1187_v27 = vsel %vm1186_vm9, %v2104_v37, %v1183_v34  ;;  %v1264_v16 = vmul.f32 %v2106_v47, %v1164_v48  ;;  %v1158_v12 = vpop.xlane.xlu1 %1157  ;;  %v2108_v4 = vpop.eup %2107  ;;  %1995 = vmatmul.msk.bf16.vlgmr.msra.gmra.mxu1 %vm940_vm2, %v1291_v31  ;;  %vm1269_vm11 = vweird.f32 %v2106_v47 }
 0x2de   :  { %v1192_v55 = vsel %vm1189_vm10, %v1191_v23, %v1187_v27  ;;  %2109 = vrcp.f32 %v1158_v12  ;;  %v1222_v5 = vmul.f32 %v2108_v4, %v2793_v10  ;;  %vm1227_vm13 = vweird.f32 %v2108_v4  ;;  %vm1270_vm14 = vmor %vm1268_vm12, %vm1269_vm11 }
 0x2df   :  { %v1278_v25 = vmul.f32 %v2681_v6, %v1192_v55  ;;  %v1265_v30 = vsub.f32 1.0, %v1264_v16  ;;  %vm1228_vm4 = vmor %vm1226_vm15, %vm1227_vm13  ;;  %v1244_v3 = vand.u32 2147483647, %v1158_v12  ;;  %v1246_v45 = vand.u32 2147483648, %v1158_v12 }
 0x2e0   :  { %v1223_v35 = vsub.f32 1.0, %v1222_v5  ;;  %vm1240_vm7 = vweird.f32 %v1158_v12  ;;  %vm1692_vm10 = vcmask 130048   ;;  %vm1695_vm11 = vcmask 195584  }
 0x2e1   :  { %v1266_v33 = vmul.f32 %v2106_v47, %v1265_v30  ;;  %v1286_v51 = vpack.c.bf16 %v1278_v25, %v1278_v25  ;;  %v1247_v37 = vor.u32 1.1754944e-38, %v1246_v45  ;;  %vm1245_vm9 = vcmp.eq.f32.partialorder %v1244_v3, 8.507059e+37 }
 0x2e2   :  { %v1224_v43 = vmul.f32 %v2108_v4, %v1223_v35 }
 0x2e3   :  { %v1267_v38 = vadd.f32 %v2106_v47, %v1266_v33  ;;  %1990 = vmatmul.msk.bf16.vlgmr.msrb.gmra.mxu0 %vm940_vm2, %v1286_v51 }
 0x2e4   :  { %v2110_v6 = vpop.eup %2109  ;;  %v1225_v58 = vadd.f32 %v2108_v4, %v1224_v43 }
 0x2e5   :  { %v1271_v50 = vsel %vm1270_vm14, %v2106_v47, %v1267_v38  ;;  %v1236_v19 = vmul.f32 %v2110_v6, %v1158_v12  ;;  %vm1241_vm6 = vweird.f32 %v2110_v6 }
 0x2e6   :  { %v1276_v60 = vsel %vm1273_vm3, %v1275_v42, %v1271_v50  ;;  %v1229_v13 = vsel %vm1228_vm4, %v2108_v4, %v1225_v58  ;;  %vm1242_vm8 = vmor %vm1240_vm7, %vm1241_vm6  ;;  %vm1856_vm4 = vcmask 523264  }
 0x2e7   :  { %v1284_v49 = vmul.f32 %v2686_v0, %v1276_v60  ;;  %v1237_v7 = vsub.f32 1.0, %v1236_v19  ;;  %v1234_v56 = vsel %vm1231_vm5, %v1233_v39, %v1229_v13 }
 0x2e8   :  { %v1281_v8 = vmul.f32 %v2689_v29, %v1234_v56 }
 0x2e9   :  { %v1238_v9 = vmul.f32 %v2110_v6, %v1237_v7  ;;  %v1292_v63 = vpack.c.bf16 %v1284_v49, %v1284_v49 }
 0x2ea   :  { %v1289_v2 = vpack.c.bf16 %v1281_v8, %v1281_v8 }
 0x2eb   :  { %v1239_v21 = vadd.f32 %v2110_v6, %v1238_v9  ;;  %1996 = vmatmul.msk.bf16.vlgmr.msra.gmra.mxu2 %vm940_vm2, %v1292_v63 }
 0x2ec   :  { %1993 = vmatmul.msk.bf16.vlgmr.msrb.gmra.mxu3 %vm940_vm2, %v1289_v2 }
 0x2ed   :  { %v1243_v54 = vsel %vm1242_vm8, %v2110_v6, %v1239_v21 }
 0x2ee   :  { %v1248_v0 = vsel %vm1245_vm9, %v1247_v37, %v1243_v54 }
 0x2ef   :  { %v1282_v28 = vmul.f32 %v2703_v1, %v1248_v0 }
 0x2f1   :  { %v1290_v44 = vpack.c.bf16 %v1282_v28, %v1282_v28 }
 0x2f3   :  { %1994 = vmatmul.msk.bf16.vlgmr.msra.gmra.mxu0 %vm940_vm2, %v1290_v44 }
 0x34a   :  { %v1347_v29 = vpop.f32.mrf.mxu1 }
 0x34b   :  { %v1446_v10 = vrot.slane %v1347_v29, 4 }
 0x352   :  { %v1349_v46 = vpop.f32.mrf.mxu1 }
 0x358   :  { %v1366_v14 = vpop.f32.mrf.mxu2 }
 0x359   :  { %v1458_v15 = vrot.slane %v1366_v14, 4 }
 0x35a   :  { %v2813_v48 = vpop.f32.mrf.mxu1 }
 0x35b   :  { %v1502_v8 = vrot.slane %v2813_v48, 4 }
 0x35e   :  { %v1309_v17 = vpop.f32.mrf.mxu3 }
 0x35f   :  { %v1447_v59 = vsel %vm216_vm1, %v1446_v10, %v1309_v17  ;;  %v1448_v57 = vrot.slane %v1309_v17, 4 }
 0x360   :  { %v1328_v18 = vpop.f32.mrf.mxu0  ;;  %v1453_v20 = vperm.slane %v1447_v59, %v2364_v26  ;;  %v1368_v24 = vpop.f32.mrf.mxu2 }
 0x361   :  { %v1459_v22 = vsel %vm216_vm1, %v1458_v15, %v1328_v18  ;;  %v1460_v1 = vrot.slane %v1328_v18, 4  ;;  %v1449_v62 = vsel %vm216_vm1, %v1347_v29, %v1448_v57 }
 0x362   :  { %v1465_v40 = vperm.slane %v1459_v22, %v2364_v26  ;;  %v1457_v53 = vperm.slane %v1449_v62, %v2364_v26  ;;  %v1472_v61 = vrot.slane %v1453_v20, 4  ;;  %v1425_v47 = vpop.f32.mrf.mxu1 }
 0x363   :  { %v1461_v34 = vsel %vm216_vm1, %v1366_v14, %v1460_v1 }
 0x364   :  { %v1469_v23 = vperm.slane %v1461_v34, %v2364_v26  ;;  %v1470_v31 = vrot.slane %v1465_v40, 4  ;;  %v1484_v27 = vrot.slane %v1457_v53, 4  ;;  %v1473_v16 = vsel %vm216_vm1, %v1465_v40, %v1472_v61 }
 0x365   :  { %v1481_v4 = vperm.slane %v1473_v16, %v2381_v52 }
 0x366   :  { %v1471_v12 = vsel %vm216_vm1, %v1470_v31, %v1453_v20  ;;  %v1482_v55 = vrot.slane %v1469_v23, 4  ;;  %v1485_v30 = vsel %vm216_vm1, %v1469_v23, %v1484_v27  ;;  %v1311_v5 = vpop.f32.mrf.mxu3 }
 0x367   :  { %v1477_v25 = vperm.slane %v1471_v12, %v2381_v52  ;;  %v1493_v32 = vperm.slane %v1485_v30, %v2381_v52  ;;  %v1496_v33 = vrot.slane %v1481_v4, 4 }
 0x368   :  { %v1483_v11 = vsel %vm216_vm1, %v1482_v55, %v1457_v53  ;;  %v1330_v35 = vpop.f32.mrf.mxu0 }
 0x369   :  { %v1489_v51 = vperm.slane %v1483_v11, %v2381_v52  ;;  %v1494_v36 = vrot.slane %v1477_v25, 4  ;;  %v1497_v38 = vsel %vm216_vm1, 0.0, %v1496_v33  ;;  %v1500_v43 = vrot.slane %v1493_v32, 4 }
 0x36a   :  { %v1558_v41 = vsel %vm216_vm1, %v1496_v33, %v1477_v25  ;;  %v1563_v50 = vrot.slane %v1497_v38, 4 }
 0x36b   :  { %v1495_v6 = vsel %vm216_vm1, 0.0, %v1494_v36  ;;  %v1498_v42 = vrot.slane %v1489_v51, 4  ;;  %v1562_v58 = vperm.slane %v1558_v41, %v2364_v26  ;;  %v1501_v19 = vsel %vm216_vm1, 0.0, %v1500_v43 }
 0x36c   :  { %v1569_v60 = vsel %vm216_vm1, %v1500_v43, %v1489_v51  ;;  %v1574_v39 = vrot.slane %v1501_v19, 4  ;;  %v1564_v13 = vsel %vm216_vm1, %v1563_v50, %v1495_v6 }
 0x36d   :  { %v1499_v49 = vsel %vm216_vm1, 0.0, %v1498_v42  ;;  %v1573_v7 = vperm.slane %v1569_v60, %v2364_v26  ;;  %v1568_v3 = vperm.slane %v1564_v13, %v2364_v26  ;;  %v1582_v45 = vrot.slane %v1562_v58, 4 }
 0x36e   :  { %v1442_v56 = vpop.f32.mrf.mxu2  ;;  %v1575_v63 = vsel %vm216_vm1, %v1574_v39, %v1499_v49 }
 0x36f   :  { %v1514_v9 = vrot.slane %v1442_v56, 4  ;;  %v1594_v21 = vrot.slane %v1573_v7, 4  ;;  %v1385_v2 = vpop.f32.mrf.mxu3  ;;  %v1579_v54 = vperm.slane %v1575_v63, %v2364_v26  ;;  %v1580_v0 = vrot.slane %v1568_v3, 4 }
 0x370   :  { %v1404_v37 = vpop.f32.mrf.mxu0  ;;  %v1503_v28 = vsel %vm216_vm1, %v1502_v8, %v1385_v2  ;;  %v1504_v44 = vrot.slane %v1385_v2, 4  ;;  %v1583_v15 = vsel %vm216_vm1, %v1568_v3, %v1582_v45 }
 0x371   :  { %v1515_v29 = vsel %vm216_vm1, %v1514_v9, %v1404_v37  ;;  %v1516_v46 = vrot.slane %v1404_v37, 4  ;;  %v1509_v14 = vperm.slane %v1503_v28, %v2364_v26  ;;  %v1595_v17 = vsel %vm216_vm1, %v1579_v54, %v1594_v21 }
 0x372   :  { %v1521_v10 = vperm.slane %v1515_v29, %v2364_v26  ;;  %v1505_v59 = vsel %vm216_vm1, %v2813_v48, %v1504_v44  ;;  %v2854_v18 = vperm.slane %v1595_v17, %v2381_v52  ;;  %v1581_v20 = vsel %vm216_vm1, %v1580_v0, %v1562_v58 }
 0x373   :  { %v1517_v57 = vsel %vm216_vm1, %v1442_v56, %v1516_v46  ;;  %v1513_v22 = vperm.slane %v1505_v59, %v2364_v26  ;;  %v1528_v1 = vrot.slane %v1509_v14, 4  ;;  %v2860_v40 = vperm.slane %v1583_v15, %v2381_v52 }
 0x374   :  { %v1525_v24 = vperm.slane %v1517_v57, %v2364_v26  ;;  %v1526_v62 = vrot.slane %v1521_v10, 4  ;;  %v1608_v53 = vrot.slane %v2854_v18, 4  ;;  %v1587_v48 = vperm.slane %v1581_v20, %v2381_v52 }
 0x375   :  { %v1592_v61 = vrot.slane %v1579_v54, 4  ;;  %v1540_v34 = vrot.slane %v1513_v22, 4  ;;  %v1529_v23 = vsel %vm216_vm1, %v1521_v10, %v1528_v1 }
 0x376   :  { %v1527_v47 = vsel %vm216_vm1, %v1526_v62, %v1509_v14  ;;  %v1538_v31 = vrot.slane %v1525_v24, 4  ;;  %v1444_v27 = vpop.f32.mrf.mxu2  ;;  %v1537_v12 = vperm.slane %v1529_v23, %v2381_v52  ;;  %v1609_v4 = vsel %vm216_vm1, %v1608_v53, %v2860_v40 }
 0x377   :  { %v1533_v16 = vperm.slane %v1527_v47, %v2381_v52  ;;  %v1593_v55 = vsel %vm216_vm1, %v1592_v61, %v1573_v7  ;;  %v1541_v30 = vsel %vm216_vm1, %v1525_v24, %v1540_v34  ;;  %v1387_v5 = vpop.f32.mrf.mxu3  ;;  %1676 = vrot.lane.b32.xlu1 %v1609_v4, %s2214_s6  ;;  %v1606_v32 = vrot.slane %v1587_v48, 4 }
 0x378   :  { %v1539_v25 = vsel %vm216_vm1, %v1538_v31, %v1513_v22  ;;  %v1599_v11 = vperm.slane %v1593_v55, %v2381_v52  ;;  %v1406_v33 = vpop.f32.mrf.mxu0  ;;  %v1549_v51 = vperm.slane %v1541_v30, %v2381_v52  ;;  %v1552_v38 = vrot.slane %v1537_v12, 4  ;;  %v2126_v5 = vld [vmem:[%s2980_s0 + $0x8] sm:$0xff] }
 0x379   :  { %v1545_v35 = vperm.slane %v1539_v25, %v2381_v52  ;;  %v1550_v36 = vrot.slane %v1533_v16, 4  ;;  %v1610_v62 = vrot.slane %v2860_v40, 4  ;;  %v2125_v40 = vld [vmem:[%s2980_s0] sm:$0xff]  ;;  %v2217_v33 = vmov 32.0  }
 0x37a   :  { %v1604_v43 = vrot.slane %v1599_v11, 4  ;;  %v1607_v41 = vsel %vm216_vm1, %v1599_v11, %v1606_v32  ;;  %v1553_v42 = vsel %vm216_vm1, 0.0, %v1552_v38  ;;  %v1556_v58 = vrot.slane %v1549_v51, 4 }
 0x37b   :  { %v1551_v6 = vsel %vm216_vm1, 0.0, %v1550_v36  ;;  %v1554_v50 = vrot.slane %v1545_v35, 4  ;;  %1668 = vrot.lane.b32.xlu0 %v1607_v41, %s2215_s5  ;;  %v1612_v19 = vsel %vm216_vm1, %v1552_v38, %v1533_v16  ;;  %v1617_v60 = vrot.slane %v1553_v42, 4 }
 0x37c   :  { %v1605_v39 = vsel %vm216_vm1, %v1604_v43, %v1587_v48  ;;  %v1557_v49 = vsel %vm216_vm1, 0.0, %v1556_v58  ;;  %v1616_v7 = vperm.slane %v1612_v19, %v2364_v26  ;;  %v1623_v56 = vsel %vm216_vm1, %v1556_v58, %v1545_v35 }
 0x37d   :  { %v1555_v13 = vsel %vm216_vm1, 0.0, %v1554_v50  ;;  %v1628_v3 = vrot.slane %v1557_v49, 4  ;;  %v1618_v45 = vsel %vm216_vm1, %v1617_v60, %v1551_v6  ;;  %v1627_v8 = vperm.slane %v1623_v56, %v2364_v26 }
 0x37e   :  { %v1622_v9 = vperm.slane %v1618_v45, %v2364_v26  ;;  %v1636_v63 = vrot.slane %v1616_v7, 4  ;;  %2111 = vrcp.f32 %v2217_v33 }
 0x37f   :  { %v1629_v21 = vsel %vm216_vm1, %v1628_v3, %v1555_v13  ;;  %v1648_v2 = vrot.slane %v1627_v8, 4 }
 0x380   :  { %v1633_v37 = vperm.slane %v1629_v21, %v2364_v26  ;;  %v1634_v54 = vrot.slane %v1622_v9, 4  ;;  %v1637_v0 = vsel %vm216_vm1, %v1622_v9, %v1636_v63  ;;  %v2030_v9 = vld [vmem:[#allocation5 + $0x8] sm:$0xff]  ;;  %v2029_v21 = vld [vmem:[#allocation5] sm:$0xff] }
 0x381   :  { %v1645_v15 = vperm.slane %v1637_v0, %v2381_v52  ;;  %1793 = vmatpush.bf16.msra.mxu3 %v2030_v9 }
 0x382   :  { %v1649_v28 = vsel %vm216_vm1, %v1633_v37, %v1648_v2  ;;  %v1635_v44 = vsel %vm216_vm1, %v1634_v54, %v1616_v7  ;;  %v1646_v29 = vrot.slane %v1633_v37, 4 }
 0x383   :  { %v1657_v46 = vperm.slane %v1649_v28, %v2381_v52  ;;  %v1641_v14 = vperm.slane %v1635_v44, %v2381_v52  ;;  %v1664_v24 = vrot.slane %v1645_v15, 4 }
 0x384   :  { %v1647_v10 = vsel %vm216_vm1, %v1646_v29, %v1627_v8  ;;  %v2112_v35 = vpop.eup %2111 }
 0x385   :  { %v1662_v17 = vrot.slane %v1657_v46, 4  ;;  %v1653_v59 = vperm.slane %v1647_v10, %v2381_v52  ;;  %v1660_v26 = vrot.slane %v1641_v14, 4  ;;  %v1665_v53 = vsel %vm216_vm1, %v1657_v46, %v1664_v24  ;;  %1794 = vmatpush.bf16.msra.mxu3 %v2029_v21 }
 0x386   :  { %v1611_v52 = vsel %vm216_vm1, %v2854_v18, %v1610_v62  ;;  %v1709_v51 = vmul.f32 32.0, %v2112_v35 }
 0x387   :  { %v1663_v57 = vsel %vm216_vm1, %v1662_v17, %v1645_v15  ;;  %v1658_v20 = vrot.slane %v1653_v59, 4  ;;  %v1661_v22 = vsel %vm216_vm1, %v1653_v59, %v1660_v26  ;;  %v2073_v26 = vld [vmem:[%s2987_s7] ss:$0 sm:$0xff] }
 0x388   :  { %1678 = vrot.lane.b32.xlu0 %v1663_v57, %s2214_s6  ;;  %1670 = vrot.lane.b32.xlu2 %v1661_v22, %s2215_s5  ;;  %v1710_v36 = vsub.f32 1.0, %v1709_v51  ;;  %s1940_s6 = sshll.u32 %s2995_s15, 4  ;;  %s1941_s6 = int_to_ptr.hbm [resolvable:$true] %s1940_s6 }
 0x389   :  { %v1659_v1 = vsel %vm216_vm1, %v1658_v20, %v1641_v14  ;;  %vm1713_vm1 = vweird.f32 %v2112_v35 }
 0x38a   :  { %v1711_v38 = vmul.f32 %v2112_v35, %v1710_v36 }
 0x38c   :  { %v1712_v43 = vadd.f32 %v2112_v35, %v1711_v38 }
 0x38e   :  { %v2925_v41 = vsel %vm1713_vm1, %v2112_v35, %v1712_v43 }
 0x390   :  { %1686 = vrot.lane.b32.xlu0 %v1665_v53, %s2216_s30  ;;  %1684 = vrot.lane.b32.xlu2 %v1611_v52, %s2216_s30  ;;  %s2218_s30 = smov [#allocation7]  }
 0x391   :  { %s1938_s16 = sshll.u32 %s2218_s30, 4  ;;  %s1939_s16 = int_to_ptr.vmem [resolvable:$true] %s1938_s16 }
 0x3e2   :  { %v1671_v48 = vpop.permute.xlu2 %1670 }
 0x3e3   :  { %v1691_v4 = vsel %vm940_vm2, %v1659_v1, %v1671_v48  ;;  %v2074_v1 = vld [vmem:[%s2988_s8] ss:$0 sm:$0xff] }
 0x3e9   :  { %v1677_v61 = vpop.permute.xlu1 %1676 }
 0x3ea   :  { %v1685_v31 = vpop.permute.xlu2 %1684 }
 0x3ed   :  { %v1669_v34 = vpop.permute.xlu0 %1668 }
 0x3ee   :  { %v1690_v47 = vsel %vm940_vm2, %v1605_v39, %v1669_v34  ;;  %v2075_v34 = vld [vmem:[%s2990_s10] ss:$0 sm:$0xff] }
 0x3ef   :  { %v1693_v23 = vsel %vm1692_vm10, %v1690_v47, %v1677_v61 }
 0x3f0   :  { %v2910_v27 = vsel %vm1695_vm11, %v1693_v23, %v1685_v31  ;;  %v2034_v23 = vld [vmem:[%s2991_s11 + $0x18] sm:$0xff] }
 0x3f1   :  { %v1698_v18 = vadd.f32 %v2125_v40, %v2910_v27  ;;  %1864 = vmatpush.bf16.msrb.mxu0 %v2034_v23  ;;  %v2033_v40 = vld [vmem:[%s2991_s11 + $0x10] sm:$0xff] }
 0x3f3   :  { %v1702_v16 = vsel %vm107_vm0, %v1698_v18, 0.0 }
 0x3f4   :  { %1703 = vadd.xlane.f32.xlu1 %v1702_v16 }
 0x3f5   :  { %1865 = vmatpush.bf16.msrb.mxu0 %v2033_v40 }
 0x3fa   :  { %v1679_v12 = vpop.permute.xlu0 %1678 }
 0x3fb   :  { %v1694_v55 = vsel %vm1692_vm10, %v1691_v4, %v1679_v12  ;;  %v2032_v12 = vld [vmem:[%s2991_s11 + $0x8] sm:$0xff] }
 0x3fc   :  { %1866 = vmatpush.bf16.msrb.mxu0 %v2032_v12 }
 0x402   :  { %v1687_v25 = vpop.permute.xlu0 %1686 }
 0x403   :  { %v2918_v30 = vsel %vm1695_vm11, %v1694_v55, %v1687_v25 }
 0x404   :  { %v1699_v11 = vadd.f32 %v2126_v5, %v2918_v30 }
 0x406   :  { %v1705_v32 = vsel %vm107_vm0, %v1699_v11, 0.0 }
 0x407   :  { %1706 = vadd.xlane.f32.xlu2 %v1705_v32 }
 0x467   :  { %v1704_v6 = vpop.xlane.xlu1 %1703 }
 0x468   :  { %v1715_v42 = vmul.f32 %v2925_v41, %v1704_v6 }
 0x46a   :  { %v1717_v50 = vsub.f32 %v1698_v18, %v1715_v42 }
 0x46c   :  { %v1719_v58 = vmul.f32 %v1717_v50, %v1717_v50 }
 0x46e   :  { %v1721_v19 = vsel %vm107_vm0, %v1719_v58, 0.0 }
 0x46f   :  { %1722 = vadd.xlane.f32.xlu0 %v1721_v19 }
 0x47a   :  { %v1707_v60 = vpop.xlane.xlu2 %1706 }
 0x47b   :  { %v1716_v39 = vmul.f32 %v2925_v41, %v1707_v60 }
 0x47d   :  { %v1718_v49 = vsub.f32 %v1699_v11, %v1716_v39  ;;  %v2031_v11 = vld [vmem:[%s2991_s11] sm:$0xff] }
 0x47e   :  { %1867 = vmatpush.bf16.msrb.mxu0 %v2031_v11 }
 0x47f   :  { %v1720_v13 = vmul.f32 %v1718_v49, %v1718_v49 }
 0x481   :  { %v1724_v7 = vsel %vm107_vm0, %v1720_v13, 0.0  ;;  %v2076_v13 = vld [vmem:[%s2992_s12] ss:$0 sm:$0xff] }
 0x482   :  { %1725 = vadd.xlane.f32.xlu1 %v1724_v7 }
 0x4e2   :  { %v1723_v56 = vpop.xlane.xlu0 %1722 }
 0x4e3   :  { %v1727_v3 = vmul.f32 %v1723_v56, %v2925_v41 }
 0x4e5   :  { %v1729_v45 = vadd.f32 1e-05, %v1727_v3 }
 0x4e7   :  { %2113 = vrsqrt.f32 %v1729_v45  ;;  %vm1737_vm12 = vweird.f32 %v1729_v45 }
 0x4ed   :  { %v2114_v8 = vpop.eup %2113 }
 0x4ee   :  { %v1732_v63 = vmul.f32 %v2114_v8, %v1729_v45  ;;  %vm1738_vm2 = vweird.f32 %v2114_v8 }
 0x4ef   :  { %vm1739_vm13 = vmor %vm1737_vm12, %vm1738_vm2 }
 0x4f0   :  { %v1733_v2 = vmul.f32 %v2114_v8, %v1732_v63 }
 0x4f2   :  { %v1734_v28 = vmul.f32 0.5, %v1733_v2 }
 0x4f4   :  { %v1735_v44 = vsub.f32 1.5, %v1734_v28 }
 0x4f5   :  { %v1726_v37 = vpop.xlane.xlu1 %1725 }
 0x4f6   :  { %v1728_v54 = vmul.f32 %v1726_v37, %v2925_v41  ;;  %v1736_v46 = vmul.f32 %v2114_v8, %v1735_v44 }
 0x4f8   :  { %v1730_v0 = vadd.f32 1e-05, %v1728_v54  ;;  %v1740_v15 = vsel %vm1739_vm13, %v2114_v8, %v1736_v46 }
 0x4f9   :  { %v1751_v57 = vmul.f32 %v1740_v15, %v1717_v50 }
 0x4fa   :  { %2115 = vrsqrt.f32 %v1730_v0  ;;  %vm1747_vm15 = vweird.f32 %v1730_v0 }
 0x4fb   :  { %v1756_v24 = vmul.f32 %v2073_v26, %v1751_v57 }
 0x4fd   :  { %v1761_v52 = vadd.f32 %v2074_v1, %v1756_v24 }
 0x500   :  { %v2116_v29 = vpop.eup %2115 }
 0x501   :  { %v1742_v14 = vmul.f32 %v2116_v29, %v1730_v0  ;;  %vm1748_vm14 = vweird.f32 %v2116_v29 }
 0x502   :  { %vm1749_vm3 = vmor %vm1747_vm15, %vm1748_vm14 }
 0x503   :  { %v1743_v10 = vmul.f32 %v2116_v29, %v1742_v14 }
 0x505   :  { %v1744_v17 = vmul.f32 0.5, %v1743_v10 }
 0x507   :  { %v1745_v59 = vsub.f32 1.5, %v1744_v17 }
 0x509   :  { %v1746_v20 = vmul.f32 %v2116_v29, %v1745_v59 }
 0x50b   :  { %v1750_v22 = vsel %vm1749_vm3, %v2116_v29, %v1746_v20 }
 0x50c   :  { %v1752_v62 = vmul.f32 %v1750_v22, %v1718_v49 }
 0x50e   :  { %v1757_v53 = vmul.f32 %v2073_v26, %v1752_v62 }
 0x510   :  { %v1762_v48 = vadd.f32 %v2074_v1, %v1757_v53 }
 0x512   :  { %v1763_v61 = vpack.c.bf16 %v1762_v48, %v1761_v52  ;;  %v2077_v48 = vld [vmem:[%s2993_s13] ss:$0 sm:$0xff] }
 0x514   :  { %2005 = vmatmul.msk.bf16.vlgmr.msra.gmra.mxu3 %vm107_vm0, %v1763_v61 }
 0x597   :  { %v1796_v47 = vpop.f32.mrf.mxu3 }
 0x598   :  { %v1797_v31 = vadd.f32 %v2075_v34, %v1796_v47 }
 0x59a   :  { %v1801_v18 = vmul.f32 %v1797_v31, %v1797_v31 }
 0x59c   :  { %v1803_v16 = vmul.f32 %v1801_v18, %v1797_v31 }
 0x59e   :  { %v1805_v4 = vmul.f32 0.044715, %v1803_v16 }
 0x59f   :  { %v1798_v55 = vpop.f32.mrf.mxu3 }
 0x5a0   :  { %v1807_v25 = vadd.f32 %v1805_v4, %v1797_v31  ;;  %v1799_v5 = vadd.f32 %v2075_v34, %v1798_v55 }
 0x5a2   :  { %v1809_v32 = vmul.f32 0.7978846, %v1807_v25  ;;  %v1802_v33 = vmul.f32 %v1799_v5, %v1799_v5 }
 0x5a4   :  { %v1804_v35 = vmul.f32 %v1802_v33, %v1799_v5  ;;  %2117 = vtanh.f32 %v1809_v32 }
 0x5a6   :  { %v1806_v51 = vmul.f32 0.044715, %v1804_v35 }
 0x5a8   :  { %v1808_v36 = vadd.f32 %v1806_v51, %v1799_v5 }
 0x5aa   :  { %v1810_v38 = vmul.f32 0.7978846, %v1808_v36  ;;  %v2118_v43 = vpop.eup %2117 }
 0x5ab   :  { %v1813_v6 = vadd.f32 1.0, %v2118_v43 }
 0x5ac   :  { %2119 = vtanh.f32 %v1810_v38 }
 0x5ad   :  { %v1815_v50 = vmul.f32 0.5, %v1813_v6 }
 0x5af   :  { %v1817_v60 = vmul.f32 %v1815_v50, %v1797_v31 }
 0x5b2   :  { %v2120_v42 = vpop.eup %2119 }
 0x5b3   :  { %v1814_v58 = vadd.f32 1.0, %v2120_v42 }
 0x5b5   :  { %v1816_v19 = vmul.f32 0.5, %v1814_v58 }
 0x5b7   :  { %v1818_v39 = vmul.f32 %v1816_v19, %v1799_v5 }
 0x5b9   :  { %v1819_v49 = vpack.c.bf16 %v1818_v39, %v1817_v60 }
 0x5bb   :  { %2022 = vmatmul.msk.bf16.vlgmr.msrb.gmra.mxu0 %vm1856_vm4, %v1819_v49 }
 0x638   :  { %v1869_v7 = vpop.f32.mrf.mxu0 }
 0x639   :  { %v1870_v56 = vadd.f32 %v2076_v13, %v1869_v7 }
 0x63b   :  { %v1874_v3 = vadd.f32 %v1870_v56, %v2910_v27 }
 0x63d   :  { %v1878_v45 = vsel %vm107_vm0, %v1874_v3, 0.0 }
 0x63e   :  { %1879 = vadd.xlane.f32.xlu2 %v1878_v45 }
 0x640   :  { %v1871_v8 = vpop.f32.mrf.mxu0 }
 0x641   :  { %v1872_v9 = vadd.f32 %v2076_v13, %v1871_v8 }
 0x643   :  { %v1875_v63 = vadd.f32 %v1872_v9, %v2918_v30 }
 0x645   :  { %v1881_v21 = vsel %vm107_vm0, %v1875_v63, 0.0 }
 0x646   :  { %1882 = vadd.xlane.f32.xlu0 %v1881_v21 }
 0x6b1   :  { %v1880_v2 = vpop.xlane.xlu2 %1879 }
 0x6b2   :  { %v1884_v37 = vmul.f32 %v1880_v2, %v2925_v41 }
 0x6b4   :  { %v1886_v54 = vsub.f32 %v1874_v3, %v1884_v37 }
 0x6b6   :  { %v1888_v0 = vmul.f32 %v1886_v54, %v1886_v54 }
 0x6b8   :  { %v1890_v28 = vsel %vm107_vm0, %v1888_v0, 0.0 }
 0x6b9   :  { %v1883_v44 = vpop.xlane.xlu0 %1882  ;;  %1891 = vadd.xlane.f32.xlu1 %v1890_v28 }
 0x6ba   :  { %v1885_v27 = vmul.f32 %v1883_v44, %v2925_v41 }
 0x6bc   :  { %v1887_v29 = vsub.f32 %v1875_v63, %v1885_v27 }
 0x6be   :  { %v1889_v46 = vmul.f32 %v1887_v29, %v1887_v29 }
 0x6c0   :  { %v1893_v14 = vsel %vm107_vm0, %v1889_v46, 0.0 }
 0x6c1   :  { %1894 = vadd.xlane.f32.xlu2 %v1893_v14 }
 0x72c   :  { %v1892_v30 = vpop.xlane.xlu1 %1891 }
 0x72d   :  { %v1896_v10 = vmul.f32 %v1892_v30, %v2925_v41 }
 0x72f   :  { %v1898_v15 = vadd.f32 1e-05, %v1896_v10 }
 0x731   :  { %2121 = vrsqrt.f32 %v1898_v15  ;;  %vm1906_vm6 = vweird.f32 %v1898_v15 }
 0x734   :  { %v1895_v17 = vpop.xlane.xlu2 %1894 }
 0x735   :  { %v1897_v59 = vmul.f32 %v1895_v17, %v2925_v41  ;;  %v2078_v41 = vld [vmem:[%s2994_s14] ss:$0 sm:$0xff]  ;;  %s2219_s14 = smov 128  }
 0x737   :  { %v2122_v26 = vpop.eup %2121  ;;  %v1899_v57 = vadd.f32 1e-05, %v1897_v59 }
 0x738   :  { %v1901_v20 = vmul.f32 %v2122_v26, %v1898_v15  ;;  %vm1907_vm5 = vweird.f32 %v2122_v26 }
 0x739   :  { %2123 = vrsqrt.f32 %v1899_v57  ;;  %vm1908_vm7 = vmor %vm1906_vm6, %vm1907_vm5  ;;  %vm1916_vm9 = vweird.f32 %v1899_v57 }
 0x73a   :  { %v1902_v22 = vmul.f32 %v2122_v26, %v1901_v20 }
 0x73c   :  { %v1903_v1 = vmul.f32 0.5, %v1902_v22 }
 0x73e   :  { %v1904_v24 = vsub.f32 1.5, %v1903_v1 }
 0x73f   :  { %v2124_v62 = vpop.eup %2123 }
 0x740   :  { %v1905_v53 = vmul.f32 %v2122_v26, %v1904_v24  ;;  %v1911_v52 = vmul.f32 %v2124_v62, %v1899_v57  ;;  %vm1917_vm8 = vweird.f32 %v2124_v62 }
 0x741   :  { %vm1918_vm10 = vmor %vm1916_vm9, %vm1917_vm8 }
 0x742   :  { %v1909_v61 = vsel %vm1908_vm7, %v2122_v26, %v1905_v53  ;;  %v1912_v34 = vmul.f32 %v2124_v62, %v1911_v52 }
 0x743   :  { %v1920_v47 = vmul.f32 %v1909_v61, %v1886_v54 }
 0x744   :  { %v1913_v23 = vmul.f32 0.5, %v1912_v34 }
 0x745   :  { %v1925_v31 = vmul.f32 %v2077_v48, %v1920_v47 }
 0x746   :  { %v1914_v40 = vsub.f32 1.5, %v1913_v23 }
 0x747   :  { %v1930_v18 = vadd.f32 %v2078_v41, %v1925_v31 }
 0x748   :  { %v1915_v16 = vmul.f32 %v2124_v62, %v1914_v40 }
 0x749   :  { %1932 = vst.msk [vmem:[#allocation7] sm:$0xff] %vm107_vm0, %v1930_v18 }
 0x74a   :  { %v1919_v12 = vsel %vm1918_vm10, %v2124_v62, %v1915_v16 }
 0x74b   :  { %v1921_v4 = vmul.f32 %v1919_v12, %v1887_v29 }
 0x74d   :  { %v1926_v55 = vmul.f32 %v2077_v48, %v1921_v4 }
 0x74f   :  { %v1931_v25 = vadd.f32 %v2078_v41, %v1926_v55 }
 0x751   :  { %1933 = vst.msk [vmem:[#allocation7 + $0x8] sm:$0xff] %vm107_vm0, %v1931_v25 }
 0x752   :  { %1946 = dma.vmem_to_hbm [thread:$0]  %s1939_s16, 256, %s1941_s6, [#allocation4], %s2219_s14, %s2219_s14, %s2215_s5  }
 0x753   :  { %2203 = dma.done.wait [#allocation4], 256  }
 0x754   :  { %2204 = vsyncadd [#allocation4], 4294967040 }
 0x755   :  { %1951 = vsyncpa [#allocation3], 1 }
 0x756   :  { %1952 = vsyncpa [#allocation6], 1 }
 0x757   :  { %1953 = vsyncpa [#allocation4], 1 }

// kernel: tpu_custom_call.1
= control target key start
LH: loop header
LB: loop body
LE: loop exit
PB: predicated region body
PF: predicated region fallthrough
CT: control target
= control target key end

     0   :  { %20 = vsyncpa [#allocation3], 0  ;;  %s2980_s0 = inlined_call_operand.vmem [shape: f32[2,8,32], index: 0, kind: input, shape index: {}]   ;;  %s2981_s1 = inlined_call_operand.vmem [shape: bf16[32,32], index: 1, kind: input, shape index: {}]   ;;  %s2982_s2 = inlined_call_operand.vmem [shape: f32[1,32], index: 2, kind: input, shape index: {}]   ;;  %s2983_s3 = inlined_call_operand.vmem [shape: bf16[32,32], index: 3, kind: input, shape index: {}]   ;;  %s2984_s4 = inlined_call_operand.vmem [shape: f32[1,32], index: 4, kind: input, shape index: {}]   ;;  %s2985_s5 = inlined_call_operand.hbm [shape: bf16[32,32], index: 5, kind: input, shape index: {}]   ;;  %s2986_s6 = inlined_call_operand.vmem [shape: f32[1,32], index: 6, kind: input, shape index: {}]   ;;  %s2987_s7 = inlined_call_operand.vmem [shape: f32[1,32], index: 7, kind: input, shape index: {}]   ;;  %s2988_s8 = inlined_call_operand.vmem [shape: f32[1,32], index: 8, kind: input, shape index: {}]   ;;  %s2989_s9 = inlined_call_operand.hbm [shape: bf16[32,64], index: 9, kind: input, shape index: {}]   ;;  %s2990_s10 = inlined_call_operand.vmem [shape: f32[1,64], index: 10, kind: input, shape index: {}]   ;;  %s2991_s11 = inlined_call_operand.vmem [shape: bf16[64,32], index: 11, kind: input, shape index: {}]   ;;  %s2992_s12 = inlined_call_operand.vmem [shape: f32[1,32], index: 12, kind: input, shape index: {}]   ;;  %s2993_s13 = inlined_call_operand.vmem [shape: f32[1,32], index: 13, kind: input, shape index: {}]   ;;  %s2994_s14 = inlined_call_operand.vmem [shape: f32[1,32], index: 14, kind: input, shape index: {}]   ;;  %s2995_s15 = inlined_call_operand.hbm [shape: f32[2,8,32], index: 15, kind: output, shape index: {}]  }
   0x1   :  { %21 = vsyncpa [#allocation6], 0 }
   0x2   :  { %22 = vsyncpa [#allocation4], 0  ;;  %s37_s20 = sshll.u32 %s2985_s5, 4  ;;  %s2205_s21 = smov [#allocation2]   ;;  %s38_s20 = int_to_ptr.hbm [resolvable:$true] %s37_s20 }
   0x3   :  { %s39_s22 = sshll.u32 %s2205_s21, 4  ;;  %s56_s25 = sshll.u32 %s2989_s9, 4  ;;  %s40_s22 = int_to_ptr.vmem [resolvable:$true] %s39_s22  ;;  %s57_s25 = int_to_ptr.hbm [resolvable:$true] %s56_s25 }
   0x4   :  { %s2206_s26 = smov 64   ;;  %s2207_s27 = smov 4  }
   0x5   :  { %45 = dma.hbm_to_vmem [thread:$0]  %s38_s20, 256, %s40_s22, [#allocation3], %s2206_s26, %s2206_s26, %s2207_s27  }
   0x6   :  { %s2208_s28 = smov [#allocation5]  }
   0x7   :  { %s58_s29 = sshll.u32 %s2208_s28, 4  ;;  %s59_s29 = int_to_ptr.vmem [resolvable:$true] %s58_s29 }
   0x8   :  { %64 = dma.hbm_to_vmem [thread:$0]  %s57_s25, 256, %s59_s29, [#allocation6], %s2206_s26, %s2206_s26, %s2207_s27  }
   0x9   :  { %2199 = dma.done.wait [#allocation3], 256  }
   0xa   :  { %2200 = vsyncadd [#allocation3], 4294967040 }
   0xb   :  { %2201 = dma.done.wait [#allocation6], 256  }
   0xc   :  { %2202 = vsyncadd [#allocation6], 4294967040  ;;  %v2024_v0 = vld [vmem:[%s2981_s1 + $0x8] sm:$0xff]  ;;  %v2023_v2 = vld [vmem:[%s2981_s1] sm:$0xff]  ;;  %vm107_vm0 = vcmask 261120   ;;  %s2209_s27 = smov 104  }
   0xd   :  { %v2026_v1 = vld [vmem:[%s2983_s3 + $0x8] sm:$0xff]  ;;  %v2025_v3 = vld [vmem:[%s2983_s3] sm:$0xff]  ;;  %117 = vmatpush.bf16.msra.mxu0 %v2024_v0  ;;  %s2210_s28 = smov 120   ;;  %v2212_v23 = vmov 1983009808   ;;  %vm216_vm1 = vcmask 1047556  }
   0xe   :  { %v84_v4 = vld [vmem:[%s2980_s0] sm:$0xff]  ;;  %151 = vmatpush.bf16.msra.mxu1 %v2026_v1  ;;  %v85_v5 = vld [vmem:[%s2980_s0 + $0x8] sm:$0xff]  ;;  %v221_v24 = vunpack.c.l.s4 %v2212_v23  ;;  %v2213_v33 = vmov 1934713408   ;;  %vm940_vm2 = vcmask 64512   ;;  %vm1296_vm3 = vcmask 1043456  }
   0xf   :  { %v2324_v6 = vpack.c.bf16 %v85_v5, %v84_v4  ;;  %v2070_v7 = vld [vmem:[%s2982_s2] ss:$0 sm:$0xff]  ;;  %s2211_s2 = smov 112   ;;  %v2028_v25 = vld [vmem:[#allocation2 + $0x8] sm:$0xff]  ;;  %v245_v34 = vunpack.c.l.s4 %v2213_v33  ;;  %s2215_s5 = smov 8  }
  0x10   :  { %v2071_v8 = vld [vmem:[%s2984_s4] ss:$0 sm:$0xff]  ;;  %185 = vmatpush.bf16.msra.mxu2 %v2028_v25  ;;  %v2364_v26 = vunpack.c.0.s8 %v221_v24  ;;  %s2216_s30 = smov 24  }
  0x11   :  { %118 = vmatpush.bf16.msra.mxu0 %v2023_v2  ;;  %v2027_v28 = vld [vmem:[#allocation2] sm:$0xff]  ;;  %v2381_v52 = vunpack.c.0.s8 %v245_v34 }
  0x12   :  { %152 = vmatpush.bf16.msra.mxu1 %v2025_v3 }
  0x14   :  { %1962 = vmatmul.msk.bf16.vlgmr.msra.gmra.mxu0 %vm107_vm0, %v2324_v6  ;;  %186 = vmatpush.bf16.msra.mxu2 %v2027_v28 }
  0x15   :  { %1971 = vmatmul.msk.bf16.vlgmr.msra.gmra.mxu1 %vm107_vm0, %v2324_v6 }
  0x17   :  { %1980 = vmatmul.msk.bf16.vlgmr.msra.gmra.mxu2 %vm107_vm0, %v2324_v6 }
  0x91   :  { %v120_v9 = vpop.f32.mrf.mxu0 }
  0x92   :  { %v154_v10 = vpop.f32.mrf.mxu1  ;;  %v121_v11 = vadd.f32 %v2070_v7, %v120_v9 }
  0x93   :  { %v2336_v12 = vadd.f32 %v2071_v8, %v154_v10 }
  0x94   :  { %v193_v13 = vmul.f32 0.35355338, %v121_v11 }
  0x95   :  { %458 = vrot.lane.b32.xlu1 %v2336_v12, %s2209_s27  ;;  %v466_v44 = vrot.slane %v2336_v12, 4 }
  0x96   :  { %209 = vrot.lane.b32.xlu2 %v193_v13, %s2209_s27  ;;  %v2050_v14 = vpack.i.bf16 %v193_v13, %v2336_v12  ;;  %v218_v35 = vrot.slane %v193_v13, 4 }
  0x98   :  { %2051 = vrot.lane.b32.xlu0 %v2050_v14, %s2210_s28 }
  0x99   :  { %v122_v17 = vpop.f32.mrf.mxu0 }
  0x9a   :  { %v156_v15 = vpop.f32.mrf.mxu1  ;;  %v123_v18 = vadd.f32 %v2070_v7, %v122_v17 }
  0x9b   :  { %v2343_v16 = vadd.f32 %v2071_v8, %v156_v15 }
  0x9c   :  { %v2350_v19 = vmul.f32 0.35355338, %v123_v18 }
  0x9d   :  { %203 = vrot.lane.b32.xlu1 %v193_v13, %s2211_s2  ;;  %v522_v45 = vrot.slane %v2343_v16, 4 }
  0x9e   :  { %448 = vrot.lane.b32.xlu2 %v2343_v16, %s2210_s28  ;;  %v274_v53 = vrot.slane %v2350_v19, 4 }
  0xa0   :  { %452 = vrot.lane.b32.xlu0 %v2336_v12, %s2211_s2 }
  0xa5   :  { %460 = vrot.lane.b32.xlu1 %v2343_v16, %s2209_s27 }
  0xa6   :  { %199 = vrot.lane.b32.xlu2 %v2350_v19, %s2210_s28 }
  0xa8   :  { %454 = vrot.lane.b32.xlu0 %v2343_v16, %s2211_s2 }
  0xad   :  { %211 = vrot.lane.b32.xlu1 %v2350_v19, %s2209_s27 }
  0xb0   :  { %205 = vrot.lane.b32.xlu0 %v2350_v19, %s2211_s2 }
  0xf0   :  { %v210_v20 = vpop.permute.xlu2 %209 }
  0xf1   :  { %v228_v29 = vrot.slane %v210_v20, 4 }
  0xf8   :  { %v2362_v21 = vpop.permute.xlu2 %448 }
  0xf9   :  { %v534_v54 = vrot.slane %v2362_v21, 4 }
 0x100   :  { %v2368_v40 = vpop.permute.xlu2 %199 }
 0x101   :  { %v286_v55 = vrot.slane %v2368_v40, 4 }
 0x107   :  { %v459_v22 = vpop.permute.xlu1 %458 }
 0x108   :  { %v476_v30 = vrot.slane %v459_v22, 4 }
 0x10a   :  { %v2052_v27 = vpop.permute.xlu0 %2051 }
 0x10b   :  { %v2054_v31 = vunpack.i.h.bf16 %v2052_v27  ;;  %v2053_v32 = vunpack.i.l.bf16 %v2052_v27 }
 0x10d   :  { %v229_v36 = vsel %vm216_vm1, %v228_v29, %v2054_v31  ;;  %v230_v37 = vrot.slane %v2054_v31, 4  ;;  %v477_v38 = vsel %vm216_vm1, %v476_v30, %v2053_v32  ;;  %v478_v39 = vrot.slane %v2053_v32, 4 }
 0x10e   :  { %v235_v41 = vperm.slane %v229_v36, %v2364_v26  ;;  %v483_v42 = vperm.slane %v477_v38, %v2364_v26 }
 0x10f   :  { %v204_v43 = vpop.permute.xlu1 %203  ;;  %v231_v46 = vsel %vm216_vm1, %v210_v20, %v230_v37  ;;  %v479_v47 = vsel %vm216_vm1, %v459_v22, %v478_v39 }
 0x110   :  { %v215_v48 = vrot.slane %v204_v43, 4  ;;  %v219_v49 = vsel %vm216_vm1, %v204_v43, %v218_v35  ;;  %v239_v50 = vperm.slane %v231_v46, %v2364_v26  ;;  %v487_v51 = vperm.slane %v479_v47, %v2364_v26 }
 0x111   :  { %v227_v57 = vperm.slane %v219_v49, %v2364_v26  ;;  %v240_v58 = vrot.slane %v235_v41, 4  ;;  %v488_v60 = vrot.slane %v483_v42, 4 }
 0x112   :  { %v217_v56 = vsel %vm216_vm1, %v215_v48, %v193_v13  ;;  %v252_v59 = vrot.slane %v239_v50, 4  ;;  %v453_v62 = vpop.permute.xlu0 %452  ;;  %v500_v63 = vrot.slane %v487_v51, 4 }
 0x113   :  { %v223_v61 = vperm.slane %v217_v56, %v2364_v26  ;;  %v254_v0 = vrot.slane %v227_v57, 4  ;;  %v464_v1 = vrot.slane %v453_v62, 4  ;;  %v467_v2 = vsel %vm216_vm1, %v453_v62, %v466_v44 }
 0x114   :  { %v253_v5 = vsel %vm216_vm1, %v252_v59, %v227_v57  ;;  %v475_v6 = vperm.slane %v467_v2, %v2364_v26 }
 0x115   :  { %v241_v3 = vsel %vm216_vm1, %v240_v58, %v223_v61  ;;  %v242_v4 = vrot.slane %v223_v61, 4  ;;  %v255_v8 = vsel %vm216_vm1, %v239_v50, %v254_v0  ;;  %v259_v9 = vperm.slane %v253_v5, %v2381_v52 }
 0x116   :  { %v247_v7 = vperm.slane %v241_v3, %v2381_v52  ;;  %v465_v10 = vsel %vm216_vm1, %v464_v1, %v2336_v12  ;;  %v263_v13 = vperm.slane %v255_v8, %v2381_v52  ;;  %v501_v15 = vsel %vm216_vm1, %v500_v63, %v475_v6 }
 0x117   :  { %v243_v11 = vsel %vm216_vm1, %v235_v41, %v242_v4  ;;  %v471_v14 = vperm.slane %v465_v10, %v2364_v26  ;;  %v461_v17 = vpop.permute.xlu1 %460  ;;  %v268_v22 = vrot.slane %v259_v9, 4  ;;  %v502_v23 = vrot.slane %v475_v6, 4 }
 0x118   :  { %v251_v18 = vperm.slane %v243_v11, %v2381_v52  ;;  %v264_v20 = vrot.slane %v247_v7, 4  ;;  %v270_v24 = vrot.slane %v263_v13, 4  ;;  %v507_v12 = vperm.slane %v501_v15, %v2381_v52 }
 0x119   :  { %v489_v25 = vsel %vm216_vm1, %v488_v60, %v471_v14  ;;  %v490_v27 = vrot.slane %v471_v14, 4  ;;  %v269_v30 = vsel %vm216_vm1, 0.0, %v268_v22  ;;  %v503_v35 = vsel %vm216_vm1, %v487_v51, %v502_v23 }
 0x11a   :  { %v2406_v28 = vsel %vm216_vm1, 0.0, %v264_v20  ;;  %v266_v29 = vrot.slane %v251_v18, 4  ;;  %v2410_v31 = vperm.slane %v489_v25, %v2381_v52  ;;  %v271_v32 = vsel %vm216_vm1, 0.0, %v270_v24  ;;  %v455_v36 = vpop.permute.xlu0 %454 }
 0x11b   :  { %v339_v33 = vsel %vm216_vm1, %v270_v24, %v259_v9  ;;  %v491_v34 = vsel %vm216_vm1, %v483_v42, %v490_v27  ;;  %v344_v41 = vrot.slane %v271_v32, 4  ;;  %v511_v42 = vperm.slane %v503_v35, %v2381_v52 }
 0x11c   :  { %v2417_v37 = vsel %vm216_vm1, 0.0, %v266_v29  ;;  %v328_v38 = vsel %vm216_vm1, %v266_v29, %v247_v7  ;;  %v2421_v39 = vperm.slane %v339_v33, %v2364_v26  ;;  %v499_v46 = vperm.slane %v491_v34, %v2381_v52 }
 0x11d   :  { %v2424_v43 = vperm.slane %v328_v38, %v2364_v26  ;;  %v333_v44 = vrot.slane %v2417_v37, 4  ;;  %v345_v47 = vsel %vm216_vm1, %v344_v41, %v269_v30  ;;  %v512_v49 = vrot.slane %v2410_v31, 4 }
 0x11e   :  { %v364_v48 = vrot.slane %v2421_v39, 4  ;;  %v516_v50 = vrot.slane %v507_v12, 4  ;;  %v2433_v51 = vperm.slane %v345_v47, %v2364_v26  ;;  %v514_v56 = vrot.slane %v499_v46, 4 }
 0x11f   :  { %v518_v57 = vrot.slane %v511_v42, 4  ;;  %v532_v58 = vrot.slane %v461_v17, 4  ;;  %v535_v60 = vsel %vm216_vm1, %v461_v17, %v534_v54  ;;  %v520_v61 = vrot.slane %v455_v36, 4  ;;  %v212_v63 = vpop.permute.xlu1 %211 }
 0x120   :  { %v517_v59 = vsel %vm216_vm1, 0.0, %v516_v50  ;;  %v523_v62 = vsel %vm216_vm1, %v455_v36, %v522_v45  ;;  %v2441_v0 = vsel %vm216_vm1, 0.0, %v514_v56  ;;  %v543_v45 = vperm.slane %v535_v60, %v2364_v26 }
 0x121   :  { %v519_v1 = vsel %vm216_vm1, 0.0, %v518_v57  ;;  %v587_v2 = vsel %vm216_vm1, %v518_v57, %v507_v12  ;;  %v533_v3 = vsel %vm216_vm1, %v532_v58, %v2362_v21  ;;  %v581_v4 = vrot.slane %v2441_v0, 4 }
 0x122   :  { %v2449_v54 = vperm.slane %v587_v2, %v2364_v26  ;;  %v592_v5 = vrot.slane %v519_v1, 4  ;;  %v539_v6 = vperm.slane %v533_v3, %v2364_v26  ;;  %v521_v7 = vsel %vm216_vm1, %v520_v61, %v2343_v16  ;;  %v206_v10 = vpop.permute.xlu0 %205 }
 0x123   :  { %v531_v8 = vperm.slane %v523_v62, %v2364_v26  ;;  %v284_v9 = vrot.slane %v212_v63, 4  ;;  %v527_v13 = vperm.slane %v521_v7, %v2364_v26  ;;  %v287_v14 = vsel %vm216_vm1, %v212_v63, %v286_v55 }
 0x124   :  { %v593_v11 = vsel %vm216_vm1, %v592_v5, %v517_v59  ;;  %v544_v21 = vrot.slane %v539_v6, 4  ;;  %v556_v15 = vrot.slane %v543_v45, 4  ;;  %v295_v16 = vperm.slane %v287_v14, %v2364_v26 }
 0x125   :  { %v558_v17 = vrot.slane %v531_v8, 4  ;;  %v285_v18 = vsel %vm216_vm1, %v284_v9, %v2368_v40  ;;  %v546_v22 = vrot.slane %v527_v13, 4  ;;  %v272_v24 = vrot.slane %v206_v10, 4 }
 0x126   :  { %v545_v20 = vsel %vm216_vm1, %v544_v21, %v527_v13  ;;  %v291_v23 = vperm.slane %v285_v18, %v2364_v26  ;;  %v557_v27 = vsel %vm216_vm1, %v556_v15, %v531_v8  ;;  %v308_v55 = vrot.slane %v295_v16, 4 }
 0x127   :  { %v551_v25 = vperm.slane %v545_v20, %v2381_v52  ;;  %v559_v12 = vsel %vm216_vm1, %v543_v45, %v558_v17  ;;  %v547_v29 = vsel %vm216_vm1, %v539_v6, %v546_v22  ;;  %v563_v30 = vperm.slane %v557_v27, %v2381_v52 }
 0x128   :  { %v567_v40 = vperm.slane %v559_v12, %v2381_v52  ;;  %v296_v32 = vrot.slane %v291_v23, 4  ;;  %v555_v33 = vperm.slane %v547_v29, %v2381_v52  ;;  %v273_v35 = vsel %vm216_vm1, %v272_v24, %v2350_v19 }
 0x129   :  { %v568_v34 = vrot.slane %v551_v25, 4  ;;  %v275_v36 = vsel %vm216_vm1, %v206_v10, %v274_v53  ;;  %v572_v38 = vrot.slane %v563_v30, 4  ;;  %v279_v46 = vperm.slane %v273_v35, %v2364_v26 }
 0x12a   :  { %v574_v41 = vrot.slane %v567_v40, 4  ;;  %v283_v42 = vperm.slane %v275_v36, %v2364_v26  ;;  %v570_v50 = vrot.slane %v555_v33, 4  ;;  %v513_v57 = vsel %vm216_vm1, 0.0, %v512_v49 }
 0x12b   :  { %v2481_v47 = vsel %vm216_vm1, 0.0, %v568_v34  ;;  %v576_v58 = vsel %vm216_vm1, %v514_v56, %v2410_v31  ;;  %v573_v59 = vsel %vm216_vm1, 0.0, %v572_v38  ;;  %v297_v60 = vsel %vm216_vm1, %v296_v32, %v279_v46 }
 0x12c   :  { %v575_v19 = vsel %vm216_vm1, 0.0, %v574_v41  ;;  %v641_v53 = vsel %vm216_vm1, %v574_v41, %v563_v30  ;;  %v2491_v61 = vsel %vm216_vm1, 0.0, %v570_v50  ;;  %v2494_v62 = vsel %vm216_vm1, %v570_v50, %v551_v25 }
 0x12d   :  { %v2497_v63 = vperm.slane %v641_v53, %v2364_v26  ;;  %v646_v49 = vrot.slane %v575_v19, 4  ;;  %v635_v31 = vrot.slane %v2491_v61, 4  ;;  %v298_v56 = vrot.slane %v279_v46, 4 }
 0x12e   :  { %v303_v1 = vperm.slane %v297_v60, %v2381_v52  ;;  %v309_v2 = vsel %vm216_vm1, %v308_v55, %v283_v42  ;;  %v310_v6 = vrot.slane %v283_v42, 4  ;;  %v580_v10 = vperm.slane %v576_v58, %v2364_v26 }
 0x12f   :  { %v647_v3 = vsel %vm216_vm1, %v646_v49, %v573_v59  ;;  %v666_v5 = vrot.slane %v2497_v63, 4  ;;  %v315_v45 = vperm.slane %v309_v2, %v2381_v52  ;;  %v299_v8 = vsel %vm216_vm1, %v291_v23, %v298_v56 }
 0x130   :  { %v2506_v7 = vperm.slane %v647_v3, %v2364_v26  ;;  %v320_v9 = vrot.slane %v303_v1, 4  ;;  %v307_v21 = vperm.slane %v299_v8, %v2381_v52  ;;  %v311_v13 = vsel %vm216_vm1, %v295_v16, %v310_v6 }
 0x131   :  { %v324_v14 = vrot.slane %v315_v45, 4  ;;  %v582_v15 = vsel %vm216_vm1, %v581_v4, %v513_v57  ;;  %v319_v17 = vperm.slane %v311_v13, %v2381_v52  ;;  %v597_v22 = vperm.slane %v593_v11, %v2364_v26 }
 0x132   :  { %v321_v18 = vsel %vm216_vm1, 0.0, %v320_v9  ;;  %v586_v20 = vperm.slane %v582_v15, %v2364_v26  ;;  %v322_v23 = vrot.slane %v307_v21, 4  ;;  %v600_v25 = vrot.slane %v580_v10, 4 }
 0x133   :  { %v325_v24 = vsel %vm216_vm1, 0.0, %v324_v14  ;;  %v612_v27 = vrot.slane %v2449_v54, 4  ;;  %v326_v16 = vrot.slane %v319_v17, 4  ;;  %v610_v0 = vrot.slane %v597_v22, 4 }
 0x134   :  { %v598_v12 = vrot.slane %v586_v20, 4  ;;  %v323_v4 = vsel %vm216_vm1, 0.0, %v322_v23  ;;  %v382_v55 = vsel %vm216_vm1, %v322_v23, %v303_v1  ;;  %v601_v29 = vsel %vm216_vm1, %v586_v20, %v600_v25 }
 0x135   :  { %v613_v30 = vsel %vm216_vm1, %v597_v22, %v612_v27  ;;  %v327_v11 = vsel %vm216_vm1, 0.0, %v326_v16  ;;  %v2527_v40 = vperm.slane %v382_v55, %v2364_v26  ;;  %v387_v32 = vrot.slane %v323_v4, 4 }
 0x136   :  { %v393_v33 = vsel %vm216_vm1, %v326_v16, %v315_v45  ;;  %v398_v35 = vrot.slane %v327_v11, 4  ;;  %v609_v36 = vperm.slane %v601_v29, %v2381_v52  ;;  %v621_v38 = vperm.slane %v613_v30, %v2381_v52 }
 0x137   :  { %v2531_v34 = vperm.slane %v393_v33, %v2364_v26  ;;  %v388_v41 = vsel %vm216_vm1, %v387_v32, %v321_v18  ;;  %v406_v46 = vrot.slane %v2527_v40, 4  ;;  %v599_v42 = vsel %vm216_vm1, %v598_v12, %v580_v10 }
 0x138   :  { %v611_v50 = vsel %vm216_vm1, %v610_v0, %v2449_v54  ;;  %v2541_v57 = vperm.slane %v388_v41, %v2364_v26  ;;  %v399_v58 = vsel %vm216_vm1, %v398_v35, %v325_v24  ;;  %v626_v19 = vrot.slane %v621_v38, 4 }
 0x139   :  { %v418_v59 = vrot.slane %v2531_v34, 4  ;;  %v2546_v53 = vperm.slane %v399_v58, %v2364_v26  ;;  %v605_v60 = vperm.slane %v599_v42, %v2381_v52  ;;  %v617_v49 = vperm.slane %v611_v50, %v2381_v52 }
 0x13a   :  { %v628_v56 = vrot.slane %v609_v36, 4  ;;  %v627_v1 = vsel %vm216_vm1, %v626_v19, %v609_v36  ;;  %v334_v54 = vsel %vm216_vm1, %v333_v44, %v2406_v28  ;;  %v352_v2 = vrot.slane %v2424_v43, 4 }
 0x13b   :  { %v365_v3 = vsel %vm216_vm1, %v2433_v51, %v364_v48  ;;  %v416_v6 = vrot.slane %v2546_v53, 4  ;;  %v686_v45 = vpack.c.bf16 %v627_v1, %v627_v1  ;;  %v622_v8 = vrot.slane %v617_v49, 4 }
 0x13c   :  { %v629_v9 = vsel %vm216_vm1, %v621_v38, %v628_v56  ;;  %v624_v21 = vrot.slane %v605_v60, 4  ;;  %v338_v13 = vperm.slane %v334_v54, %v2364_v26  ;;  %v373_v37 = vperm.slane %v365_v3, %v2381_v52 }
 0x13d   :  { %v687_v10 = vpack.c.bf16 %v629_v9, %v629_v9  ;;  %v983_v28 = vsel %vm940_vm2, %v686_v45, 0  ;;  %v623_v44 = vsel %vm216_vm1, %v622_v8, %v605_v60  ;;  %v634_v14 = vperm.slane %v2494_v62, %v2364_v26 }
 0x13e   :  { %v636_v48 = vsel %vm216_vm1, %v635_v31, %v2481_v47  ;;  %992 = vmatpush.bf16.xpose.msrb.mxu1 %v983_v28  ;;  %v684_v15 = vpack.c.bf16 %v623_v44, %v623_v44  ;;  %v625_v18 = vsel %vm216_vm1, %v617_v49, %v624_v21  ;;  %v353_v20 = vsel %vm216_vm1, %v338_v13, %v352_v2 }
 0x13f   :  { %v1002_v17 = vsel %vm940_vm2, %v687_v10, 0  ;;  %v685_v22 = vpack.c.bf16 %v625_v18, %v625_v18  ;;  %v361_v23 = vperm.slane %v353_v20, %v2381_v52  ;;  %v378_v24 = vrot.slane %v373_v37, 4 }
 0x140   :  { %1011 = vmatpush.bf16.xpose.msrb.mxu2 %v1002_v17  ;;  %v640_v62 = vperm.slane %v636_v48, %v2364_v26  ;;  %v945_v25 = vsel %vm940_vm2, %v684_v15, 0  ;;  %v654_v61 = vrot.slane %v634_v14, 4  ;;  %v667_v47 = vsel %vm216_vm1, %v2506_v7, %v666_v5 }
 0x141   :  { %v350_v31 = vrot.slane %v338_v13, 4  ;;  %954 = vmatpush.bf16.xpose.msra.mxu3 %v945_v25  ;;  %v964_v27 = vsel %vm940_vm2, %v685_v22, 0  ;;  %v379_v16 = vsel %vm216_vm1, %v378_v24, %v361_v23  ;;  %v675_v12 = vperm.slane %v667_v47, %v2381_v52 }
 0x142   :  { %v362_v0 = vrot.slane %v2433_v51, 4  ;;  %973 = vmatpush.bf16.xpose.msrb.mxu0 %v964_v27  ;;  %v438_v4 = vpack.c.bf16 %v379_v16, %v379_v16  ;;  %v655_v55 = vsel %vm216_vm1, %v640_v62, %v654_v61  ;;  %v380_v30 = vrot.slane %v361_v23, 4  ;;  %v188_v16 = vpop.f32.mrf.mxu2 }
 0x143   :  { %v351_v29 = vsel %vm216_vm1, %v350_v31, %v2424_v43  ;;  %v663_v5 = vperm.slane %v655_v55, %v2381_v52  ;;  %v680_v11 = vrot.slane %v675_v12, 4  ;;  %v652_v36 = vrot.slane %v640_v62, 4 }
 0x144   :  { %v357_v32 = vperm.slane %v351_v29, %v2381_v52  ;;  %v363_v33 = vsel %vm216_vm1, %v362_v0, %v2421_v39  ;;  %v381_v51 = vsel %vm216_vm1, %v373_v37, %v380_v30  ;;  %v664_v38 = vrot.slane %v2506_v7, 4 }
 0x145   :  { %v369_v35 = vperm.slane %v363_v33, %v2381_v52  ;;  %1983 = vmatmul.msk.bf16.vlgmr.msrb.gmra.mxu1 %vm940_vm2, %v438_v4  ;;  %v681_v43 = vsel %vm216_vm1, %v680_v11, %v663_v5  ;;  %v439_v42 = vpack.c.bf16 %v381_v51, %v381_v51  ;;  %v682_v50 = vrot.slane %v663_v5, 4 }
 0x146   :  { %v376_v41 = vrot.slane %v357_v32, 4  ;;  %v690_v58 = vpack.c.bf16 %v681_v43, %v681_v43  ;;  %v653_v60 = vsel %vm216_vm1, %v652_v36, %v634_v14  ;;  %v665_v39 = vsel %vm216_vm1, %v664_v38, %v2497_v63 }
 0x147   :  { %v374_v19 = vrot.slane %v369_v35, 4  ;;  %1984 = vmatmul.msk.bf16.vlgmr.msrb.gmra.mxu2 %vm940_vm2, %v439_v42  ;;  %v659_v49 = vperm.slane %v653_v60, %v2381_v52  ;;  %v671_v7 = vperm.slane %v665_v39, %v2381_v52  ;;  %v683_v56 = vsel %vm216_vm1, %v675_v12, %v682_v50 }
 0x148   :  { %v377_v1 = vsel %vm216_vm1, %v369_v35, %v376_v41  ;;  %v1059_v54 = vsel %vm940_vm2, %v690_v58, 0  ;;  %v691_v3 = vpack.c.bf16 %v683_v56, %v683_v56  ;;  %v407_v10 = vsel %vm216_vm1, %v2541_v57, %v406_v46  ;;  %v2072_v56 = vld [vmem:[%s2986_s6] ss:$0 sm:$0xff]  ;;  %s2214_s6 = smov 16  }
 0x149   :  { %v375_v2 = vsel %vm216_vm1, %v374_v19, %v357_v32  ;;  %v437_v45 = vpack.c.bf16 %v377_v1, %v377_v1  ;;  %1068 = vmatpush.bf16.xpose.msra.mxu1 %v1059_v54  ;;  %v676_v9 = vrot.slane %v671_v7, 4  ;;  %v678_v63 = vrot.slane %v659_v49, 4 }
 0x14a   :  { %v436_v8 = vpack.c.bf16 %v375_v2, %v375_v2  ;;  %v1078_v21 = vsel %vm940_vm2, %v691_v3, 0  ;;  %v415_v13 = vperm.slane %v407_v10, %v2381_v52  ;;  %v419_v37 = vsel %vm216_vm1, %v2546_v53, %v418_v59  ;;  %v190_v12 = vpop.f32.mrf.mxu2 }
 0x14b   :  { %1982 = vmatmul.msk.bf16.vlgmr.msrb.gmra.mxu0 %vm940_vm2, %v437_v45  ;;  %v404_v28 = vrot.slane %v2541_v57, 4  ;;  %v677_v44 = vsel %vm216_vm1, %v676_v9, %v659_v49  ;;  %1087 = vmatpush.bf16.xpose.msra.mxu2 %v1078_v21  ;;  %v679_v46 = vsel %vm216_vm1, %v671_v7, %v678_v63  ;;  %v427_v14 = vperm.slane %v419_v37, %v2381_v52 }
 0x14c   :  { %1981 = vmatmul.msk.bf16.vlgmr.msra.gmra.mxu3 %vm940_vm2, %v436_v8  ;;  %v688_v48 = vpack.c.bf16 %v677_v44, %v677_v44  ;;  %v689_v15 = vpack.c.bf16 %v679_v46, %v679_v46  ;;  %v417_v59 = vsel %vm216_vm1, %v416_v6, %v2531_v34  ;;  %v434_v24 = vrot.slane %v415_v13, 4 }
 0x14d   :  { %v405_v17 = vsel %vm216_vm1, %v404_v28, %v2527_v40  ;;  %v432_v57 = vrot.slane %v427_v14, 4  ;;  %v423_v23 = vperm.slane %v417_v59, %v2381_v52  ;;  %v2656_v54 = vadd.f32 %v2072_v56, %v188_v16 }
 0x14e   :  { %v411_v18 = vperm.slane %v405_v17, %v2381_v52  ;;  %v1021_v20 = vsel %vm940_vm2, %v688_v48, 0  ;;  %v1040_v22 = vsel %vm940_vm2, %v689_v15, 0  ;;  %v435_v53 = vsel %vm216_vm1, %v427_v14, %v434_v24 }
 0x14f   :  { %1030 = vmatpush.bf16.xpose.msrb.mxu3 %v1021_v20  ;;  %1049 = vmatpush.bf16.xpose.msra.mxu0 %v1040_v22  ;;  %v433_v62 = vsel %vm216_vm1, %v432_v57, %v415_v13  ;;  %v428_v25 = vrot.slane %v423_v23, 4  ;;  %v443_v34 = vpack.c.bf16 %v435_v53, %v435_v53  ;;  %v2658_v2 = vadd.f32 %v2072_v56, %v190_v12 }
 0x150   :  { %v430_v40 = vrot.slane %v411_v18, 4  ;;  %v442_v61 = vpack.c.bf16 %v433_v62, %v433_v62 }
 0x151   :  { %v429_v47 = vsel %vm216_vm1, %v428_v25, %v411_v18  ;;  %v2060_v3 = vpack.i.bf16 %v2658_v2, %v2656_v54 }
 0x152   :  { %v431_v6 = vsel %vm216_vm1, %v423_v23, %v430_v40  ;;  %v440_v27 = vpack.c.bf16 %v429_v47, %v429_v47 }
 0x153   :  { %v441_v31 = vpack.c.bf16 %v431_v6, %v431_v6 }
 0x155   :  { %1987 = vmatmul.msk.bf16.vlgmr.msra.gmra.mxu1 %vm940_vm2, %v442_v61 }
 0x157   :  { %1988 = vmatmul.msk.bf16.vlgmr.msra.gmra.mxu2 %vm940_vm2, %v443_v34 }
 0x15b   :  { %1986 = vmatmul.msk.bf16.vlgmr.msra.gmra.mxu0 %vm940_vm2, %v441_v31 }
 0x15c   :  { %1985 = vmatmul.msk.bf16.vlgmr.msrb.gmra.mxu3 %vm940_vm2, %v440_v27 }
 0x1c2   :  { %v994_v0 = vpop.f32.mrf.mxu1 }
 0x1c3   :  { %v1099_v4 = vsel %vm940_vm2, %v994_v0, -inf }
 0x1c4   :  { %1100 = vmax.xlane.f32.xlu1 %v1099_v4 }
 0x1c8   :  { %v975_v55 = vpop.f32.mrf.mxu0 }
 0x1c9   :  { %v1096_v29 = vsel %vm940_vm2, %v975_v55, -inf }
 0x1ca   :  { %1097 = vmax.xlane.f32.xlu2 %v1096_v29  ;;  %v996_v30 = vpop.f32.mrf.mxu1  ;;  %v1013_v5 = vpop.f32.mrf.mxu2 }
 0x1cb   :  { %v1102_v11 = vsel %vm940_vm2, %v1013_v5, -inf }
 0x1cc   :  { %1103 = vmax.xlane.f32.xlu0 %v1102_v11 }
 0x1cf   :  { %v956_v32 = vpop.f32.mrf.mxu3 }
 0x1d0   :  { %v977_v33 = vpop.f32.mrf.mxu0  ;;  %v1093_v35 = vsel %vm940_vm2, %v956_v32, -inf }
 0x1d2   :  { %1094 = vmax.xlane.f32.xlu2 %v1093_v35  ;;  %v1015_v51 = vpop.f32.mrf.mxu2  ;;  %v1070_v36 = vpop.f32.mrf.mxu1 }
 0x1d3   :  { %v1111_v38 = vsel %vm940_vm2, %v1070_v36, -inf }
 0x1d4   :  { %1112 = vmax.xlane.f32.xlu1 %v1111_v38 }
 0x1d7   :  { %v958_v43 = vpop.f32.mrf.mxu3 }
 0x1d8   :  { %v2647_v41 = vpop.f32.mrf.mxu0 }
 0x1d9   :  { %v1108_v42 = vsel %vm940_vm2, %v2647_v41, -inf }
 0x1da   :  { %1109 = vmax.xlane.f32.xlu2 %v1108_v42  ;;  %v1072_v50 = vpop.f32.mrf.mxu1  ;;  %v1089_v58 = vpop.f32.mrf.mxu2 }
 0x1db   :  { %v1114_v19 = vsel %vm940_vm2, %v1089_v58, -inf }
 0x1dc   :  { %1115 = vmax.xlane.f32.xlu0 %v1114_v19 }
 0x1df   :  { %v1032_v60 = vpop.f32.mrf.mxu3 }
 0x1e0   :  { %v1053_v39 = vpop.f32.mrf.mxu0  ;;  %v1105_v49 = vsel %vm940_vm2, %v1032_v60, -inf }
 0x1e2   :  { %1106 = vmax.xlane.f32.xlu2 %v1105_v49  ;;  %v1091_v7 = vpop.f32.mrf.mxu2 }
 0x1e7   :  { %v1034_v1 = vpop.f32.mrf.mxu3 }
 0x1ed   :  { %2061 = vrot.lane.b32.xlu1 %v2060_v3, %s2211_s2 }
 0x1f0   :  { %2056 = vrot.lane.b32.xlu0 %v2060_v3, %s2210_s28 }
 0x1fa   :  { %2066 = vrot.lane.b32.xlu2 %v2060_v3, %s2209_s27 }
 0x237   :  { %v1101_v45 = vpop.xlane.xlu1 %1100 }
 0x238   :  { %v1119_v8 = vsub.f32 %v994_v0, %v1101_v45 }
 0x23a   :  { %v1129_v9 = vmul.f32 1.442695, %v1119_v8 }
 0x23c   :  { %2079 = vpow2.f32 %v1129_v9 }
 0x23d   :  { %v1098_v63 = vpop.xlane.xlu2 %1097 }
 0x23e   :  { %v1118_v14 = vsub.f32 %v975_v55, %v1098_v63  ;;  %v714_v55 = vrot.slane %v2656_v54, 4 }
 0x23f   :  { %v1104_v10 = vpop.xlane.xlu0 %1103 }
 0x240   :  { %v1120_v21 = vsub.f32 %v1013_v5, %v1104_v10  ;;  %v1127_v18 = vmul.f32 1.442695, %v1118_v14  ;;  %v770_v5 = vrot.slane %v2658_v2, 4 }
 0x242   :  { %v2665_v13 = vpop.eup %2079  ;;  %v1131_v37 = vmul.f32 1.442695, %v1120_v21 }
 0x243   :  { %v1147_v28 = vsel %vm940_vm2, %v2665_v13, 0.0 }
 0x244   :  { %2081 = vpow2.f32 %v1131_v37  ;;  %1148 = vadd.xlane.f32.xlu2 %v1147_v28 }
 0x245   :  { %v1095_v44 = vpop.xlane.xlu2 %1094 }
 0x246   :  { %v1117_v46 = vsub.f32 %v956_v32, %v1095_v44 }
 0x247   :  { %v1113_v15 = vpop.xlane.xlu1 %1112 }
 0x248   :  { %v1125_v48 = vmul.f32 1.442695, %v1117_v46  ;;  %v1123_v17 = vsub.f32 %v1070_v36, %v1113_v15 }
 0x24a   :  { %2083 = vpow2.f32 %v1125_v48  ;;  %v2669_v59 = vpop.eup %2081  ;;  %v1137_v57 = vmul.f32 1.442695, %v1123_v17 }
 0x24b   :  { %v1150_v20 = vsel %vm940_vm2, %v2669_v59, 0.0 }
 0x24c   :  { %2085 = vpow2.f32 %v1137_v57  ;;  %1151 = vadd.xlane.f32.xlu1 %v1150_v20 }
 0x24d   :  { %v1110_v22 = vpop.xlane.xlu2 %1109  ;;  %2087 = vpow2.f32 %v1127_v18 }
 0x24e   :  { %v1122_v31 = vsub.f32 %v2647_v41, %v1110_v22 }
 0x24f   :  { %v1116_v24 = vpop.xlane.xlu0 %1115 }
 0x250   :  { %v2673_v23 = vpop.eup %2083  ;;  %v1124_v62 = vsub.f32 %v1089_v58, %v1116_v24  ;;  %v1135_v12 = vmul.f32 1.442695, %v1122_v31 }
 0x251   :  { %v1141_v40 = vsel %vm940_vm2, %v2673_v23, 0.0 }
 0x252   :  { %1142 = vadd.xlane.f32.xlu0 %v1141_v40  ;;  %v2677_v25 = vpop.eup %2085  ;;  %v1139_v53 = vmul.f32 1.442695, %v1124_v62 }
 0x253   :  { %v1159_v61 = vsel %vm940_vm2, %v2677_v25, 0.0  ;;  %v2681_v6 = vpop.eup %2087 }
 0x254   :  { %1160 = vadd.xlane.f32.xlu2 %v1159_v61  ;;  %2089 = vpow2.f32 %v1139_v53  ;;  %v1144_v16 = vsel %vm940_vm2, %v2681_v6, 0.0 }
 0x255   :  { %v1107_v34 = vpop.xlane.xlu2 %1106 }
 0x256   :  { %v1121_v47 = vsub.f32 %v1032_v60, %v1107_v34 }
 0x258   :  { %v1133_v27 = vmul.f32 1.442695, %v1121_v47 }
 0x25a   :  { %2091 = vpow2.f32 %v1133_v27  ;;  %1145 = vadd.xlane.f32.xlu0 %v1144_v16  ;;  %v2686_v0 = vpop.eup %2089 }
 0x25b   :  { %2093 = vpow2.f32 %v1135_v12  ;;  %v1162_v32 = vsel %vm940_vm2, %v2686_v0, 0.0 }
 0x25d   :  { %v2067_v4 = vpop.permute.xlu2 %2066 }
 0x25e   :  { %v2069_v30 = vunpack.i.h.bf16 %v2067_v4  ;;  %v2068_v33 = vunpack.i.l.bf16 %v2067_v4 }
 0x25f   :  { %v2062_v11 = vpop.permute.xlu1 %2061 }
 0x260   :  { %v2689_v29 = vpop.eup %2091  ;;  %v2064_v35 = vunpack.i.h.bf16 %v2062_v11  ;;  %v2063_v51 = vunpack.i.l.bf16 %v2062_v11  ;;  %v780_v58 = vrot.slane %v2069_v30, 4  ;;  %v724_v39 = vrot.slane %v2068_v33, 4 }
 0x261   :  { %v1153_v36 = vsel %vm940_vm2, %v2689_v29, 0.0  ;;  %v2703_v1 = vpop.eup %2093 }
 0x262   :  { %1163 = vadd.xlane.f32.xlu0 %v1162_v32  ;;  %1154 = vadd.xlane.f32.xlu1 %v1153_v36  ;;  %v768_v38 = vrot.slane %v2064_v35, 4  ;;  %v771_v43 = vsel %vm216_vm1, %v2064_v35, %v770_v5  ;;  %v712_v41 = vrot.slane %v2063_v51, 4  ;;  %v715_v42 = vsel %vm216_vm1, %v2063_v51, %v714_v55  ;;  %v2057_v50 = vpop.permute.xlu0 %2056 }
 0x263   :  { %v2059_v19 = vunpack.i.h.bf16 %v2057_v50  ;;  %v2058_v60 = vunpack.i.l.bf16 %v2057_v50  ;;  %v723_v56 = vperm.slane %v715_v42, %v2364_v26  ;;  %v779_v45 = vperm.slane %v771_v43, %v2364_v26 }
 0x264   :  { %v769_v49 = vsel %vm216_vm1, %v768_v38, %v2658_v2  ;;  %v713_v7 = vsel %vm216_vm1, %v712_v41, %v2656_v54  ;;  %v1156_v48 = vsel %vm940_vm2, %v2703_v1, 0.0 }
 0x265   :  { %v775_v3 = vperm.slane %v769_v49, %v2364_v26  ;;  %v719_v8 = vperm.slane %v713_v7, %v2364_v26  ;;  %v782_v9 = vrot.slane %v2059_v19, 4  ;;  %v725_v63 = vsel %vm216_vm1, %v724_v39, %v2058_v60 }
 0x266   :  { %v726_v10 = vrot.slane %v2058_v60, 4  ;;  %v781_v21 = vsel %vm216_vm1, %v780_v58, %v2059_v19  ;;  %v731_v54 = vperm.slane %v725_v63, %v2364_v26  ;;  %v750_v44 = vrot.slane %v723_v56, 4 }
 0x267   :  { %v794_v2 = vrot.slane %v775_v3, 4  ;;  %v738_v37 = vrot.slane %v719_v8, 4  ;;  %v787_v28 = vperm.slane %v781_v21, %v2364_v26  ;;  %v783_v14 = vsel %vm216_vm1, %v2069_v30, %v782_v9 }
 0x268   :  { %v727_v46 = vsel %vm216_vm1, %v2068_v33, %v726_v10  ;;  %v736_v17 = vrot.slane %v731_v54, 4  ;;  %v791_v18 = vperm.slane %v783_v14, %v2364_v26  ;;  %v806_v20 = vrot.slane %v779_v45, 4 }
 0x269   :  { %v735_v15 = vperm.slane %v727_v46, %v2364_v26  ;;  %v739_v57 = vsel %vm216_vm1, %v731_v54, %v738_v37  ;;  %v792_v24 = vrot.slane %v787_v28, 4  ;;  %v795_v62 = vsel %vm216_vm1, %v787_v28, %v794_v2 }
 0x26a   :  { %1157 = vadd.xlane.f32.xlu1 %v1156_v48  ;;  %v747_v22 = vperm.slane %v739_v57, %v2381_v52  ;;  %v737_v40 = vsel %vm216_vm1, %v736_v17, %v719_v8  ;;  %v803_v34 = vperm.slane %v795_v62, %v2381_v52  ;;  %v804_v55 = vrot.slane %v791_v18, 4 }
 0x26b   :  { %v748_v53 = vrot.slane %v735_v15, 4  ;;  %v751_v61 = vsel %vm216_vm1, %v735_v15, %v750_v44  ;;  %v743_v47 = vperm.slane %v737_v40, %v2381_v52  ;;  %v793_v16 = vsel %vm216_vm1, %v792_v24, %v775_v3 }
 0x26c   :  { %v759_v31 = vperm.slane %v751_v61, %v2381_v52  ;;  %v762_v27 = vrot.slane %v747_v22, 4  ;;  %v799_v4 = vperm.slane %v793_v16, %v2381_v52  ;;  %v807_v30 = vsel %vm216_vm1, %v791_v18, %v806_v20 }
 0x26d   :  { %v749_v12 = vsel %vm216_vm1, %v748_v53, %v723_v56  ;;  %v760_v11 = vrot.slane %v743_v47, 4  ;;  %v805_v35 = vsel %vm216_vm1, %v804_v55, %v779_v45  ;;  %v815_v51 = vperm.slane %v807_v30, %v2381_v52 }
 0x26e   :  { %v755_v5 = vperm.slane %v749_v12, %v2381_v52  ;;  %v763_v32 = vsel %vm216_vm1, 0.0, %v762_v27  ;;  %v766_v33 = vrot.slane %v759_v31, 4  ;;  %v816_v36 = vrot.slane %v799_v4, 4 }
 0x26f   :  { %v818_v38 = vrot.slane %v803_v34, 4  ;;  %v761_v43 = vsel %vm216_vm1, 0.0, %v760_v11  ;;  %v811_v50 = vperm.slane %v805_v35, %v2381_v52  ;;  %v822_v60 = vrot.slane %v815_v51, 4 }
 0x270   :  { %v764_v41 = vrot.slane %v755_v5, 4  ;;  %v767_v42 = vsel %vm216_vm1, 0.0, %v766_v33  ;;  %v817_v58 = vsel %vm216_vm1, 0.0, %v816_v36  ;;  %v824_v39 = vsel %vm216_vm1, %v762_v27, %v743_v47 }
 0x271   :  { %v819_v19 = vsel %vm216_vm1, 0.0, %v818_v38  ;;  %v820_v49 = vrot.slane %v811_v50, 4  ;;  %v828_v7 = vperm.slane %v824_v39, %v2364_v26  ;;  %v829_v56 = vrot.slane %v763_v32, 4 }
 0x272   :  { %v840_v3 = vrot.slane %v767_v42, 4  ;;  %v823_v45 = vsel %vm216_vm1, 0.0, %v822_v60  ;;  %v878_v8 = vsel %vm216_vm1, %v818_v38, %v799_v4  ;;  %v883_v9 = vrot.slane %v819_v19, 4 }
 0x273   :  { %v765_v63 = vsel %vm216_vm1, 0.0, %v764_v41  ;;  %v882_v10 = vperm.slane %v878_v8, %v2364_v26  ;;  %v894_v21 = vrot.slane %v823_v45, 4  ;;  %v830_v2 = vsel %vm216_vm1, %v829_v56, %v761_v43 }
 0x274   :  { %v835_v37 = vsel %vm216_vm1, %v766_v33, %v755_v5  ;;  %v834_v54 = vperm.slane %v830_v2, %v2364_v26  ;;  %v841_v44 = vsel %vm216_vm1, %v840_v3, %v765_v63  ;;  %v848_v46 = vrot.slane %v828_v7, 4 }
 0x275   :  { %v839_v28 = vperm.slane %v835_v37, %v2364_v26  ;;  %v845_v14 = vperm.slane %v841_v44, %v2364_v26  ;;  %v821_v48 = vsel %vm216_vm1, 0.0, %v820_v49  ;;  %v884_v15 = vsel %vm216_vm1, %v883_v9, %v817_v58 }
 0x276   :  { %v889_v17 = vsel %vm216_vm1, %v822_v60, %v811_v50  ;;  %v849_v57 = vsel %vm216_vm1, %v834_v54, %v848_v46  ;;  %v888_v20 = vperm.slane %v884_v15, %v2364_v26  ;;  %v895_v62 = vsel %vm216_vm1, %v894_v21, %v821_v48 }
 0x277   :  { %v860_v18 = vrot.slane %v839_v28, 4  ;;  %v893_v22 = vperm.slane %v889_v17, %v2364_v26  ;;  %v857_v24 = vperm.slane %v849_v57, %v2381_v52  ;;  %v902_v40 = vrot.slane %v882_v10, 4 }
 0x278   :  { %v846_v53 = vrot.slane %v834_v54, 4  ;;  %v899_v34 = vperm.slane %v895_v62, %v2364_v26  ;;  %v858_v31 = vrot.slane %v845_v14, 4  ;;  %v900_v41 = vrot.slane %v888_v20, 4 }
 0x279   :  { %v861_v61 = vsel %vm216_vm1, %v845_v14, %v860_v18  ;;  %v914_v47 = vrot.slane %v893_v22, 4  ;;  %v876_v16 = vrot.slane %v857_v24, 4  ;;  %v903_v12 = vsel %vm216_vm1, %v888_v20, %v902_v40 }
 0x27a   :  { %v869_v27 = vperm.slane %v861_v61, %v2381_v52  ;;  %v847_v4 = vsel %vm216_vm1, %v846_v53, %v828_v7  ;;  %v911_v55 = vperm.slane %v903_v12, %v2381_v52  ;;  %v859_v11 = vsel %vm216_vm1, %v858_v31, %v839_v28 }
 0x27b   :  { %v915_v30 = vsel %vm216_vm1, %v899_v34, %v914_v47  ;;  %v853_v5 = vperm.slane %v847_v4, %v2381_v52  ;;  %v865_v51 = vperm.slane %v859_v11, %v2381_v52  ;;  %v912_v19 = vrot.slane %v899_v34, 4 }
 0x27c   :  { %v877_v32 = vsel %vm216_vm1, %v869_v27, %v876_v16  ;;  %v874_v33 = vrot.slane %v869_v27, 4  ;;  %v923_v35 = vperm.slane %v915_v30, %v2381_v52  ;;  %v930_v38 = vrot.slane %v911_v55, 4 }
 0x27d   :  { %v935_v36 = vpack.c.bf16 %v877_v32, %v877_v32  ;;  %v872_v43 = vrot.slane %v853_v5, 4  ;;  %v870_v58 = vrot.slane %v865_v51, 4  ;;  %v901_v2 = vsel %vm216_vm1, %v900_v41, %v882_v10 }
 0x27e   :  { %v875_v42 = vsel %vm216_vm1, %v874_v33, %v857_v24  ;;  %v928_v50 = vrot.slane %v923_v35, 4  ;;  %v931_v49 = vsel %vm216_vm1, %v923_v35, %v930_v38  ;;  %v907_v28 = vperm.slane %v901_v2, %v2381_v52 }
 0x27f   :  { %v1355_v60 = vsel %vm1296_vm3, %v935_v36, 0  ;;  %v934_v39 = vpack.c.bf16 %v875_v42, %v875_v42  ;;  %v873_v7 = vsel %vm216_vm1, %v865_v51, %v872_v43  ;;  %v939_v56 = vpack.c.bf16 %v931_v49, %v931_v49 }
 0x280   :  { %1364 = vmatpush.bf16.msrb.mxu2 %v1355_v60  ;;  %v933_v3 = vpack.c.bf16 %v873_v7, %v873_v7  ;;  %v929_v45 = vsel %vm216_vm1, %v928_v50, %v911_v55  ;;  %v871_v8 = vsel %vm216_vm1, %v870_v58, %v853_v5  ;;  %v913_v44 = vsel %vm216_vm1, %v912_v19, %v893_v22 }
 0x281   :  { %v1336_v9 = vsel %vm1296_vm3, %v934_v39, 0  ;;  %v938_v63 = vpack.c.bf16 %v929_v45, %v929_v45  ;;  %v932_v21 = vpack.c.bf16 %v871_v8, %v871_v8  ;;  %v1431_v37 = vsel %vm1296_vm3, %v939_v56, 0 }
 0x282   :  { %1345 = vmatpush.bf16.msrb.mxu1 %v1336_v9  ;;  %v1317_v54 = vsel %vm1296_vm3, %v933_v3, 0  ;;  %v919_v48 = vperm.slane %v913_v44, %v2381_v52  ;;  %v926_v10 = vrot.slane %v907_v28, 4 }
 0x283   :  { %1326 = vmatpush.bf16.msrb.mxu0 %v1317_v54  ;;  %v1412_v46 = vsel %vm1296_vm3, %v938_v63, 0  ;;  %v1298_v14 = vsel %vm1296_vm3, %v932_v21, 0 }
 0x284   :  { %1440 = vmatpush.bf16.msra.mxu2 %v1431_v37  ;;  %1307 = vmatpush.bf16.msra.mxu3 %v1298_v14  ;;  %v924_v15 = vrot.slane %v919_v48, 4  ;;  %v927_v17 = vsel %vm216_vm1, %v919_v48, %v926_v10 }
 0x285   :  { %v937_v57 = vpack.c.bf16 %v927_v17, %v927_v17 }
 0x286   :  { %1421 = vmatpush.bf16.msra.mxu1 %v1412_v46  ;;  %v925_v18 = vsel %vm216_vm1, %v924_v15, %v907_v28 }
 0x287   :  { %v936_v20 = vpack.c.bf16 %v925_v18, %v925_v18  ;;  %v1393_v22 = vsel %vm1296_vm3, %v937_v57, 0 }
 0x288   :  { %1402 = vmatpush.bf16.msra.mxu0 %v1393_v22 }
 0x289   :  { %v1374_v24 = vsel %vm1296_vm3, %v936_v20, 0 }
 0x28a   :  { %1383 = vmatpush.bf16.msrb.mxu3 %v1374_v24 }
 0x2b7   :  { %v1149_v62 = vpop.xlane.xlu2 %1148 }
 0x2b8   :  { %2095 = vrcp.f32 %v1149_v62  ;;  %v1204_v47 = vand.u32 2147483648, %v1149_v62  ;;  %v1202_v27 = vand.u32 2147483647, %v1149_v62  ;;  %vm1198_vm5 = vweird.f32 %v1149_v62 }
 0x2ba   :  { %v1205_v55 = vor.u32 1.1754944e-38, %v1204_v47  ;;  %vm1203_vm7 = vcmp.eq.f32.partialorder %v1202_v27, 8.507059e+37 }
 0x2be   :  { %v2096_v40 = vpop.eup %2095 }
 0x2bf   :  { %v1194_v53 = vmul.f32 %v2096_v40, %v1149_v62  ;;  %v1152_v61 = vpop.xlane.xlu1 %1151  ;;  %vm1199_vm4 = vweird.f32 %v2096_v40 }
 0x2c0   :  { %2097 = vrcp.f32 %v1152_v61  ;;  %vm1200_vm6 = vmor %vm1198_vm5, %vm1199_vm4  ;;  %v1218_v51 = vand.u32 2147483648, %v1152_v61  ;;  %v1216_v43 = vand.u32 2147483647, %v1152_v61  ;;  %vm1212_vm9 = vweird.f32 %v1152_v61 }
 0x2c1   :  { %v1195_v34 = vsub.f32 1.0, %v1194_v53 }
 0x2c2   :  { %v1219_v60 = vor.u32 1.1754944e-38, %v1218_v51  ;;  %vm1217_vm11 = vcmp.eq.f32.partialorder %v1216_v43, 8.507059e+37 }
 0x2c3   :  { %v1196_v31 = vmul.f32 %v2096_v40, %v1195_v34 }
 0x2c5   :  { %v1143_v16 = vpop.xlane.xlu0 %1142  ;;  %v1197_v12 = vadd.f32 %v2096_v40, %v1196_v31 }
 0x2c6   :  { %2099 = vrcp.f32 %v1143_v16  ;;  %v2098_v4 = vpop.eup %2097  ;;  %v1176_v49 = vand.u32 2147483648, %v1143_v16  ;;  %v1174_v45 = vand.u32 2147483647, %v1143_v16  ;;  %vm1170_vm13 = vweird.f32 %v1143_v16 }
 0x2c7   :  { %v1201_v30 = vsel %vm1200_vm6, %v2096_v40, %v1197_v12  ;;  %v1208_v5 = vmul.f32 %v2098_v4, %v1152_v61  ;;  %v1161_v11 = vpop.xlane.xlu2 %1160  ;;  %vm1213_vm8 = vweird.f32 %v2098_v4 }
 0x2c8   :  { %v1206_v32 = vsel %vm1203_vm7, %v1205_v55, %v1201_v30  ;;  %2101 = vrcp.f32 %v1161_v11  ;;  %vm1214_vm10 = vmor %vm1212_vm9, %vm1213_vm8  ;;  %v1177_v21 = vor.u32 1.1754944e-38, %v1176_v49  ;;  %v1260_v2 = vand.u32 2147483648, %v1161_v11 }
 0x2c9   :  { %v1279_v33 = vmul.f32 %v2665_v13, %v1206_v32  ;;  %v1209_v35 = vsub.f32 1.0, %v1208_v5  ;;  %v1258_v28 = vand.u32 2147483647, %v1161_v11  ;;  %vm1175_vm3 = vcmp.eq.f32.partialorder %v1174_v45, 8.507059e+37 }
 0x2ca   :  { %vm1254_vm4 = vweird.f32 %v1161_v11  ;;  %v1261_v57 = vor.u32 1.1754944e-38, %v1260_v2 }
 0x2cb   :  { %v1210_v38 = vmul.f32 %v2098_v4, %v1209_v35  ;;  %v1287_v41 = vpack.c.bf16 %v1279_v33, %v1279_v33  ;;  %vm1259_vm6 = vcmp.eq.f32.partialorder %v1258_v28, 8.507059e+37 }
 0x2cc   :  { %v2100_v36 = vpop.eup %2099 }
 0x2cd   :  { %v1166_v42 = vmul.f32 %v2100_v36, %v1143_v16  ;;  %v1146_v50 = vpop.xlane.xlu0 %1145  ;;  %v1211_v58 = vadd.f32 %v2098_v4, %v1210_v38  ;;  %1991 = vmatmul.msk.bf16.vlgmr.msrb.gmra.mxu1 %vm940_vm2, %v1287_v41  ;;  %vm1171_vm12 = vweird.f32 %v2100_v36 }
 0x2ce   :  { %2103 = vrcp.f32 %v1146_v50  ;;  %v2102_v19 = vpop.eup %2101  ;;  %vm1172_vm14 = vmor %vm1170_vm13, %vm1171_vm12  ;;  %v1190_v22 = vand.u32 2147483648, %v1146_v50  ;;  %v1188_v40 = vand.u32 2147483647, %v1146_v50  ;;  %vm1184_vm8 = vweird.f32 %v1146_v50 }
 0x2cf   :  { %v1167_v39 = vsub.f32 1.0, %v1166_v42  ;;  %v1215_v13 = vsel %vm1214_vm10, %v2098_v4, %v1211_v58  ;;  %v1250_v7 = vmul.f32 %v2102_v19, %v1161_v11  ;;  %vm1255_vm15 = vweird.f32 %v2102_v19 }
 0x2d0   :  { %v1220_v56 = vsel %vm1217_vm11, %v1219_v60, %v1215_v13  ;;  %vm1256_vm5 = vmor %vm1254_vm4, %vm1255_vm15  ;;  %vm1189_vm10 = vcmp.eq.f32.partialorder %v1188_v40, 8.507059e+37 }
 0x2d1   :  { %v1168_v3 = vmul.f32 %v2100_v36, %v1167_v39  ;;  %v1280_v8 = vmul.f32 %v2669_v59, %v1220_v56  ;;  %v1251_v9 = vsub.f32 1.0, %v1250_v7 }
 0x2d3   :  { %v1169_v63 = vadd.f32 %v2100_v36, %v1168_v3  ;;  %v1252_v54 = vmul.f32 %v2102_v19, %v1251_v9  ;;  %v1288_v44 = vpack.c.bf16 %v1280_v8, %v1280_v8 }
 0x2d4   :  { %v2104_v37 = vpop.eup %2103 }
 0x2d5   :  { %v1173_v46 = vsel %vm1172_vm14, %v2100_v36, %v1169_v63  ;;  %v1180_v14 = vmul.f32 %v2104_v37, %v1146_v50  ;;  %v1164_v48 = vpop.xlane.xlu0 %1163  ;;  %v2793_v10 = vpop.xlane.xlu1 %1154  ;;  %v1253_v17 = vadd.f32 %v2102_v19, %v1252_v54  ;;  %1992 = vmatmul.msk.bf16.vlgmr.msrb.gmra.mxu2 %vm940_vm2, %v1288_v44  ;;  %vm1185_vm7 = vweird.f32 %v2104_v37 }
 0x2d6   :  { %v1178_v15 = vsel %vm1175_vm3, %v1177_v21, %v1173_v46  ;;  %2105 = vrcp.f32 %v1164_v48  ;;  %vm1186_vm9 = vmor %vm1184_vm8, %vm1185_vm7  ;;  %v1272_v11 = vand.u32 2147483647, %v1164_v48  ;;  %v1274_v32 = vand.u32 2147483648, %v1164_v48 }
 0x2d7   :  { %v1277_v59 = vmul.f32 %v2673_v23, %v1178_v15  ;;  %v1181_v18 = vsub.f32 1.0, %v1180_v14  ;;  %v1257_v20 = vsel %vm1256_vm5, %v2102_v19, %v1253_v17  ;;  %2107 = vrcp.f32 %v2793_v10 }
 0x2d8   :  { %v1262_v24 = vsel %vm1259_vm6, %v1261_v57, %v1257_v20  ;;  %v1191_v23 = vor.u32 1.1754944e-38, %v1190_v22  ;;  %vm1268_vm12 = vweird.f32 %v1164_v48  ;;  %v1232_v36 = vand.u32 2147483648, %v2793_v10 }
 0x2d9   :  { %v1182_v62 = vmul.f32 %v2104_v37, %v1181_v18  ;;  %v1283_v53 = vmul.f32 %v2677_v25, %v1262_v24  ;;  %v1285_v61 = vpack.c.bf16 %v1277_v59, %v1277_v59  ;;  %v1230_v41 = vand.u32 2147483647, %v2793_v10 }
 0x2da   :  { %v1275_v42 = vor.u32 1.1754944e-38, %v1274_v32  ;;  %vm1226_vm15 = vweird.f32 %v2793_v10  ;;  %vm1273_vm3 = vcmp.eq.f32.partialorder %v1272_v11, 8.507059e+37  ;;  %v1233_v39 = vor.u32 1.1754944e-38, %v1232_v36 }
 0x2db   :  { %v1183_v34 = vadd.f32 %v2104_v37, %v1182_v62  ;;  %1989 = vmatmul.msk.bf16.vlgmr.msra.gmra.mxu3 %vm940_vm2, %v1285_v61  ;;  %v1291_v31 = vpack.c.bf16 %v1283_v53, %v1283_v53  ;;  %vm1231_vm5 = vcmp.eq.f32.partialorder %v1230_v41, 8.507059e+37 }
 0x2dc   :  { %v2106_v47 = vpop.eup %2105 }
 0x2dd   :  { %v1187_v27 = vsel %vm1186_vm9, %v2104_v37, %v1183_v34  ;;  %v1264_v16 = vmul.f32 %v2106_v47, %v1164_v48  ;;  %v1158_v12 = vpop.xlane.xlu1 %1157  ;;  %v2108_v4 = vpop.eup %2107  ;;  %1995 = vmatmul.msk.bf16.vlgmr.msra.gmra.mxu1 %vm940_vm2, %v1291_v31  ;;  %vm1269_vm11 = vweird.f32 %v2106_v47 }
 0x2de   :  { %v1192_v55 = vsel %vm1189_vm10, %v1191_v23, %v1187_v27  ;;  %2109 = vrcp.f32 %v1158_v12  ;;  %v1222_v5 = vmul.f32 %v2108_v4, %v2793_v10  ;;  %vm1227_vm13 = vweird.f32 %v2108_v4  ;;  %vm1270_vm14 = vmor %vm1268_vm12, %vm1269_vm11 }
 0x2df   :  { %v1278_v25 = vmul.f32 %v2681_v6, %v1192_v55  ;;  %v1265_v30 = vsub.f32 1.0, %v1264_v16  ;;  %vm1228_vm4 = vmor %vm1226_vm15, %vm1227_vm13  ;;  %v1244_v3 = vand.u32 2147483647, %v1158_v12  ;;  %v1246_v45 = vand.u32 2147483648, %v1158_v12 }
 0x2e0   :  { %v1223_v35 = vsub.f32 1.0, %v1222_v5  ;;  %vm1240_vm7 = vweird.f32 %v1158_v12  ;;  %vm1692_vm10 = vcmask 130048   ;;  %vm1695_vm11 = vcmask 195584  }
 0x2e1   :  { %v1266_v33 = vmul.f32 %v2106_v47, %v1265_v30  ;;  %v1286_v51 = vpack.c.bf16 %v1278_v25, %v1278_v25  ;;  %v1247_v37 = vor.u32 1.1754944e-38, %v1246_v45  ;;  %vm1245_vm9 = vcmp.eq.f32.partialorder %v1244_v3, 8.507059e+37 }
 0x2e2   :  { %v1224_v43 = vmul.f32 %v2108_v4, %v1223_v35 }
 0x2e3   :  { %v1267_v38 = vadd.f32 %v2106_v47, %v1266_v33  ;;  %1990 = vmatmul.msk.bf16.vlgmr.msrb.gmra.mxu0 %vm940_vm2, %v1286_v51 }
 0x2e4   :  { %v2110_v6 = vpop.eup %2109  ;;  %v1225_v58 = vadd.f32 %v2108_v4, %v1224_v43 }
 0x2e5   :  { %v1271_v50 = vsel %vm1270_vm14, %v2106_v47, %v1267_v38  ;;  %v1236_v19 = vmul.f32 %v2110_v6, %v1158_v12  ;;  %vm1241_vm6 = vweird.f32 %v2110_v6 }
 0x2e6   :  { %v1276_v60 = vsel %vm1273_vm3, %v1275_v42, %v1271_v50  ;;  %v1229_v13 = vsel %vm1228_vm4, %v2108_v4, %v1225_v58  ;;  %vm1242_vm8 = vmor %vm1240_vm7, %vm1241_vm6  ;;  %vm1856_vm4 = vcmask 523264  }
 0x2e7   :  { %v1284_v49 = vmul.f32 %v2686_v0, %v1276_v60  ;;  %v1237_v7 = vsub.f32 1.0, %v1236_v19  ;;  %v1234_v56 = vsel %vm1231_vm5, %v1233_v39, %v1229_v13 }
 0x2e8   :  { %v1281_v8 = vmul.f32 %v2689_v29, %v1234_v56 }
 0x2e9   :  { %v1238_v9 = vmul.f32 %v2110_v6, %v1237_v7  ;;  %v1292_v63 = vpack.c.bf16 %v1284_v49, %v1284_v49 }
 0x2ea   :  { %v1289_v2 = vpack.c.bf16 %v1281_v8, %v1281_v8 }
 0x2eb   :  { %v1239_v21 = vadd.f32 %v2110_v6, %v1238_v9  ;;  %1996 = vmatmul.msk.bf16.vlgmr.msra.gmra.mxu2 %vm940_vm2, %v1292_v63 }
 0x2ec   :  { %1993 = vmatmul.msk.bf16.vlgmr.msrb.gmra.mxu3 %vm940_vm2, %v1289_v2 }
 0x2ed   :  { %v1243_v54 = vsel %vm1242_vm8, %v2110_v6, %v1239_v21 }
 0x2ee   :  { %v1248_v0 = vsel %vm1245_vm9, %v1247_v37, %v1243_v54 }
 0x2ef   :  { %v1282_v28 = vmul.f32 %v2703_v1, %v1248_v0 }
 0x2f1   :  { %v1290_v44 = vpack.c.bf16 %v1282_v28, %v1282_v28 }
 0x2f3   :  { %1994 = vmatmul.msk.bf16.vlgmr.msra.gmra.mxu0 %vm940_vm2, %v1290_v44 }
 0x34a   :  { %v1347_v29 = vpop.f32.mrf.mxu1 }
 0x34b   :  { %v1446_v10 = vrot.slane %v1347_v29, 4 }
 0x352   :  { %v1349_v46 = vpop.f32.mrf.mxu1 }
 0x358   :  { %v1366_v14 = vpop.f32.mrf.mxu2 }
 0x359   :  { %v1458_v15 = vrot.slane %v1366_v14, 4 }
 0x35a   :  { %v2813_v48 = vpop.f32.mrf.mxu1 }
 0x35b   :  { %v1502_v8 = vrot.slane %v2813_v48, 4 }
 0x35e   :  { %v1309_v17 = vpop.f32.mrf.mxu3 }
 0x35f   :  { %v1447_v59 = vsel %vm216_vm1, %v1446_v10, %v1309_v17  ;;  %v1448_v57 = vrot.slane %v1309_v17, 4 }
 0x360   :  { %v1328_v18 = vpop.f32.mrf.mxu0  ;;  %v1453_v20 = vperm.slane %v1447_v59, %v2364_v26  ;;  %v1368_v24 = vpop.f32.mrf.mxu2 }
 0x361   :  { %v1459_v22 = vsel %vm216_vm1, %v1458_v15, %v1328_v18  ;;  %v1460_v1 = vrot.slane %v1328_v18, 4  ;;  %v1449_v62 = vsel %vm216_vm1, %v1347_v29, %v1448_v57 }
 0x362   :  { %v1465_v40 = vperm.slane %v1459_v22, %v2364_v26  ;;  %v1457_v53 = vperm.slane %v1449_v62, %v2364_v26  ;;  %v1472_v61 = vrot.slane %v1453_v20, 4  ;;  %v1425_v47 = vpop.f32.mrf.mxu1 }
 0x363   :  { %v1461_v34 = vsel %vm216_vm1, %v1366_v14, %v1460_v1 }
 0x364   :  { %v1469_v23 = vperm.slane %v1461_v34, %v2364_v26  ;;  %v1470_v31 = vrot.slane %v1465_v40, 4  ;;  %v1484_v27 = vrot.slane %v1457_v53, 4  ;;  %v1473_v16 = vsel %vm216_vm1, %v1465_v40, %v1472_v61 }
 0x365   :  { %v1481_v4 = vperm.slane %v1473_v16, %v2381_v52 }
 0x366   :  { %v1471_v12 = vsel %vm216_vm1, %v1470_v31, %v1453_v20  ;;  %v1482_v55 = vrot.slane %v1469_v23, 4  ;;  %v1485_v30 = vsel %vm216_vm1, %v1469_v23, %v1484_v27  ;;  %v1311_v5 = vpop.f32.mrf.mxu3 }
 0x367   :  { %v1477_v25 = vperm.slane %v1471_v12, %v2381_v52  ;;  %v1493_v32 = vperm.slane %v1485_v30, %v2381_v52  ;;  %v1496_v33 = vrot.slane %v1481_v4, 4 }
 0x368   :  { %v1483_v11 = vsel %vm216_vm1, %v1482_v55, %v1457_v53  ;;  %v1330_v35 = vpop.f32.mrf.mxu0 }
 0x369   :  { %v1489_v51 = vperm.slane %v1483_v11, %v2381_v52  ;;  %v1494_v36 = vrot.slane %v1477_v25, 4  ;;  %v1497_v38 = vsel %vm216_vm1, 0.0, %v1496_v33  ;;  %v1500_v43 = vrot.slane %v1493_v32, 4 }
 0x36a   :  { %v1558_v41 = vsel %vm216_vm1, %v1496_v33, %v1477_v25  ;;  %v1563_v50 = vrot.slane %v1497_v38, 4 }
 0x36b   :  { %v1495_v6 = vsel %vm216_vm1, 0.0, %v1494_v36  ;;  %v1498_v42 = vrot.slane %v1489_v51, 4  ;;  %v1562_v58 = vperm.slane %v1558_v41, %v2364_v26  ;;  %v1501_v19 = vsel %vm216_vm1, 0.0, %v1500_v43 }
 0x36c   :  { %v1569_v60 = vsel %vm216_vm1, %v1500_v43, %v1489_v51  ;;  %v1574_v39 = vrot.slane %v1501_v19, 4  ;;  %v1564_v13 = vsel %vm216_vm1, %v1563_v50, %v1495_v6 }
 0x36d   :  { %v1499_v49 = vsel %vm216_vm1, 0.0, %v1498_v42  ;;  %v1573_v7 = vperm.slane %v1569_v60, %v2364_v26  ;;  %v1568_v3 = vperm.slane %v1564_v13, %v2364_v26  ;;  %v1582_v45 = vrot.slane %v1562_v58, 4 }
 0x36e   :  { %v1442_v56 = vpop.f32.mrf.mxu2  ;;  %v1575_v63 = vsel %vm216_vm1, %v1574_v39, %v1499_v49 }
 0x36f   :  { %v1514_v9 = vrot.slane %v1442_v56, 4  ;;  %v1594_v21 = vrot.slane %v1573_v7, 4  ;;  %v1385_v2 = vpop.f32.mrf.mxu3  ;;  %v1579_v54 = vperm.slane %v1575_v63, %v2364_v26  ;;  %v1580_v0 = vrot.slane %v1568_v3, 4 }
 0x370   :  { %v1404_v37 = vpop.f32.mrf.mxu0  ;;  %v1503_v28 = vsel %vm216_vm1, %v1502_v8, %v1385_v2  ;;  %v1504_v44 = vrot.slane %v1385_v2, 4  ;;  %v1583_v15 = vsel %vm216_vm1, %v1568_v3, %v1582_v45 }
 0x371   :  { %v1515_v29 = vsel %vm216_vm1, %v1514_v9, %v1404_v37  ;;  %v1516_v46 = vrot.slane %v1404_v37, 4  ;;  %v1509_v14 = vperm.slane %v1503_v28, %v2364_v26  ;;  %v1595_v17 = vsel %vm216_vm1, %v1579_v54, %v1594_v21 }
 0x372   :  { %v1521_v10 = vperm.slane %v1515_v29, %v2364_v26  ;;  %v1505_v59 = vsel %vm216_vm1, %v2813_v48, %v1504_v44  ;;  %v2854_v18 = vperm.slane %v1595_v17, %v2381_v52  ;;  %v1581_v20 = vsel %vm216_vm1, %v1580_v0, %v1562_v58 }
 0x373   :  { %v1517_v57 = vsel %vm216_vm1, %v1442_v56, %v1516_v46  ;;  %v1513_v22 = vperm.slane %v1505_v59, %v2364_v26  ;;  %v1528_v1 = vrot.slane %v1509_v14, 4  ;;  %v2860_v40 = vperm.slane %v1583_v15, %v2381_v52 }
 0x374   :  { %v1525_v24 = vperm.slane %v1517_v57, %v2364_v26  ;;  %v1526_v62 = vrot.slane %v1521_v10, 4  ;;  %v1608_v53 = vrot.slane %v2854_v18, 4  ;;  %v1587_v48 = vperm.slane %v1581_v20, %v2381_v52 }
 0x375   :  { %v1592_v61 = vrot.slane %v1579_v54, 4  ;;  %v1540_v34 = vrot.slane %v1513_v22, 4  ;;  %v1529_v23 = vsel %vm216_vm1, %v1521_v10, %v1528_v1 }
 0x376   :  { %v1527_v47 = vsel %vm216_vm1, %v1526_v62, %v1509_v14  ;;  %v1538_v31 = vrot.slane %v1525_v24, 4  ;;  %v1444_v27 = vpop.f32.mrf.mxu2  ;;  %v1537_v12 = vperm.slane %v1529_v23, %v2381_v52  ;;  %v1609_v4 = vsel %vm216_vm1, %v1608_v53, %v2860_v40 }
 0x377   :  { %v1533_v16 = vperm.slane %v1527_v47, %v2381_v52  ;;  %v1593_v55 = vsel %vm216_vm1, %v1592_v61, %v1573_v7  ;;  %v1541_v30 = vsel %vm216_vm1, %v1525_v24, %v1540_v34  ;;  %v1387_v5 = vpop.f32.mrf.mxu3  ;;  %1676 = vrot.lane.b32.xlu1 %v1609_v4, %s2214_s6  ;;  %v1606_v32 = vrot.slane %v1587_v48, 4 }
 0x378   :  { %v1539_v25 = vsel %vm216_vm1, %v1538_v31, %v1513_v22  ;;  %v1599_v11 = vperm.slane %v1593_v55, %v2381_v52  ;;  %v1406_v33 = vpop.f32.mrf.mxu0  ;;  %v1549_v51 = vperm.slane %v1541_v30, %v2381_v52  ;;  %v1552_v38 = vrot.slane %v1537_v12, 4  ;;  %v2126_v5 = vld [vmem:[%s2980_s0 + $0x8] sm:$0xff] }
 0x379   :  { %v1545_v35 = vperm.slane %v1539_v25, %v2381_v52  ;;  %v1550_v36 = vrot.slane %v1533_v16, 4  ;;  %v1610_v62 = vrot.slane %v2860_v40, 4  ;;  %v2125_v40 = vld [vmem:[%s2980_s0] sm:$0xff]  ;;  %v2217_v33 = vmov 32.0  }
 0x37a   :  { %v1604_v43 = vrot.slane %v1599_v11, 4  ;;  %v1607_v41 = vsel %vm216_vm1, %v1599_v11, %v1606_v32  ;;  %v1553_v42 = vsel %vm216_vm1, 0.0, %v1552_v38  ;;  %v1556_v58 = vrot.slane %v1549_v51, 4 }
 0x37b   :  { %v1551_v6 = vsel %vm216_vm1, 0.0, %v1550_v36  ;;  %v1554_v50 = vrot.slane %v1545_v35, 4  ;;  %1668 = vrot.lane.b32.xlu0 %v1607_v41, %s2215_s5  ;;  %v1612_v19 = vsel %vm216_vm1, %v1552_v38, %v1533_v16  ;;  %v1617_v60 = vrot.slane %v1553_v42, 4 }
 0x37c   :  { %v1605_v39 = vsel %vm216_vm1, %v1604_v43, %v1587_v48  ;;  %v1557_v49 = vsel %vm216_vm1, 0.0, %v1556_v58  ;;  %v1616_v7 = vperm.slane %v1612_v19, %v2364_v26  ;;  %v1623_v56 = vsel %vm216_vm1, %v1556_v58, %v1545_v35 }
 0x37d   :  { %v1555_v13 = vsel %vm216_vm1, 0.0, %v1554_v50  ;;  %v1628_v3 = vrot.slane %v1557_v49, 4  ;;  %v1618_v45 = vsel %vm216_vm1, %v1617_v60, %v1551_v6  ;;  %v1627_v8 = vperm.slane %v1623_v56, %v2364_v26 }
 0x37e   :  { %v1622_v9 = vperm.slane %v1618_v45, %v2364_v26  ;;  %v1636_v63 = vrot.slane %v1616_v7, 4  ;;  %2111 = vrcp.f32 %v2217_v33 }
 0x37f   :  { %v1629_v21 = vsel %vm216_vm1, %v1628_v3, %v1555_v13  ;;  %v1648_v2 = vrot.slane %v1627_v8, 4 }
 0x380   :  { %v1633_v37 = vperm.slane %v1629_v21, %v2364_v26  ;;  %v1634_v54 = vrot.slane %v1622_v9, 4  ;;  %v1637_v0 = vsel %vm216_vm1, %v1622_v9, %v1636_v63  ;;  %v2030_v9 = vld [vmem:[#allocation5 + $0x8] sm:$0xff]  ;;  %v2029_v21 = vld [vmem:[#allocation5] sm:$0xff] }
 0x381   :  { %v1645_v15 = vperm.slane %v1637_v0, %v2381_v52  ;;  %1793 = vmatpush.bf16.msra.mxu3 %v2030_v9 }
 0x382   :  { %v1649_v28 = vsel %vm216_vm1, %v1633_v37, %v1648_v2  ;;  %v1635_v44 = vsel %vm216_vm1, %v1634_v54, %v1616_v7  ;;  %v1646_v29 = vrot.slane %v1633_v37, 4 }
 0x383   :  { %v1657_v46 = vperm.slane %v1649_v28, %v2381_v52  ;;  %v1641_v14 = vperm.slane %v1635_v44, %v2381_v52  ;;  %v1664_v24 = vrot.slane %v1645_v15, 4 }
 0x384   :  { %v1647_v10 = vsel %vm216_vm1, %v1646_v29, %v1627_v8  ;;  %v2112_v35 = vpop.eup %2111 }
 0x385   :  { %v1662_v17 = vrot.slane %v1657_v46, 4  ;;  %v1653_v59 = vperm.slane %v1647_v10, %v2381_v52  ;;  %v1660_v26 = vrot.slane %v1641_v14, 4  ;;  %v1665_v53 = vsel %vm216_vm1, %v1657_v46, %v1664_v24  ;;  %1794 = vmatpush.bf16.msra.mxu3 %v2029_v21 }
 0x386   :  { %v1611_v52 = vsel %vm216_vm1, %v2854_v18, %v1610_v62  ;;  %v1709_v51 = vmul.f32 32.0, %v2112_v35 }
 0x387   :  { %v1663_v57 = vsel %vm216_vm1, %v1662_v17, %v1645_v15  ;;  %v1658_v20 = vrot.slane %v1653_v59, 4  ;;  %v1661_v22 = vsel %vm216_vm1, %v1653_v59, %v1660_v26  ;;  %v2073_v26 = vld [vmem:[%s2987_s7] ss:$0 sm:$0xff] }
 0x388   :  { %1678 = vrot.lane.b32.xlu0 %v1663_v57, %s2214_s6  ;;  %1670 = vrot.lane.b32.xlu2 %v1661_v22, %s2215_s5  ;;  %v1710_v36 = vsub.f32 1.0, %v1709_v51  ;;  %s1940_s6 = sshll.u32 %s2995_s15, 4  ;;  %s1941_s6 = int_to_ptr.hbm [resolvable:$true] %s1940_s6 }
 0x389   :  { %v1659_v1 = vsel %vm216_vm1, %v1658_v20, %v1641_v14  ;;  %vm1713_vm1 = vweird.f32 %v2112_v35 }
 0x38a   :  { %v1711_v38 = vmul.f32 %v2112_v35, %v1710_v36 }
 0x38c   :  { %v1712_v43 = vadd.f32 %v2112_v35, %v1711_v38 }
 0x38e   :  { %v2925_v41 = vsel %vm1713_vm1, %v2112_v35, %v1712_v43 }
 0x390   :  { %1686 = vrot.lane.b32.xlu0 %v1665_v53, %s2216_s30  ;;  %1684 = vrot.lane.b32.xlu2 %v1611_v52, %s2216_s30  ;;  %s2218_s30 = smov [#allocation7]  }
 0x391   :  { %s1938_s16 = sshll.u32 %s2218_s30, 4  ;;  %s1939_s16 = int_to_ptr.vmem [resolvable:$true] %s1938_s16 }
 0x3e2   :  { %v1671_v48 = vpop.permute.xlu2 %1670 }
 0x3e3   :  { %v1691_v4 = vsel %vm940_vm2, %v1659_v1, %v1671_v48  ;;  %v2074_v1 = vld [vmem:[%s2988_s8] ss:$0 sm:$0xff] }
 0x3e9   :  { %v1677_v61 = vpop.permute.xlu1 %1676 }
 0x3ea   :  { %v1685_v31 = vpop.permute.xlu2 %1684 }
 0x3ed   :  { %v1669_v34 = vpop.permute.xlu0 %1668 }
 0x3ee   :  { %v1690_v47 = vsel %vm940_vm2, %v1605_v39, %v1669_v34  ;;  %v2075_v34 = vld [vmem:[%s2990_s10] ss:$0 sm:$0xff] }
 0x3ef   :  { %v1693_v23 = vsel %vm1692_vm10, %v1690_v47, %v1677_v61 }
 0x3f0   :  { %v2910_v27 = vsel %vm1695_vm11, %v1693_v23, %v1685_v31  ;;  %v2034_v23 = vld [vmem:[%s2991_s11 + $0x18] sm:$0xff] }
 0x3f1   :  { %v1698_v18 = vadd.f32 %v2125_v40, %v2910_v27  ;;  %1864 = vmatpush.bf16.msrb.mxu0 %v2034_v23  ;;  %v2033_v40 = vld [vmem:[%s2991_s11 + $0x10] sm:$0xff] }
 0x3f3   :  { %v1702_v16 = vsel %vm107_vm0, %v1698_v18, 0.0 }
 0x3f4   :  { %1703 = vadd.xlane.f32.xlu1 %v1702_v16 }
 0x3f5   :  { %1865 = vmatpush.bf16.msrb.mxu0 %v2033_v40 }
 0x3fa   :  { %v1679_v12 = vpop.permute.xlu0 %1678 }
 0x3fb   :  { %v1694_v55 = vsel %vm1692_vm10, %v1691_v4, %v1679_v12  ;;  %v2032_v12 = vld [vmem:[%s2991_s11 + $0x8] sm:$0xff] }
 0x3fc   :  { %1866 = vmatpush.bf16.msrb.mxu0 %v2032_v12 }
 0x402   :  { %v1687_v25 = vpop.permute.xlu0 %1686 }
 0x403   :  { %v2918_v30 = vsel %vm1695_vm11, %v1694_v55, %v1687_v25 }
 0x404   :  { %v1699_v11 = vadd.f32 %v2126_v5, %v2918_v30 }
 0x406   :  { %v1705_v32 = vsel %vm107_vm0, %v1699_v11, 0.0 }
 0x407   :  { %1706 = vadd.xlane.f32.xlu2 %v1705_v32 }
 0x467   :  { %v1704_v6 = vpop.xlane.xlu1 %1703 }
 0x468   :  { %v1715_v42 = vmul.f32 %v2925_v41, %v1704_v6 }
 0x46a   :  { %v1717_v50 = vsub.f32 %v1698_v18, %v1715_v42 }
 0x46c   :  { %v1719_v58 = vmul.f32 %v1717_v50, %v1717_v50 }
 0x46e   :  { %v1721_v19 = vsel %vm107_vm0, %v1719_v58, 0.0 }
 0x46f   :  { %1722 = vadd.xlane.f32.xlu0 %v1721_v19 }
 0x47a   :  { %v1707_v60 = vpop.xlane.xlu2 %1706 }
 0x47b   :  { %v1716_v39 = vmul.f32 %v2925_v41, %v1707_v60 }
 0x47d   :  { %v1718_v49 = vsub.f32 %v1699_v11, %v1716_v39  ;;  %v2031_v11 = vld [vmem:[%s2991_s11] sm:$0xff] }
 0x47e   :  { %1867 = vmatpush.bf16.msrb.mxu0 %v2031_v11 }
 0x47f   :  { %v1720_v13 = vmul.f32 %v1718_v49, %v1718_v49 }
 0x481   :  { %v1724_v7 = vsel %vm107_vm0, %v1720_v13, 0.0  ;;  %v2076_v13 = vld [vmem:[%s2992_s12] ss:$0 sm:$0xff] }
 0x482   :  { %1725 = vadd.xlane.f32.xlu1 %v1724_v7 }
 0x4e2   :  { %v1723_v56 = vpop.xlane.xlu0 %1722 }
 0x4e3   :  { %v1727_v3 = vmul.f32 %v1723_v56, %v2925_v41 }
 0x4e5   :  { %v1729_v45 = vadd.f32 1e-05, %v1727_v3 }
 0x4e7   :  { %2113 = vrsqrt.f32 %v1729_v45  ;;  %vm1737_vm12 = vweird.f32 %v1729_v45 }
 0x4ed   :  { %v2114_v8 = vpop.eup %2113 }
 0x4ee   :  { %v1732_v63 = vmul.f32 %v2114_v8, %v1729_v45  ;;  %vm1738_vm2 = vweird.f32 %v2114_v8 }
 0x4ef   :  { %vm1739_vm13 = vmor %vm1737_vm12, %vm1738_vm2 }
 0x4f0   :  { %v1733_v2 = vmul.f32 %v2114_v8, %v1732_v63 }
 0x4f2   :  { %v1734_v28 = vmul.f32 0.5, %v1733_v2 }
 0x4f4   :  { %v1735_v44 = vsub.f32 1.5, %v1734_v28 }
 0x4f5   :  { %v1726_v37 = vpop.xlane.xlu1 %1725 }
 0x4f6   :  { %v1728_v54 = vmul.f32 %v1726_v37, %v2925_v41  ;;  %v1736_v46 = vmul.f32 %v2114_v8, %v1735_v44 }
 0x4f8   :  { %v1730_v0 = vadd.f32 1e-05, %v1728_v54  ;;  %v1740_v15 = vsel %vm1739_vm13, %v2114_v8, %v1736_v46 }
 0x4f9   :  { %v1751_v57 = vmul.f32 %v1740_v15, %v1717_v50 }
 0x4fa   :  { %2115 = vrsqrt.f32 %v1730_v0  ;;  %vm1747_vm15 = vweird.f32 %v1730_v0 }
 0x4fb   :  { %v1756_v24 = vmul.f32 %v2073_v26, %v1751_v57 }
 0x4fd   :  { %v1761_v52 = vadd.f32 %v2074_v1, %v1756_v24 }
 0x500   :  { %v2116_v29 = vpop.eup %2115 }
 0x501   :  { %v1742_v14 = vmul.f32 %v2116_v29, %v1730_v0  ;;  %vm1748_vm14 = vweird.f32 %v2116_v29 }
 0x502   :  { %vm1749_vm3 = vmor %vm1747_vm15, %vm1748_vm14 }
 0x503   :  { %v1743_v10 = vmul.f32 %v2116_v29, %v1742_v14 }
 0x505   :  { %v1744_v17 = vmul.f32 0.5, %v1743_v10 }
 0x507   :  { %v1745_v59 = vsub.f32 1.5, %v1744_v17 }
 0x509   :  { %v1746_v20 = vmul.f32 %v2116_v29, %v1745_v59 }
 0x50b   :  { %v1750_v22 = vsel %vm1749_vm3, %v2116_v29, %v1746_v20 }
 0x50c   :  { %v1752_v62 = vmul.f32 %v1750_v22, %v1718_v49 }
 0x50e   :  { %v1757_v53 = vmul.f32 %v2073_v26, %v1752_v62 }
 0x510   :  { %v1762_v48 = vadd.f32 %v2074_v1, %v1757_v53 }
 0x512   :  { %v1763_v61 = vpack.c.bf16 %v1762_v48, %v1761_v52  ;;  %v2077_v48 = vld [vmem:[%s2993_s13] ss:$0 sm:$0xff] }
 0x514   :  { %2005 = vmatmul.msk.bf16.vlgmr.msra.gmra.mxu3 %vm107_vm0, %v1763_v61 }
 0x597   :  { %v1796_v47 = vpop.f32.mrf.mxu3 }
 0x598   :  { %v1797_v31 = vadd.f32 %v2075_v34, %v1796_v47 }
 0x59a   :  { %v1801_v18 = vmul.f32 %v1797_v31, %v1797_v31 }
 0x59c   :  { %v1803_v16 = vmul.f32 %v1801_v18, %v1797_v31 }
 0x59e   :  { %v1805_v4 = vmul.f32 0.044715, %v1803_v16 }
 0x59f   :  { %v1798_v55 = vpop.f32.mrf.mxu3 }
 0x5a0   :  { %v1807_v25 = vadd.f32 %v1805_v4, %v1797_v31  ;;  %v1799_v5 = vadd.f32 %v2075_v34, %v1798_v55 }
 0x5a2   :  { %v1809_v32 = vmul.f32 0.7978846, %v1807_v25  ;;  %v1802_v33 = vmul.f32 %v1799_v5, %v1799_v5 }
 0x5a4   :  { %v1804_v35 = vmul.f32 %v1802_v33, %v1799_v5  ;;  %2117 = vtanh.f32 %v1809_v32 }
 0x5a6   :  { %v1806_v51 = vmul.f32 0.044715, %v1804_v35 }
 0x5a8   :  { %v1808_v36 = vadd.f32 %v1806_v51, %v1799_v5 }
 0x5aa   :  { %v1810_v38 = vmul.f32 0.7978846, %v1808_v36  ;;  %v2118_v43 = vpop.eup %2117 }
 0x5ab   :  { %v1813_v6 = vadd.f32 1.0, %v2118_v43 }
 0x5ac   :  { %2119 = vtanh.f32 %v1810_v38 }
 0x5ad   :  { %v1815_v50 = vmul.f32 0.5, %v1813_v6 }
 0x5af   :  { %v1817_v60 = vmul.f32 %v1815_v50, %v1797_v31 }
 0x5b2   :  { %v2120_v42 = vpop.eup %2119 }
 0x5b3   :  { %v1814_v58 = vadd.f32 1.0, %v2120_v42 }
 0x5b5   :  { %v1816_v19 = vmul.f32 0.5, %v1814_v58 }
 0x5b7   :  { %v1818_v39 = vmul.f32 %v1816_v19, %v1799_v5 }
 0x5b9   :  { %v1819_v49 = vpack.c.bf16 %v1818_v39, %v1817_v60 }
 0x5bb   :  { %2022 = vmatmul.msk.bf16.vlgmr.msrb.gmra.mxu0 %vm1856_vm4, %v1819_v49 }
 0x638   :  { %v1869_v7 = vpop.f32.mrf.mxu0 }
 0x639   :  { %v1870_v56 = vadd.f32 %v2076_v13, %v1869_v7 }
 0x63b   :  { %v1874_v3 = vadd.f32 %v1870_v56, %v2910_v27 }
 0x63d   :  { %v1878_v45 = vsel %vm107_vm0, %v1874_v3, 0.0 }
 0x63e   :  { %1879 = vadd.xlane.f32.xlu2 %v1878_v45 }
 0x640   :  { %v1871_v8 = vpop.f32.mrf.mxu0 }
 0x641   :  { %v1872_v9 = vadd.f32 %v2076_v13, %v1871_v8 }
 0x643   :  { %v1875_v63 = vadd.f32 %v1872_v9, %v2918_v30 }
 0x645   :  { %v1881_v21 = vsel %vm107_vm0, %v1875_v63, 0.0 }
 0x646   :  { %1882 = vadd.xlane.f32.xlu0 %v1881_v21 }
 0x6b1   :  { %v1880_v2 = vpop.xlane.xlu2 %1879 }
 0x6b2   :  { %v1884_v37 = vmul.f32 %v1880_v2, %v2925_v41 }
 0x6b4   :  { %v1886_v54 = vsub.f32 %v1874_v3, %v1884_v37 }
 0x6b6   :  { %v1888_v0 = vmul.f32 %v1886_v54, %v1886_v54 }
 0x6b8   :  { %v1890_v28 = vsel %vm107_vm0, %v1888_v0, 0.0 }
 0x6b9   :  { %v1883_v44 = vpop.xlane.xlu0 %1882  ;;  %1891 = vadd.xlane.f32.xlu1 %v1890_v28 }
 0x6ba   :  { %v1885_v27 = vmul.f32 %v1883_v44, %v2925_v41 }
 0x6bc   :  { %v1887_v29 = vsub.f32 %v1875_v63, %v1885_v27 }
 0x6be   :  { %v1889_v46 = vmul.f32 %v1887_v29, %v1887_v29 }
 0x6c0   :  { %v1893_v14 = vsel %vm107_vm0, %v1889_v46, 0.0 }
 0x6c1   :  { %1894 = vadd.xlane.f32.xlu2 %v1893_v14 }
 0x72c   :  { %v1892_v30 = vpop.xlane.xlu1 %1891 }
 0x72d   :  { %v1896_v10 = vmul.f32 %v1892_v30, %v2925_v41 }
 0x72f   :  { %v1898_v15 = vadd.f32 1e-05, %v1896_v10 }
 0x731   :  { %2121 = vrsqrt.f32 %v1898_v15  ;;  %vm1906_vm6 = vweird.f32 %v1898_v15 }
 0x734   :  { %v1895_v17 = vpop.xlane.xlu2 %1894 }
 0x735   :  { %v1897_v59 = vmul.f32 %v1895_v17, %v2925_v41  ;;  %v2078_v41 = vld [vmem:[%s2994_s14] ss:$0 sm:$0xff]  ;;  %s2219_s14 = smov 128  }
 0x737   :  { %v2122_v26 = vpop.eup %2121  ;;  %v1899_v57 = vadd.f32 1e-05, %v1897_v59 }
 0x738   :  { %v1901_v20 = vmul.f32 %v2122_v26, %v1898_v15  ;;  %vm1907_vm5 = vweird.f32 %v2122_v26 }
 0x739   :  { %2123 = vrsqrt.f32 %v1899_v57  ;;  %vm1908_vm7 = vmor %vm1906_vm6, %vm1907_vm5  ;;  %vm1916_vm9 = vweird.f32 %v1899_v57 }
 0x73a   :  { %v1902_v22 = vmul.f32 %v2122_v26, %v1901_v20 }
 0x73c   :  { %v1903_v1 = vmul.f32 0.5, %v1902_v22 }
 0x73e   :  { %v1904_v24 = vsub.f32 1.5, %v1903_v1 }
 0x73f   :  { %v2124_v62 = vpop.eup %2123 }
 0x740   :  { %v1905_v53 = vmul.f32 %v2122_v26, %v1904_v24  ;;  %v1911_v52 = vmul.f32 %v2124_v62, %v1899_v57  ;;  %vm1917_vm8 = vweird.f32 %v2124_v62 }
 0x741   :  { %vm1918_vm10 = vmor %vm1916_vm9, %vm1917_vm8 }
 0x742   :  { %v1909_v61 = vsel %vm1908_vm7, %v2122_v26, %v1905_v53  ;;  %v1912_v34 = vmul.f32 %v2124_v62, %v1911_v52 }
 0x743   :  { %v1920_v47 = vmul.f32 %v1909_v61, %v1886_v54 }
 0x744   :  { %v1913_v23 = vmul.f32 0.5, %v1912_v34 }
 0x745   :  { %v1925_v31 = vmul.f32 %v2077_v48, %v1920_v47 }
 0x746   :  { %v1914_v40 = vsub.f32 1.5, %v1913_v23 }
 0x747   :  { %v1930_v18 = vadd.f32 %v2078_v41, %v1925_v31 }
 0x748   :  { %v1915_v16 = vmul.f32 %v2124_v62, %v1914_v40 }
 0x749   :  { %1932 = vst.msk [vmem:[#allocation7] sm:$0xff] %vm107_vm0, %v1930_v18 }
 0x74a   :  { %v1919_v12 = vsel %vm1918_vm10, %v2124_v62, %v1915_v16 }
 0x74b   :  { %v1921_v4 = vmul.f32 %v1919_v12, %v1887_v29 }
 0x74d   :  { %v1926_v55 = vmul.f32 %v2077_v48, %v1921_v4 }
 0x74f   :  { %v1931_v25 = vadd.f32 %v2078_v41, %v1926_v55 }
 0x751   :  { %1933 = vst.msk [vmem:[#allocation7 + $0x8] sm:$0xff] %vm107_vm0, %v1931_v25 }
 0x752   :  { %1946 = dma.vmem_to_hbm [thread:$0]  %s1939_s16, 256, %s1941_s6, [#allocation4], %s2219_s14, %s2219_s14, %s2215_s5  }
 0x753   :  { %2203 = dma.done.wait [#allocation4], 256  }
 0x754   :  { %2204 = vsyncadd [#allocation4], 4294967040 }
 0x755   :  { %1951 = vsyncpa [#allocation3], 1 }
 0x756   :  { %1952 = vsyncpa [#allocation6], 1 }
 0x757   :  { %1953 = vsyncpa [#allocation4], 1 }

</bundles_post_ra>
